<compile_context>
chip_gen: v6e
topology: v6e:2x2x1
jax: 0.10.0
libtpu: 0.0.40
codegen_flags: <defaults>
</compile_context>

<pallas_src>
import math

import jax
import jax.numpy as jnp
from jax import lax
from jax.experimental import pallas as pl
from jax.experimental.pallas import tpu as pltpu

KH = KW = 7
PAD = 3


def _round_up(v, m):
    return (v + m - 1) // m * m


# --------------------------------------------------------------------------
# Fused kernel: conv+ReLU -> Linear(2C->C) -> Softmax(frames) -> weighted sum
# One grid step per batch element; all nf frames handled by batched vreg ops
# and block-diagonal MXU dots.
# --------------------------------------------------------------------------
def _make_fused_kernel(nf, C, H, W, k_pad):
    HW = H * W
    NTAP = KH * KW
    T = NTAP + 1                      # 49 conv taps + 1 "ones" row (conv bias)

    def kernel(mflat_ref, x_ref, wconv_ref, wx_ref, wm_ref, o_ref,
               p_ref, logits_ref):
        # mflat_ref  : (1, nf, LF)      flattened H-padded mask rows (front pad = PAD)
        # x_ref      : (1, nf*C, HW)    frame-blocked rows: row n*C+c = x[n, c, :]
        # wconv_ref  : (nf*C, k_pad)    block conv weight: [n*C+c, t*nf+n] = w[c,t]
        # wx_ref     : (nf*C, nf*C)     block-diag of lin_w[:, :C]
        # wm_ref     : (nf*C, nf*C)     block-diag of lin_w[:, C:]
        # o_ref      : (1, C, HW)       merged output (NCHW, spatial flattened)
        # p_ref      : (k_pad, HW) VMEM im2col scratch, row t*nf + n
        # logits_ref : (nf*C, HW) VMEM  m_out logits (keeps softmax spill-free)
        mf = mflat_ref[0]                                       # (nf, LF)

        # Width-halo lane masks (per kw): output column w is valid for tap kw
        # iff 0 <= w + kw - PAD < W (the flat-shift trick wraps across rows
        # otherwise; those lanes are zeroed).  Built once per grid step.
        lane_w = lax.broadcasted_iota(jnp.int32, (1, HW), 1) % W
        col_mask = [
            ((lane_w + kw >= PAD) & (lane_w + kw < W + PAD)).astype(jnp.float32)
            for kw in range(KW)
        ]

        # ---- im2col: per tap, ONE (nf, HW) lane-shifted window covering all
        #      frames, one mask multiply, one 4-sublane scratch store.
        for kh in range(KH):
            for kw in range(KW):
                t = kh * KW + kw
                s = kh * W + kw                       # uniform flat shift
                win = mf[:, s:s + HW]                 # (nf, HW)
                if kw != PAD:                         # center column needs no mask
                    win = win * col_mask[kw]
                p_ref[t * nf:(t + 1) * nf, :] = win   # rows t*nf .. t*nf+nf-1

        # Folded conv-bias "ones" rows (one per frame) + K-alignment padding.
        p_ref[NTAP * nf:T * nf, :] = jnp.ones((nf, HW), jnp.float32)
        if k_pad > T * nf:
            p_ref[T * nf:k_pad, :] = jnp.zeros((k_pad - T * nf, HW), jnp.float32)

        # ---- Conv(1->C,7x7) + bias + ReLU for ALL frames: one block-diagonal
        #      MXU dot.  Row n*C+c of the result is m_conv[frame n, channel c].
        m_big = jnp.maximum(
            jnp.dot(wconv_ref[...], p_ref[...],
                    preferred_element_type=jnp.float32), 0.0)   # (nf*C, HW)

        # ---- m_out Linear on cat([x, m_conv]): two block-diag dots, no concat.
        #      NOTE: lin bias dropped -- identical across frames, cancels in the
        #      frame softmax below.
        x_big = x_ref[0]                                        # (nf*C, HW)
        logits = (jnp.dot(wx_ref[...], x_big, preferred_element_type=jnp.float32)
                  + jnp.dot(wm_ref[...], m_big, preferred_element_type=jnp.float32))
        logits_ref[...] = logits                                # park in VMEM

        # ---- Streaming softmax over the nf frames + weighted sum of x.
        # Pass 1: running max (frame slices are free 8-aligned sublane picks).
        mx = logits[0:C, :]
        for n in range(1, nf):
            mx = jnp.maximum(mx, logits[n * C:(n + 1) * C, :])

        # Pass 2: one frame at a time, accumulate denominator and x-weighted sum.
        den = jnp.zeros((C, HW), jnp.float32)
        acc = jnp.zeros((C, HW), jnp.float32)
        for n in range(nf):
            e = jnp.exp(logits_ref[n * C:(n + 1) * C, :] - mx)
            den = den + e
            acc = acc + x_ref[0, n * C:(n + 1) * C, :] * e

        # EUP approximate reciprocal + one Newton step (f32-level accuracy),
        # applied once to the accumulated sum.
        inv = pl.reciprocal(den, approx=True)
        inv = inv * (2.0 - den * inv)
        o_ref[0] = acc * inv

    return kernel


# --------------------------------------------------------------------------
# Forward wrapper: only free reshapes + tiny mask/weight prep outside kernel.
# --------------------------------------------------------------------------
def vil_view_merge_forward(x, m, params):
    """x: (B, nf, C, H, W) f32, m: (B, nf, H, W) f32 -> (B, C, H, W) f32."""
    B, nf, C, H, W = x.shape
    HW = H * W
    NTAP = KH * KW
    T = NTAP + 1
    k_pad = _round_up(T * nf, 8)          # im2col K rows, MXU-aligned
    Hp = H + 2 * PAD
    # Flat, H-padded mask row length: front pad of PAD zeros makes tap (kh,kw)
    # start at flat offset kh*W + kw; tail pad keeps every window in bounds.
    LF = _round_up(max(PAD + Hp * W, (KH - 1) * W + (KW - 1) + HW), 128)
    # Static guards (review correctness concern): largest tap window must fit.
    assert (KH - 1) * W + (KW - 1) + HW <= LF
    assert HW % 128 == 0 and C % 8 == 0

    # ---- wrapper-side prep (free reshapes, tiny mask padding) --------------
    x_big = x.reshape(B, nf * C, HW)                              # free reshape
    m_pad = jnp.pad(m, ((0, 0), (0, 0), (PAD, PAD), (0, 0)))      # tiny
    m_flat = m_pad.reshape(B, nf, Hp * W)                         # free
    m_flat = jnp.pad(m_flat, ((0, 0), (0, 0), (PAD, LF - PAD - Hp * W)))

    # Block-structured conv weight: col t*nf + n of row n*C + c is w[c, t]
    # (col (NTAP)*nf + n carries the folded conv bias, matched by the in-kernel
    # "ones" rows).
    wtap = jnp.concatenate(
        [params["conv_w"].reshape(C, NTAP), params["conv_b"].reshape(C, 1)],
        axis=1)                                                   # (C, T)
    eye = jnp.eye(nf, dtype=jnp.float32)
    w_conv_big = jnp.einsum("ct,nm->nctm", wtap, eye).reshape(nf * C, T * nf)
    if k_pad > T * nf:
        w_conv_big = jnp.pad(w_conv_big, ((0, 0), (0, k_pad - T * nf)))
    # Block-diagonal halves of the m_out Linear weight (x-half, m-half).
    wx_big = jnp.kron(eye, params["lin_w"][:, :C])                # (nf*C, nf*C)
    wm_big = jnp.kron(eye, params["lin_w"][:, C:])                # (nf*C, nf*C)
    # lin_b intentionally dropped: frame-invariant bias cancels in the softmax.

    kernel = _make_fused_kernel(nf, C, H, W, k_pad)
    out = pl.pallas_call(
        kernel,
        out_shape=jax.ShapeDtypeStruct((B, C, HW), jnp.float32),
        grid=(B,),
        in_specs=[
            pl.BlockSpec((1, nf, LF), lambda b: (b, 0, 0)),
            pl.BlockSpec((1, nf * C, HW), lambda b: (b, 0, 0)),
            pl.BlockSpec((nf * C, k_pad), lambda b: (0, 0)),
            pl.BlockSpec((nf * C, nf * C), lambda b: (0, 0)),
            pl.BlockSpec((nf * C, nf * C), lambda b: (0, 0)),
        ],
        out_specs=pl.BlockSpec((1, C, HW), lambda b: (b, 0, 0)),
        scratch_shapes=[pltpu.VMEM((k_pad, HW), jnp.float32),
                        pltpu.VMEM((nf * C, HW), jnp.float32)],
        compiler_params=pltpu.CompilerParams(
            dimension_semantics=("parallel",)),
    )(m_flat, x_big, w_conv_big, wx_big, wm_big)

    return out.reshape(B, C, H, W)                                # free


# --------------------------------------------------------------------------
# Pure-JAX reference (same math, faithful to the PyTorch module).
# --------------------------------------------------------------------------
def reference_forward(x, m, params):
    B, nf, C, H, W = x.shape
    m4 = m.reshape(B * nf, 1, H, W)
    mc = lax.conv_general_dilated(
        m4, params["conv_w"], (1, 1), [(PAD, PAD), (PAD, PAD)],
        dimension_numbers=("NCHW", "OIHW", "NCHW"))
    mc = jax.nn.relu(mc + params["conv_b"][None, :, None, None])
    mc = mc.reshape(B, nf, C, H, W)
    m_seq = jnp.transpose(mc, (0, 3, 4, 1, 2)).reshape(B * H * W, nf, C)
    x_seq = jnp.transpose(x, (0, 3, 4, 1, 2)).reshape(B * H * W, nf, C)
    cat = jnp.concatenate([x_seq, m_seq], axis=-1)
    logits = cat @ params["lin_w"].T + params["lin_b"]
    attn = jax.nn.softmax(logits, axis=1)
    out = jnp.sum(x_seq * attn, axis=1)
    return jnp.transpose(out.reshape(B, H, W, C), (0, 3, 1, 2))


if __name__ == "__main__":
    B, nf, C, H, W = 2, 4, 32, 16, 16

    key = jax.random.PRNGKey(0)
    k_x, k_m, k_cw, k_cb, k_lw, k_lb = jax.random.split(key, 6)

    x = jax.random.normal(k_x, (B, nf, C, H, W), jnp.float32)
    m = jax.random.normal(k_m, (B, nf, H, W), jnp.float32)

    # Parameters (mirror _init_weights scales; biases made non-zero so the
    # folded conv-bias path and the softmax bias-cancellation are exercised).
    fan_out = KH * KW * C
    params = {
        "conv_w": jax.random.normal(k_cw, (C, 1, KH, KW), jnp.float32)
                  * math.sqrt(2.0 / fan_out),
        "conv_b": jax.random.normal(k_cb, (C,), jnp.float32) * 0.05,
        "lin_w": jax.random.truncated_normal(
            k_lw, -2.0, 2.0, (C, 2 * C), jnp.float32) * 0.02,
        "lin_b": jax.random.normal(k_lb, (C,), jnp.float32) * 0.05,
    }

    out = jax.block_until_ready(vil_view_merge_forward(x, m, params))
    ref = jax.block_until_ready(reference_forward(x, m, params))

    assert out.shape == (B, C, H, W)
    assert jnp.allclose(out, ref, atol=2e-3, rtol=2e-3), "mismatch vs reference"

    print("KERNEL_OK")
</pallas_src>

<mosaic_0001>
module attributes {stable_mosaic.version = 11 : i64} {
  func.func @kernel(%arg0: i32, %arg1: memref<1x4x384xf32, #tpu.memory_space<vmem>>, %arg2: memref<1x128x256xf32, #tpu.memory_space<vmem>>, %arg3: memref<128x200xf32, #tpu.memory_space<vmem>>, %arg4: memref<128x128xf32, #tpu.memory_space<vmem>>, %arg5: memref<128x128xf32, #tpu.memory_space<vmem>>, %arg6: memref<1x32x256xf32, #tpu.memory_space<vmem>>, %arg7: memref<200x256xf32, #tpu.memory_space<vmem>>, %arg8: memref<128x256xf32, #tpu.memory_space<vmem>>) attributes {dimension_semantics = [#tpu.dimension_semantics<parallel>], iteration_bounds = array<i64: 2>, scalar_prefetch = 0 : i64, scratch_operands = 2 : i64, tpu.core_type = #tpu.core_type<tc>, window_params = [{transform_indices = @transform_0, window_bounds = array<i64: 1, 4, 384>}, {transform_indices = @transform_1, window_bounds = array<i64: 1, 128, 256>}, {pipeline_mode = #tpu.pipeline_mode<synchronous>, transform_indices = @transform_2, window_bounds = array<i64: 128, 200>}, {pipeline_mode = #tpu.pipeline_mode<synchronous>, transform_indices = @transform_3, window_bounds = array<i64: 128, 128>}, {pipeline_mode = #tpu.pipeline_mode<synchronous>, transform_indices = @transform_4, window_bounds = array<i64: 128, 128>}, {transform_indices = @transform_5, window_bounds = array<i64: 1, 32, 256>}]} {
    %c0 = arith.constant 0 : index
    %c0_0 = arith.constant 0 : index
    %c0_1 = arith.constant 0 : index
    %0 = vector.load %arg1[%c0, %c0_0, %c0_1] : memref<1x4x384xf32, #tpu.memory_space<vmem>>, vector<1x4x384xf32>
    %1 = vector.shape_cast %0 : vector<1x4x384xf32> to vector<4x384xf32>
    %2 = tpu.iota {dimensions = array<i32: 1>} : vector<1x256xi32>
    %c16_i32 = arith.constant 16 : i32
    %c0_i32 = arith.constant 0 : i32
    %3 = arith.cmpi eq, %c16_i32, %c0_i32 : i32
    %c1_i32 = arith.constant 1 : i32
    %4 = arith.select %3, %c1_i32, %c16_i32 : i32
    %5 = vector.broadcast %4 : i32 to vector<1x256xi32>
    %6 = arith.remsi %2, %5 : vector<1x256xi32>
    %c0_i32_2 = arith.constant 0 : i32
    %7 = vector.broadcast %c0_i32_2 : i32 to vector<1x256xi32>
    %8 = arith.cmpi ne, %6, %7 : vector<1x256xi32>
    %c0_i32_3 = arith.constant 0 : i32
    %9 = vector.broadcast %c0_i32_3 : i32 to vector<1x256xi32>
    %10 = arith.cmpi slt, %6, %9 : vector<1x256xi32>
    %c0_i32_4 = arith.constant 0 : i32
    %11 = arith.cmpi slt, %4, %c0_i32_4 : i32
    %12 = vector.broadcast %11 : i1 to vector<1x256xi1>
    %13 = vector.broadcast %12 : vector<1x256xi1> to vector<1x256xi1>
    %14 = arith.xori %10, %13 : vector<1x256xi1>
    %15 = arith.andi %14, %8 : vector<1x256xi1>
    %16 = vector.broadcast %4 : i32 to vector<1x256xi32>
    %17 = arith.addi %6, %16 : vector<1x256xi32>
    %18 = arith.select %15, %17, %6 : vector<1x256xi1>, vector<1x256xi32>
    %c0_i32_5 = arith.constant 0 : i32
    %19 = vector.broadcast %c0_i32_5 : i32 to vector<1x256xi32>
    %20 = arith.addi %18, %19 : vector<1x256xi32>
    %c3_i32 = arith.constant 3 : i32
    %21 = vector.broadcast %c3_i32 : i32 to vector<1x256xi32>
    %22 = arith.cmpi sge, %20, %21 : vector<1x256xi32>
    %c0_i32_6 = arith.constant 0 : i32
    %23 = vector.broadcast %c0_i32_6 : i32 to vector<1x256xi32>
    %24 = arith.addi %18, %23 : vector<1x256xi32>
    %c19_i32 = arith.constant 19 : i32
    %25 = vector.broadcast %c19_i32 : i32 to vector<1x256xi32>
    %26 = arith.cmpi slt, %24, %25 : vector<1x256xi32>
    %27 = arith.andi %22, %26 : vector<1x256xi1>
    %28 = arith.extui %27 : vector<1x256xi1> to vector<1x256xi32>
    %29 = arith.sitofp %28 : vector<1x256xi32> to vector<1x256xf32>
    %c1_i32_7 = arith.constant 1 : i32
    %30 = vector.broadcast %c1_i32_7 : i32 to vector<1x256xi32>
    %31 = arith.addi %18, %30 : vector<1x256xi32>
    %c3_i32_8 = arith.constant 3 : i32
    %32 = vector.broadcast %c3_i32_8 : i32 to vector<1x256xi32>
    %33 = arith.cmpi sge, %31, %32 : vector<1x256xi32>
    %c1_i32_9 = arith.constant 1 : i32
    %34 = vector.broadcast %c1_i32_9 : i32 to vector<1x256xi32>
    %35 = arith.addi %18, %34 : vector<1x256xi32>
    %c19_i32_10 = arith.constant 19 : i32
    %36 = vector.broadcast %c19_i32_10 : i32 to vector<1x256xi32>
    %37 = arith.cmpi slt, %35, %36 : vector<1x256xi32>
    %38 = arith.andi %33, %37 : vector<1x256xi1>
    %39 = arith.extui %38 : vector<1x256xi1> to vector<1x256xi32>
    %40 = arith.sitofp %39 : vector<1x256xi32> to vector<1x256xf32>
    %c2_i32 = arith.constant 2 : i32
    %41 = vector.broadcast %c2_i32 : i32 to vector<1x256xi32>
    %42 = arith.addi %18, %41 : vector<1x256xi32>
    %c3_i32_11 = arith.constant 3 : i32
    %43 = vector.broadcast %c3_i32_11 : i32 to vector<1x256xi32>
    %44 = arith.cmpi sge, %42, %43 : vector<1x256xi32>
    %c2_i32_12 = arith.constant 2 : i32
    %45 = vector.broadcast %c2_i32_12 : i32 to vector<1x256xi32>
    %46 = arith.addi %18, %45 : vector<1x256xi32>
    %c19_i32_13 = arith.constant 19 : i32
    %47 = vector.broadcast %c19_i32_13 : i32 to vector<1x256xi32>
    %48 = arith.cmpi slt, %46, %47 : vector<1x256xi32>
    %49 = arith.andi %44, %48 : vector<1x256xi1>
    %50 = arith.extui %49 : vector<1x256xi1> to vector<1x256xi32>
    %51 = arith.sitofp %50 : vector<1x256xi32> to vector<1x256xf32>
    %c4_i32 = arith.constant 4 : i32
    %52 = vector.broadcast %c4_i32 : i32 to vector<1x256xi32>
    %53 = arith.addi %18, %52 : vector<1x256xi32>
    %c3_i32_14 = arith.constant 3 : i32
    %54 = vector.broadcast %c3_i32_14 : i32 to vector<1x256xi32>
    %55 = arith.cmpi sge, %53, %54 : vector<1x256xi32>
    %c4_i32_15 = arith.constant 4 : i32
    %56 = vector.broadcast %c4_i32_15 : i32 to vector<1x256xi32>
    %57 = arith.addi %18, %56 : vector<1x256xi32>
    %c19_i32_16 = arith.constant 19 : i32
    %58 = vector.broadcast %c19_i32_16 : i32 to vector<1x256xi32>
    %59 = arith.cmpi slt, %57, %58 : vector<1x256xi32>
    %60 = arith.andi %55, %59 : vector<1x256xi1>
    %61 = arith.extui %60 : vector<1x256xi1> to vector<1x256xi32>
    %62 = arith.sitofp %61 : vector<1x256xi32> to vector<1x256xf32>
    %c5_i32 = arith.constant 5 : i32
    %63 = vector.broadcast %c5_i32 : i32 to vector<1x256xi32>
    %64 = arith.addi %18, %63 : vector<1x256xi32>
    %c3_i32_17 = arith.constant 3 : i32
    %65 = vector.broadcast %c3_i32_17 : i32 to vector<1x256xi32>
    %66 = arith.cmpi sge, %64, %65 : vector<1x256xi32>
    %c5_i32_18 = arith.constant 5 : i32
    %67 = vector.broadcast %c5_i32_18 : i32 to vector<1x256xi32>
    %68 = arith.addi %18, %67 : vector<1x256xi32>
    %c19_i32_19 = arith.constant 19 : i32
    %69 = vector.broadcast %c19_i32_19 : i32 to vector<1x256xi32>
    %70 = arith.cmpi slt, %68, %69 : vector<1x256xi32>
    %71 = arith.andi %66, %70 : vector<1x256xi1>
    %72 = arith.extui %71 : vector<1x256xi1> to vector<1x256xi32>
    %73 = arith.sitofp %72 : vector<1x256xi32> to vector<1x256xf32>
    %c6_i32 = arith.constant 6 : i32
    %74 = vector.broadcast %c6_i32 : i32 to vector<1x256xi32>
    %75 = arith.addi %18, %74 : vector<1x256xi32>
    %c3_i32_20 = arith.constant 3 : i32
    %76 = vector.broadcast %c3_i32_20 : i32 to vector<1x256xi32>
    %77 = arith.cmpi sge, %75, %76 : vector<1x256xi32>
    %c6_i32_21 = arith.constant 6 : i32
    %78 = vector.broadcast %c6_i32_21 : i32 to vector<1x256xi32>
    %79 = arith.addi %18, %78 : vector<1x256xi32>
    %c19_i32_22 = arith.constant 19 : i32
    %80 = vector.broadcast %c19_i32_22 : i32 to vector<1x256xi32>
    %81 = arith.cmpi slt, %79, %80 : vector<1x256xi32>
    %82 = arith.andi %77, %81 : vector<1x256xi1>
    %83 = arith.extui %82 : vector<1x256xi1> to vector<1x256xi32>
    %84 = arith.sitofp %83 : vector<1x256xi32> to vector<1x256xf32>
    %85 = vector.extract_strided_slice %1 {offsets = [0, 0], sizes = [4, 256], strides = [1, 1]} : vector<4x384xf32> to vector<4x256xf32>
    %86 = vector.broadcast %29 : vector<1x256xf32> to vector<4x256xf32>
    %87 = arith.mulf %85, %86 : vector<4x256xf32>
    %c0_23 = arith.constant 0 : index
    %c0_24 = arith.constant 0 : index
    %88 = vector.load %arg7[%c0_23, %c0_24] : memref<200x256xf32, #tpu.memory_space<vmem>>, vector<4x256xf32>
    tpu.vector_store %arg7[%c0_23, %c0_24], %87 {strides = array<i32>} : memref<200x256xf32, #tpu.memory_space<vmem>>, vector<4x256xf32>,
    %89 = vector.extract_strided_slice %1 {offsets = [0, 1], sizes = [4, 256], strides = [1, 1]} : vector<4x384xf32> to vector<4x256xf32>
    %90 = vector.broadcast %40 : vector<1x256xf32> to vector<4x256xf32>
    %91 = arith.mulf %89, %90 : vector<4x256xf32>
    %c4 = arith.constant 4 : index
    %c0_25 = arith.constant 0 : index
    %92 = vector.load %arg7[%c4, %c0_25] : memref<200x256xf32, #tpu.memory_space<vmem>>, vector<4x256xf32>
    tpu.vector_store %arg7[%c4, %c0_25], %91 {strides = array<i32>} : memref<200x256xf32, #tpu.memory_space<vmem>>, vector<4x256xf32>,
    %93 = vector.extract_strided_slice %1 {offsets = [0, 2], sizes = [4, 256], strides = [1, 1]} : vector<4x384xf32> to vector<4x256xf32>
    %94 = vector.broadcast %51 : vector<1x256xf32> to vector<4x256xf32>
    %95 = arith.mulf %93, %94 : vector<4x256xf32>
    %c8 = arith.constant 8 : index
    %c0_26 = arith.constant 0 : index
    %96 = vector.load %arg7[%c8, %c0_26] : memref<200x256xf32, #tpu.memory_space<vmem>>, vector<4x256xf32>
    tpu.vector_store %arg7[%c8, %c0_26], %95 {strides = array<i32>} : memref<200x256xf32, #tpu.memory_space<vmem>>, vector<4x256xf32>,
    %97 = vector.extract_strided_slice %1 {offsets = [0, 3], sizes = [4, 256], strides = [1, 1]} : vector<4x384xf32> to vector<4x256xf32>
    %c12 = arith.constant 12 : index
    %c0_27 = arith.constant 0 : index
    %98 = vector.load %arg7[%c12, %c0_27] : memref<200x256xf32, #tpu.memory_space<vmem>>, vector<4x256xf32>
    tpu.vector_store %arg7[%c12, %c0_27], %97 {strides = array<i32>} : memref<200x256xf32, #tpu.memory_space<vmem>>, vector<4x256xf32>,
    %99 = vector.extract_strided_slice %1 {offsets = [0, 4], sizes = [4, 256], strides = [1, 1]} : vector<4x384xf32> to vector<4x256xf32>
    %100 = vector.broadcast %62 : vector<1x256xf32> to vector<4x256xf32>
    %101 = arith.mulf %99, %100 : vector<4x256xf32>
    %c16 = arith.constant 16 : index
    %c0_28 = arith.constant 0 : index
    %102 = vector.load %arg7[%c16, %c0_28] : memref<200x256xf32, #tpu.memory_space<vmem>>, vector<4x256xf32>
    tpu.vector_store %arg7[%c16, %c0_28], %101 {strides = array<i32>} : memref<200x256xf32, #tpu.memory_space<vmem>>, vector<4x256xf32>,
    %103 = vector.extract_strided_slice %1 {offsets = [0, 5], sizes = [4, 256], strides = [1, 1]} : vector<4x384xf32> to vector<4x256xf32>
    %104 = vector.broadcast %73 : vector<1x256xf32> to vector<4x256xf32>
    %105 = arith.mulf %103, %104 : vector<4x256xf32>
    %c20 = arith.constant 20 : index
    %c0_29 = arith.constant 0 : index
    %106 = vector.load %arg7[%c20, %c0_29] : memref<200x256xf32, #tpu.memory_space<vmem>>, vector<4x256xf32>
    tpu.vector_store %arg7[%c20, %c0_29], %105 {strides = array<i32>} : memref<200x256xf32, #tpu.memory_space<vmem>>, vector<4x256xf32>,
    %107 = vector.extract_strided_slice %1 {offsets = [0, 6], sizes = [4, 256], strides = [1, 1]} : vector<4x384xf32> to vector<4x256xf32>
    %108 = vector.broadcast %84 : vector<1x256xf32> to vector<4x256xf32>
    %109 = arith.mulf %107, %108 : vector<4x256xf32>
    %c24 = arith.constant 24 : index
    %c0_30 = arith.constant 0 : index
    %110 = vector.load %arg7[%c24, %c0_30] : memref<200x256xf32, #tpu.memory_space<vmem>>, vector<4x256xf32>
    tpu.vector_store %arg7[%c24, %c0_30], %109 {strides = array<i32>} : memref<200x256xf32, #tpu.memory_space<vmem>>, vector<4x256xf32>,
    %111 = vector.extract_strided_slice %1 {offsets = [0, 16], sizes = [4, 256], strides = [1, 1]} : vector<4x384xf32> to vector<4x256xf32>
    %112 = vector.broadcast %29 : vector<1x256xf32> to vector<4x256xf32>
    %113 = arith.mulf %111, %112 : vector<4x256xf32>
    %c28 = arith.constant 28 : index
    %c0_31 = arith.constant 0 : index
    %114 = vector.load %arg7[%c28, %c0_31] : memref<200x256xf32, #tpu.memory_space<vmem>>, vector<4x256xf32>
    tpu.vector_store %arg7[%c28, %c0_31], %113 {strides = array<i32>} : memref<200x256xf32, #tpu.memory_space<vmem>>, vector<4x256xf32>,
    %115 = vector.extract_strided_slice %1 {offsets = [0, 17], sizes = [4, 256], strides = [1, 1]} : vector<4x384xf32> to vector<4x256xf32>
    %116 = vector.broadcast %40 : vector<1x256xf32> to vector<4x256xf32>
    %117 = arith.mulf %115, %116 : vector<4x256xf32>
    %c32 = arith.constant 32 : index
    %c0_32 = arith.constant 0 : index
    %118 = vector.load %arg7[%c32, %c0_32] : memref<200x256xf32, #tpu.memory_space<vmem>>, vector<4x256xf32>
    tpu.vector_store %arg7[%c32, %c0_32], %117 {strides = array<i32>} : memref<200x256xf32, #tpu.memory_space<vmem>>, vector<4x256xf32>,
    %119 = vector.extract_strided_slice %1 {offsets = [0, 18], sizes = [4, 256], strides = [1, 1]} : vector<4x384xf32> to vector<4x256xf32>
    %120 = vector.broadcast %51 : vector<1x256xf32> to vector<4x256xf32>
    %121 = arith.mulf %119, %120 : vector<4x256xf32>
    %c36 = arith.constant 36 : index
    %c0_33 = arith.constant 0 : index
    %122 = vector.load %arg7[%c36, %c0_33] : memref<200x256xf32, #tpu.memory_space<vmem>>, vector<4x256xf32>
    tpu.vector_store %arg7[%c36, %c0_33], %121 {strides = array<i32>} : memref<200x256xf32, #tpu.memory_space<vmem>>, vector<4x256xf32>,
    %123 = vector.extract_strided_slice %1 {offsets = [0, 19], sizes = [4, 256], strides = [1, 1]} : vector<4x384xf32> to vector<4x256xf32>
    %c40 = arith.constant 40 : index
    %c0_34 = arith.constant 0 : index
    %124 = vector.load %arg7[%c40, %c0_34] : memref<200x256xf32, #tpu.memory_space<vmem>>, vector<4x256xf32>
    tpu.vector_store %arg7[%c40, %c0_34], %123 {strides = array<i32>} : memref<200x256xf32, #tpu.memory_space<vmem>>, vector<4x256xf32>,
    %125 = vector.extract_strided_slice %1 {offsets = [0, 20], sizes = [4, 256], strides = [1, 1]} : vector<4x384xf32> to vector<4x256xf32>
    %126 = vector.broadcast %62 : vector<1x256xf32> to vector<4x256xf32>
    %127 = arith.mulf %125, %126 : vector<4x256xf32>
    %c44 = arith.constant 44 : index
    %c0_35 = arith.constant 0 : index
    %128 = vector.load %arg7[%c44, %c0_35] : memref<200x256xf32, #tpu.memory_space<vmem>>, vector<4x256xf32>
    tpu.vector_store %arg7[%c44, %c0_35], %127 {strides = array<i32>} : memref<200x256xf32, #tpu.memory_space<vmem>>, vector<4x256xf32>,
    %129 = vector.extract_strided_slice %1 {offsets = [0, 21], sizes = [4, 256], strides = [1, 1]} : vector<4x384xf32> to vector<4x256xf32>
    %130 = vector.broadcast %73 : vector<1x256xf32> to vector<4x256xf32>
    %131 = arith.mulf %129, %130 : vector<4x256xf32>
    %c48 = arith.constant 48 : index
    %c0_36 = arith.constant 0 : index
    %132 = vector.load %arg7[%c48, %c0_36] : memref<200x256xf32, #tpu.memory_space<vmem>>, vector<4x256xf32>
    tpu.vector_store %arg7[%c48, %c0_36], %131 {strides = array<i32>} : memref<200x256xf32, #tpu.memory_space<vmem>>, vector<4x256xf32>,
    %133 = vector.extract_strided_slice %1 {offsets = [0, 22], sizes = [4, 256], strides = [1, 1]} : vector<4x384xf32> to vector<4x256xf32>
    %134 = vector.broadcast %84 : vector<1x256xf32> to vector<4x256xf32>
    %135 = arith.mulf %133, %134 : vector<4x256xf32>
    %c52 = arith.constant 52 : index
    %c0_37 = arith.constant 0 : index
    %136 = vector.load %arg7[%c52, %c0_37] : memref<200x256xf32, #tpu.memory_space<vmem>>, vector<4x256xf32>
    tpu.vector_store %arg7[%c52, %c0_37], %135 {strides = array<i32>} : memref<200x256xf32, #tpu.memory_space<vmem>>, vector<4x256xf32>,
    %137 = vector.extract_strided_slice %1 {offsets = [0, 32], sizes = [4, 256], strides = [1, 1]} : vector<4x384xf32> to vector<4x256xf32>
    %138 = vector.broadcast %29 : vector<1x256xf32> to vector<4x256xf32>
    %139 = arith.mulf %137, %138 : vector<4x256xf32>
    %c56 = arith.constant 56 : index
    %c0_38 = arith.constant 0 : index
    %140 = vector.load %arg7[%c56, %c0_38] : memref<200x256xf32, #tpu.memory_space<vmem>>, vector<4x256xf32>
    tpu.vector_store %arg7[%c56, %c0_38], %139 {strides = array<i32>} : memref<200x256xf32, #tpu.memory_space<vmem>>, vector<4x256xf32>,
    %141 = vector.extract_strided_slice %1 {offsets = [0, 33], sizes = [4, 256], strides = [1, 1]} : vector<4x384xf32> to vector<4x256xf32>
    %142 = vector.broadcast %40 : vector<1x256xf32> to vector<4x256xf32>
    %143 = arith.mulf %141, %142 : vector<4x256xf32>
    %c60 = arith.constant 60 : index
    %c0_39 = arith.constant 0 : index
    %144 = vector.load %arg7[%c60, %c0_39] : memref<200x256xf32, #tpu.memory_space<vmem>>, vector<4x256xf32>
    tpu.vector_store %arg7[%c60, %c0_39], %143 {strides = array<i32>} : memref<200x256xf32, #tpu.memory_space<vmem>>, vector<4x256xf32>,
    %145 = vector.extract_strided_slice %1 {offsets = [0, 34], sizes = [4, 256], strides = [1, 1]} : vector<4x384xf32> to vector<4x256xf32>
    %146 = vector.broadcast %51 : vector<1x256xf32> to vector<4x256xf32>
    %147 = arith.mulf %145, %146 : vector<4x256xf32>
    %c64 = arith.constant 64 : index
    %c0_40 = arith.constant 0 : index
    %148 = vector.load %arg7[%c64, %c0_40] : memref<200x256xf32, #tpu.memory_space<vmem>>, vector<4x256xf32>
    tpu.vector_store %arg7[%c64, %c0_40], %147 {strides = array<i32>} : memref<200x256xf32, #tpu.memory_space<vmem>>, vector<4x256xf32>,
    %149 = vector.extract_strided_slice %1 {offsets = [0, 35], sizes = [4, 256], strides = [1, 1]} : vector<4x384xf32> to vector<4x256xf32>
    %c68 = arith.constant 68 : index
    %c0_41 = arith.constant 0 : index
    %150 = vector.load %arg7[%c68, %c0_41] : memref<200x256xf32, #tpu.memory_space<vmem>>, vector<4x256xf32>
    tpu.vector_store %arg7[%c68, %c0_41], %149 {strides = array<i32>} : memref<200x256xf32, #tpu.memory_space<vmem>>, vector<4x256xf32>,
    %151 = vector.extract_strided_slice %1 {offsets = [0, 36], sizes = [4, 256], strides = [1, 1]} : vector<4x384xf32> to vector<4x256xf32>
    %152 = vector.broadcast %62 : vector<1x256xf32> to vector<4x256xf32>
    %153 = arith.mulf %151, %152 : vector<4x256xf32>
    %c72 = arith.constant 72 : index
    %c0_42 = arith.constant 0 : index
    %154 = vector.load %arg7[%c72, %c0_42] : memref<200x256xf32, #tpu.memory_space<vmem>>, vector<4x256xf32>
    tpu.vector_store %arg7[%c72, %c0_42], %153 {strides = array<i32>} : memref<200x256xf32, #tpu.memory_space<vmem>>, vector<4x256xf32>,
    %155 = vector.extract_strided_slice %1 {offsets = [0, 37], sizes = [4, 256], strides = [1, 1]} : vector<4x384xf32> to vector<4x256xf32>
    %156 = vector.broadcast %73 : vector<1x256xf32> to vector<4x256xf32>
    %157 = arith.mulf %155, %156 : vector<4x256xf32>
    %c76 = arith.constant 76 : index
    %c0_43 = arith.constant 0 : index
    %158 = vector.load %arg7[%c76, %c0_43] : memref<200x256xf32, #tpu.memory_space<vmem>>, vector<4x256xf32>
    tpu.vector_store %arg7[%c76, %c0_43], %157 {strides = array<i32>} : memref<200x256xf32, #tpu.memory_space<vmem>>, vector<4x256xf32>,
    %159 = vector.extract_strided_slice %1 {offsets = [0, 38], sizes = [4, 256], strides = [1, 1]} : vector<4x384xf32> to vector<4x256xf32>
    %160 = vector.broadcast %84 : vector<1x256xf32> to vector<4x256xf32>
    %161 = arith.mulf %159, %160 : vector<4x256xf32>
    %c80 = arith.constant 80 : index
    %c0_44 = arith.constant 0 : index
    %162 = vector.load %arg7[%c80, %c0_44] : memref<200x256xf32, #tpu.memory_space<vmem>>, vector<4x256xf32>
    tpu.vector_store %arg7[%c80, %c0_44], %161 {strides = array<i32>} : memref<200x256xf32, #tpu.memory_space<vmem>>, vector<4x256xf32>,
    %163 = vector.extract_strided_slice %1 {offsets = [0, 48], sizes = [4, 256], strides = [1, 1]} : vector<4x384xf32> to vector<4x256xf32>
    %164 = vector.broadcast %29 : vector<1x256xf32> to vector<4x256xf32>
    %165 = arith.mulf %163, %164 : vector<4x256xf32>
    %c84 = arith.constant 84 : index
    %c0_45 = arith.constant 0 : index
    %166 = vector.load %arg7[%c84, %c0_45] : memref<200x256xf32, #tpu.memory_space<vmem>>, vector<4x256xf32>
    tpu.vector_store %arg7[%c84, %c0_45], %165 {strides = array<i32>} : memref<200x256xf32, #tpu.memory_space<vmem>>, vector<4x256xf32>,
    %167 = vector.extract_strided_slice %1 {offsets = [0, 49], sizes = [4, 256], strides = [1, 1]} : vector<4x384xf32> to vector<4x256xf32>
    %168 = vector.broadcast %40 : vector<1x256xf32> to vector<4x256xf32>
    %169 = arith.mulf %167, %168 : vector<4x256xf32>
    %c88 = arith.constant 88 : index
    %c0_46 = arith.constant 0 : index
    %170 = vector.load %arg7[%c88, %c0_46] : memref<200x256xf32, #tpu.memory_space<vmem>>, vector<4x256xf32>
    tpu.vector_store %arg7[%c88, %c0_46], %169 {strides = array<i32>} : memref<200x256xf32, #tpu.memory_space<vmem>>, vector<4x256xf32>,
    %171 = vector.extract_strided_slice %1 {offsets = [0, 50], sizes = [4, 256], strides = [1, 1]} : vector<4x384xf32> to vector<4x256xf32>
    %172 = vector.broadcast %51 : vector<1x256xf32> to vector<4x256xf32>
    %173 = arith.mulf %171, %172 : vector<4x256xf32>
    %c92 = arith.constant 92 : index
    %c0_47 = arith.constant 0 : index
    %174 = vector.load %arg7[%c92, %c0_47] : memref<200x256xf32, #tpu.memory_space<vmem>>, vector<4x256xf32>
    tpu.vector_store %arg7[%c92, %c0_47], %173 {strides = array<i32>} : memref<200x256xf32, #tpu.memory_space<vmem>>, vector<4x256xf32>,
    %175 = vector.extract_strided_slice %1 {offsets = [0, 51], sizes = [4, 256], strides = [1, 1]} : vector<4x384xf32> to vector<4x256xf32>
    %c96 = arith.constant 96 : index
    %c0_48 = arith.constant 0 : index
    %176 = vector.load %arg7[%c96, %c0_48] : memref<200x256xf32, #tpu.memory_space<vmem>>, vector<4x256xf32>
    tpu.vector_store %arg7[%c96, %c0_48], %175 {strides = array<i32>} : memref<200x256xf32, #tpu.memory_space<vmem>>, vector<4x256xf32>,
    %177 = vector.extract_strided_slice %1 {offsets = [0, 52], sizes = [4, 256], strides = [1, 1]} : vector<4x384xf32> to vector<4x256xf32>
    %178 = vector.broadcast %62 : vector<1x256xf32> to vector<4x256xf32>
    %179 = arith.mulf %177, %178 : vector<4x256xf32>
    %c100 = arith.constant 100 : index
    %c0_49 = arith.constant 0 : index
    %180 = vector.load %arg7[%c100, %c0_49] : memref<200x256xf32, #tpu.memory_space<vmem>>, vector<4x256xf32>
    tpu.vector_store %arg7[%c100, %c0_49], %179 {strides = array<i32>} : memref<200x256xf32, #tpu.memory_space<vmem>>, vector<4x256xf32>,
    %181 = vector.extract_strided_slice %1 {offsets = [0, 53], sizes = [4, 256], strides = [1, 1]} : vector<4x384xf32> to vector<4x256xf32>
    %182 = vector.broadcast %73 : vector<1x256xf32> to vector<4x256xf32>
    %183 = arith.mulf %181, %182 : vector<4x256xf32>
    %c104 = arith.constant 104 : index
    %c0_50 = arith.constant 0 : index
    %184 = vector.load %arg7[%c104, %c0_50] : memref<200x256xf32, #tpu.memory_space<vmem>>, vector<4x256xf32>
    tpu.vector_store %arg7[%c104, %c0_50], %183 {strides = array<i32>} : memref<200x256xf32, #tpu.memory_space<vmem>>, vector<4x256xf32>,
    %185 = vector.extract_strided_slice %1 {offsets = [0, 54], sizes = [4, 256], strides = [1, 1]} : vector<4x384xf32> to vector<4x256xf32>
    %186 = vector.broadcast %84 : vector<1x256xf32> to vector<4x256xf32>
    %187 = arith.mulf %185, %186 : vector<4x256xf32>
    %c108 = arith.constant 108 : index
    %c0_51 = arith.constant 0 : index
    %188 = vector.load %arg7[%c108, %c0_51] : memref<200x256xf32, #tpu.memory_space<vmem>>, vector<4x256xf32>
    tpu.vector_store %arg7[%c108, %c0_51], %187 {strides = array<i32>} : memref<200x256xf32, #tpu.memory_space<vmem>>, vector<4x256xf32>,
    %189 = vector.extract_strided_slice %1 {offsets = [0, 64], sizes = [4, 256], strides = [1, 1]} : vector<4x384xf32> to vector<4x256xf32>
    %190 = vector.broadcast %29 : vector<1x256xf32> to vector<4x256xf32>
    %191 = arith.mulf %189, %190 : vector<4x256xf32>
    %c112 = arith.constant 112 : index
    %c0_52 = arith.constant 0 : index
    %192 = vector.load %arg7[%c112, %c0_52] : memref<200x256xf32, #tpu.memory_space<vmem>>, vector<4x256xf32>
    tpu.vector_store %arg7[%c112, %c0_52], %191 {strides = array<i32>} : memref<200x256xf32, #tpu.memory_space<vmem>>, vector<4x256xf32>,
    %193 = vector.extract_strided_slice %1 {offsets = [0, 65], sizes = [4, 256], strides = [1, 1]} : vector<4x384xf32> to vector<4x256xf32>
    %194 = vector.broadcast %40 : vector<1x256xf32> to vector<4x256xf32>
    %195 = arith.mulf %193, %194 : vector<4x256xf32>
    %c116 = arith.constant 116 : index
    %c0_53 = arith.constant 0 : index
    %196 = vector.load %arg7[%c116, %c0_53] : memref<200x256xf32, #tpu.memory_space<vmem>>, vector<4x256xf32>
    tpu.vector_store %arg7[%c116, %c0_53], %195 {strides = array<i32>} : memref<200x256xf32, #tpu.memory_space<vmem>>, vector<4x256xf32>,
    %197 = vector.extract_strided_slice %1 {offsets = [0, 66], sizes = [4, 256], strides = [1, 1]} : vector<4x384xf32> to vector<4x256xf32>
    %198 = vector.broadcast %51 : vector<1x256xf32> to vector<4x256xf32>
    %199 = arith.mulf %197, %198 : vector<4x256xf32>
    %c120 = arith.constant 120 : index
    %c0_54 = arith.constant 0 : index
    %200 = vector.load %arg7[%c120, %c0_54] : memref<200x256xf32, #tpu.memory_space<vmem>>, vector<4x256xf32>
    tpu.vector_store %arg7[%c120, %c0_54], %199 {strides = array<i32>} : memref<200x256xf32, #tpu.memory_space<vmem>>, vector<4x256xf32>,
    %201 = vector.extract_strided_slice %1 {offsets = [0, 67], sizes = [4, 256], strides = [1, 1]} : vector<4x384xf32> to vector<4x256xf32>
    %c124 = arith.constant 124 : index
    %c0_55 = arith.constant 0 : index
    %202 = vector.load %arg7[%c124, %c0_55] : memref<200x256xf32, #tpu.memory_space<vmem>>, vector<4x256xf32>
    tpu.vector_store %arg7[%c124, %c0_55], %201 {strides = array<i32>} : memref<200x256xf32, #tpu.memory_space<vmem>>, vector<4x256xf32>,
    %203 = vector.extract_strided_slice %1 {offsets = [0, 68], sizes = [4, 256], strides = [1, 1]} : vector<4x384xf32> to vector<4x256xf32>
    %204 = vector.broadcast %62 : vector<1x256xf32> to vector<4x256xf32>
    %205 = arith.mulf %203, %204 : vector<4x256xf32>
    %c128 = arith.constant 128 : index
    %c0_56 = arith.constant 0 : index
    %206 = vector.load %arg7[%c128, %c0_56] : memref<200x256xf32, #tpu.memory_space<vmem>>, vector<4x256xf32>
    tpu.vector_store %arg7[%c128, %c0_56], %205 {strides = array<i32>} : memref<200x256xf32, #tpu.memory_space<vmem>>, vector<4x256xf32>,
    %207 = vector.extract_strided_slice %1 {offsets = [0, 69], sizes = [4, 256], strides = [1, 1]} : vector<4x384xf32> to vector<4x256xf32>
    %208 = vector.broadcast %73 : vector<1x256xf32> to vector<4x256xf32>
    %209 = arith.mulf %207, %208 : vector<4x256xf32>
    %c132 = arith.constant 132 : index
    %c0_57 = arith.constant 0 : index
    %210 = vector.load %arg7[%c132, %c0_57] : memref<200x256xf32, #tpu.memory_space<vmem>>, vector<4x256xf32>
    tpu.vector_store %arg7[%c132, %c0_57], %209 {strides = array<i32>} : memref<200x256xf32, #tpu.memory_space<vmem>>, vector<4x256xf32>,
    %211 = vector.extract_strided_slice %1 {offsets = [0, 70], sizes = [4, 256], strides = [1, 1]} : vector<4x384xf32> to vector<4x256xf32>
    %212 = vector.broadcast %84 : vector<1x256xf32> to vector<4x256xf32>
    %213 = arith.mulf %211, %212 : vector<4x256xf32>
    %c136 = arith.constant 136 : index
    %c0_58 = arith.constant 0 : index
    %214 = vector.load %arg7[%c136, %c0_58] : memref<200x256xf32, #tpu.memory_space<vmem>>, vector<4x256xf32>
    tpu.vector_store %arg7[%c136, %c0_58], %213 {strides = array<i32>} : memref<200x256xf32, #tpu.memory_space<vmem>>, vector<4x256xf32>,
    %215 = vector.extract_strided_slice %1 {offsets = [0, 80], sizes = [4, 256], strides = [1, 1]} : vector<4x384xf32> to vector<4x256xf32>
    %216 = vector.broadcast %29 : vector<1x256xf32> to vector<4x256xf32>
    %217 = arith.mulf %215, %216 : vector<4x256xf32>
    %c140 = arith.constant 140 : index
    %c0_59 = arith.constant 0 : index
    %218 = vector.load %arg7[%c140, %c0_59] : memref<200x256xf32, #tpu.memory_space<vmem>>, vector<4x256xf32>
    tpu.vector_store %arg7[%c140, %c0_59], %217 {strides = array<i32>} : memref<200x256xf32, #tpu.memory_space<vmem>>, vector<4x256xf32>,
    %219 = vector.extract_strided_slice %1 {offsets = [0, 81], sizes = [4, 256], strides = [1, 1]} : vector<4x384xf32> to vector<4x256xf32>
    %220 = vector.broadcast %40 : vector<1x256xf32> to vector<4x256xf32>
    %221 = arith.mulf %219, %220 : vector<4x256xf32>
    %c144 = arith.constant 144 : index
    %c0_60 = arith.constant 0 : index
    %222 = vector.load %arg7[%c144, %c0_60] : memref<200x256xf32, #tpu.memory_space<vmem>>, vector<4x256xf32>
    tpu.vector_store %arg7[%c144, %c0_60], %221 {strides = array<i32>} : memref<200x256xf32, #tpu.memory_space<vmem>>, vector<4x256xf32>,
    %223 = vector.extract_strided_slice %1 {offsets = [0, 82], sizes = [4, 256], strides = [1, 1]} : vector<4x384xf32> to vector<4x256xf32>
    %224 = vector.broadcast %51 : vector<1x256xf32> to vector<4x256xf32>
    %225 = arith.mulf %223, %224 : vector<4x256xf32>
    %c148 = arith.constant 148 : index
    %c0_61 = arith.constant 0 : index
    %226 = vector.load %arg7[%c148, %c0_61] : memref<200x256xf32, #tpu.memory_space<vmem>>, vector<4x256xf32>
    tpu.vector_store %arg7[%c148, %c0_61], %225 {strides = array<i32>} : memref<200x256xf32, #tpu.memory_space<vmem>>, vector<4x256xf32>,
    %227 = vector.extract_strided_slice %1 {offsets = [0, 83], sizes = [4, 256], strides = [1, 1]} : vector<4x384xf32> to vector<4x256xf32>
    %c152 = arith.constant 152 : index
    %c0_62 = arith.constant 0 : index
    %228 = vector.load %arg7[%c152, %c0_62] : memref<200x256xf32, #tpu.memory_space<vmem>>, vector<4x256xf32>
    tpu.vector_store %arg7[%c152, %c0_62], %227 {strides = array<i32>} : memref<200x256xf32, #tpu.memory_space<vmem>>, vector<4x256xf32>,
    %229 = vector.extract_strided_slice %1 {offsets = [0, 84], sizes = [4, 256], strides = [1, 1]} : vector<4x384xf32> to vector<4x256xf32>
    %230 = vector.broadcast %62 : vector<1x256xf32> to vector<4x256xf32>
    %231 = arith.mulf %229, %230 : vector<4x256xf32>
    %c156 = arith.constant 156 : index
    %c0_63 = arith.constant 0 : index
    %232 = vector.load %arg7[%c156, %c0_63] : memref<200x256xf32, #tpu.memory_space<vmem>>, vector<4x256xf32>
    tpu.vector_store %arg7[%c156, %c0_63], %231 {strides = array<i32>} : memref<200x256xf32, #tpu.memory_space<vmem>>, vector<4x256xf32>,
    %233 = vector.extract_strided_slice %1 {offsets = [0, 85], sizes = [4, 256], strides = [1, 1]} : vector<4x384xf32> to vector<4x256xf32>
    %234 = vector.broadcast %73 : vector<1x256xf32> to vector<4x256xf32>
    %235 = arith.mulf %233, %234 : vector<4x256xf32>
    %c160 = arith.constant 160 : index
    %c0_64 = arith.constant 0 : index
    %236 = vector.load %arg7[%c160, %c0_64] : memref<200x256xf32, #tpu.memory_space<vmem>>, vector<4x256xf32>
    tpu.vector_store %arg7[%c160, %c0_64], %235 {strides = array<i32>} : memref<200x256xf32, #tpu.memory_space<vmem>>, vector<4x256xf32>,
    %237 = vector.extract_strided_slice %1 {offsets = [0, 86], sizes = [4, 256], strides = [1, 1]} : vector<4x384xf32> to vector<4x256xf32>
    %238 = vector.broadcast %84 : vector<1x256xf32> to vector<4x256xf32>
    %239 = arith.mulf %237, %238 : vector<4x256xf32>
    %c164 = arith.constant 164 : index
    %c0_65 = arith.constant 0 : index
    %240 = vector.load %arg7[%c164, %c0_65] : memref<200x256xf32, #tpu.memory_space<vmem>>, vector<4x256xf32>
    tpu.vector_store %arg7[%c164, %c0_65], %239 {strides = array<i32>} : memref<200x256xf32, #tpu.memory_space<vmem>>, vector<4x256xf32>,
    %241 = vector.extract_strided_slice %1 {offsets = [0, 96], sizes = [4, 256], strides = [1, 1]} : vector<4x384xf32> to vector<4x256xf32>
    %242 = vector.broadcast %29 : vector<1x256xf32> to vector<4x256xf32>
    %243 = arith.mulf %241, %242 : vector<4x256xf32>
    %c168 = arith.constant 168 : index
    %c0_66 = arith.constant 0 : index
    %244 = vector.load %arg7[%c168, %c0_66] : memref<200x256xf32, #tpu.memory_space<vmem>>, vector<4x256xf32>
    tpu.vector_store %arg7[%c168, %c0_66], %243 {strides = array<i32>} : memref<200x256xf32, #tpu.memory_space<vmem>>, vector<4x256xf32>,
    %245 = vector.extract_strided_slice %1 {offsets = [0, 97], sizes = [4, 256], strides = [1, 1]} : vector<4x384xf32> to vector<4x256xf32>
    %246 = vector.broadcast %40 : vector<1x256xf32> to vector<4x256xf32>
    %247 = arith.mulf %245, %246 : vector<4x256xf32>
    %c172 = arith.constant 172 : index
    %c0_67 = arith.constant 0 : index
    %248 = vector.load %arg7[%c172, %c0_67] : memref<200x256xf32, #tpu.memory_space<vmem>>, vector<4x256xf32>
    tpu.vector_store %arg7[%c172, %c0_67], %247 {strides = array<i32>} : memref<200x256xf32, #tpu.memory_space<vmem>>, vector<4x256xf32>,
    %249 = vector.extract_strided_slice %1 {offsets = [0, 98], sizes = [4, 256], strides = [1, 1]} : vector<4x384xf32> to vector<4x256xf32>
    %250 = vector.broadcast %51 : vector<1x256xf32> to vector<4x256xf32>
    %251 = arith.mulf %249, %250 : vector<4x256xf32>
    %c176 = arith.constant 176 : index
    %c0_68 = arith.constant 0 : index
    %252 = vector.load %arg7[%c176, %c0_68] : memref<200x256xf32, #tpu.memory_space<vmem>>, vector<4x256xf32>
    tpu.vector_store %arg7[%c176, %c0_68], %251 {strides = array<i32>} : memref<200x256xf32, #tpu.memory_space<vmem>>, vector<4x256xf32>,
    %253 = vector.extract_strided_slice %1 {offsets = [0, 99], sizes = [4, 256], strides = [1, 1]} : vector<4x384xf32> to vector<4x256xf32>
    %c180 = arith.constant 180 : index
    %c0_69 = arith.constant 0 : index
    %254 = vector.load %arg7[%c180, %c0_69] : memref<200x256xf32, #tpu.memory_space<vmem>>, vector<4x256xf32>
    tpu.vector_store %arg7[%c180, %c0_69], %253 {strides = array<i32>} : memref<200x256xf32, #tpu.memory_space<vmem>>, vector<4x256xf32>,
    %255 = vector.extract_strided_slice %1 {offsets = [0, 100], sizes = [4, 256], strides = [1, 1]} : vector<4x384xf32> to vector<4x256xf32>
    %256 = vector.broadcast %62 : vector<1x256xf32> to vector<4x256xf32>
    %257 = arith.mulf %255, %256 : vector<4x256xf32>
    %c184 = arith.constant 184 : index
    %c0_70 = arith.constant 0 : index
    %258 = vector.load %arg7[%c184, %c0_70] : memref<200x256xf32, #tpu.memory_space<vmem>>, vector<4x256xf32>
    tpu.vector_store %arg7[%c184, %c0_70], %257 {strides = array<i32>} : memref<200x256xf32, #tpu.memory_space<vmem>>, vector<4x256xf32>,
    %259 = vector.extract_strided_slice %1 {offsets = [0, 101], sizes = [4, 256], strides = [1, 1]} : vector<4x384xf32> to vector<4x256xf32>
    %260 = vector.broadcast %73 : vector<1x256xf32> to vector<4x256xf32>
    %261 = arith.mulf %259, %260 : vector<4x256xf32>
    %c188 = arith.constant 188 : index
    %c0_71 = arith.constant 0 : index
    %262 = vector.load %arg7[%c188, %c0_71] : memref<200x256xf32, #tpu.memory_space<vmem>>, vector<4x256xf32>
    tpu.vector_store %arg7[%c188, %c0_71], %261 {strides = array<i32>} : memref<200x256xf32, #tpu.memory_space<vmem>>, vector<4x256xf32>,
    %263 = vector.extract_strided_slice %1 {offsets = [0, 102], sizes = [4, 256], strides = [1, 1]} : vector<4x384xf32> to vector<4x256xf32>
    %264 = vector.broadcast %84 : vector<1x256xf32> to vector<4x256xf32>
    %265 = arith.mulf %263, %264 : vector<4x256xf32>
    %c192 = arith.constant 192 : index
    %c0_72 = arith.constant 0 : index
    %266 = vector.load %arg7[%c192, %c0_72] : memref<200x256xf32, #tpu.memory_space<vmem>>, vector<4x256xf32>
    tpu.vector_store %arg7[%c192, %c0_72], %265 {strides = array<i32>} : memref<200x256xf32, #tpu.memory_space<vmem>>, vector<4x256xf32>,
    %cst = arith.constant 1.000000e+00 : f32
    %267 = vector.broadcast %cst : f32 to vector<4x256xf32>
    %c196 = arith.constant 196 : index
    %c0_73 = arith.constant 0 : index
    %268 = vector.load %arg7[%c196, %c0_73] : memref<200x256xf32, #tpu.memory_space<vmem>>, vector<4x256xf32>
    tpu.vector_store %arg7[%c196, %c0_73], %267 {strides = array<i32>} : memref<200x256xf32, #tpu.memory_space<vmem>>, vector<4x256xf32>,
    %c0_74 = arith.constant 0 : index
    %c0_75 = arith.constant 0 : index
    %269 = vector.load %arg3[%c0_74, %c0_75] : memref<128x200xf32, #tpu.memory_space<vmem>>, vector<128x200xf32>
    %c0_76 = arith.constant 0 : index
    %c0_77 = arith.constant 0 : index
    %270 = vector.load %arg7[%c0_76, %c0_77] : memref<200x256xf32, #tpu.memory_space<vmem>>, vector<200x256xf32>
    %cst_78 = arith.constant dense<0.000000e+00> : vector<128x256xf32>
    %271 = tpu.matmul %269, %270, %cst_78 {dimension_numbers = #tpu.dot_dimension_numbers<[1], [0], [0], [1], [0, 0, 1, 1], [], []>} : vector<128x200xf32>, vector<200x256xf32>, vector<128x256xf32> -> vector<128x256xf32>
    %cst_79 = arith.constant 0.000000e+00 : f32
    %272 = vector.broadcast %cst_79 : f32 to vector<128x256xf32>
    %273 = arith.maximumf %271, %272 : vector<128x256xf32>
    %c0_80 = arith.constant 0 : index
    %c0_81 = arith.constant 0 : index
    %c0_82 = arith.constant 0 : index
    %274 = vector.load %arg2[%c0_80, %c0_81, %c0_82] : memref<1x128x256xf32, #tpu.memory_space<vmem>>, vector<1x128x256xf32>
    %275 = vector.shape_cast %274 : vector<1x128x256xf32> to vector<128x256xf32>
    %c0_83 = arith.constant 0 : index
    %c0_84 = arith.constant 0 : index
    %276 = vector.load %arg4[%c0_83, %c0_84] : memref<128x128xf32, #tpu.memory_space<vmem>>, vector<128x128xf32>
    %cst_85 = arith.constant dense<0.000000e+00> : vector<128x256xf32>
    %277 = tpu.matmul %276, %275, %cst_85 {dimension_numbers = #tpu.dot_dimension_numbers<[1], [0], [0], [1], [0, 0, 1, 1], [], []>} : vector<128x128xf32>, vector<128x256xf32>, vector<128x256xf32> -> vector<128x256xf32>
    %c0_86 = arith.constant 0 : index
    %c0_87 = arith.constant 0 : index
    %278 = vector.load %arg5[%c0_86, %c0_87] : memref<128x128xf32, #tpu.memory_space<vmem>>, vector<128x128xf32>
    %cst_88 = arith.constant dense<0.000000e+00> : vector<128x256xf32>
    %279 = tpu.matmul %278, %273, %cst_88 {dimension_numbers = #tpu.dot_dimension_numbers<[1], [0], [0], [1], [0, 0, 1, 1], [], []>} : vector<128x128xf32>, vector<128x256xf32>, vector<128x256xf32> -> vector<128x256xf32>
    %280 = arith.addf %277, %279 : vector<128x256xf32>
    %c0_89 = arith.constant 0 : index
    %c0_90 = arith.constant 0 : index
    %281 = vector.load %arg8[%c0_89, %c0_90] : memref<128x256xf32, #tpu.memory_space<vmem>>, vector<128x256xf32>
    tpu.vector_store %arg8[%c0_89, %c0_90], %280 {strides = array<i32>} : memref<128x256xf32, #tpu.memory_space<vmem>>, vector<128x256xf32>,
    %282 = vector.extract_strided_slice %280 {offsets = [0, 0], sizes = [32, 256], strides = [1, 1]} : vector<128x256xf32> to vector<32x256xf32>
    %283 = vector.extract_strided_slice %280 {offsets = [32, 0], sizes = [32, 256], strides = [1, 1]} : vector<128x256xf32> to vector<32x256xf32>
    %284 = arith.maximumf %282, %283 : vector<32x256xf32>
    %285 = vector.extract_strided_slice %280 {offsets = [64, 0], sizes = [32, 256], strides = [1, 1]} : vector<128x256xf32> to vector<32x256xf32>
    %286 = arith.maximumf %284, %285 : vector<32x256xf32>
    %287 = vector.extract_strided_slice %280 {offsets = [96, 0], sizes = [32, 256], strides = [1, 1]} : vector<128x256xf32> to vector<32x256xf32>
    %288 = arith.maximumf %286, %287 : vector<32x256xf32>
    %cst_91 = arith.constant 0.000000e+00 : f32
    %289 = vector.broadcast %cst_91 : f32 to vector<32x256xf32>
    %cst_92 = arith.constant 0.000000e+00 : f32
    %290 = vector.broadcast %cst_92 : f32 to vector<32x256xf32>
    %c0_93 = arith.constant 0 : index
    %c0_94 = arith.constant 0 : index
    %291 = vector.load %arg8[%c0_93, %c0_94] : memref<128x256xf32, #tpu.memory_space<vmem>>, vector<32x256xf32>
    %292 = arith.subf %291, %288 : vector<32x256xf32>
    %293 = math.exp %292 : vector<32x256xf32>
    %294 = arith.addf %289, %293 : vector<32x256xf32>
    %c0_95 = arith.constant 0 : index
    %c0_96 = arith.constant 0 : index
    %c0_97 = arith.constant 0 : index
    %295 = vector.load %arg2[%c0_95, %c0_96, %c0_97] : memref<1x128x256xf32, #tpu.memory_space<vmem>>, vector<1x32x256xf32>
    %296 = vector.shape_cast %295 : vector<1x32x256xf32> to vector<32x256xf32>
    %297 = arith.mulf %296, %293 : vector<32x256xf32>
    %298 = arith.addf %290, %297 : vector<32x256xf32>
    %c32_98 = arith.constant 32 : index
    %c0_99 = arith.constant 0 : index
    %299 = vector.load %arg8[%c32_98, %c0_99] : memref<128x256xf32, #tpu.memory_space<vmem>>, vector<32x256xf32>
    %300 = arith.subf %299, %288 : vector<32x256xf32>
    %301 = math.exp %300 : vector<32x256xf32>
    %302 = arith.addf %294, %301 : vector<32x256xf32>
    %c0_100 = arith.constant 0 : index
    %c32_101 = arith.constant 32 : index
    %c0_102 = arith.constant 0 : index
    %303 = vector.load %arg2[%c0_100, %c32_101, %c0_102] : memref<1x128x256xf32, #tpu.memory_space<vmem>>, vector<1x32x256xf32>
    %304 = vector.shape_cast %303 : vector<1x32x256xf32> to vector<32x256xf32>
    %305 = arith.mulf %304, %301 : vector<32x256xf32>
    %306 = arith.addf %298, %305 : vector<32x256xf32>
    %c64_103 = arith.constant 64 : index
    %c0_104 = arith.constant 0 : index
    %307 = vector.load %arg8[%c64_103, %c0_104] : memref<128x256xf32, #tpu.memory_space<vmem>>, vector<32x256xf32>
    %308 = arith.subf %307, %288 : vector<32x256xf32>
    %309 = math.exp %308 : vector<32x256xf32>
    %310 = arith.addf %302, %309 : vector<32x256xf32>
    %c0_105 = arith.constant 0 : index
    %c64_106 = arith.constant 64 : index
    %c0_107 = arith.constant 0 : index
    %311 = vector.load %arg2[%c0_105, %c64_106, %c0_107] : memref<1x128x256xf32, #tpu.memory_space<vmem>>, vector<1x32x256xf32>
    %312 = vector.shape_cast %311 : vector<1x32x256xf32> to vector<32x256xf32>
    %313 = arith.mulf %312, %309 : vector<32x256xf32>
    %314 = arith.addf %306, %313 : vector<32x256xf32>
    %c96_108 = arith.constant 96 : index
    %c0_109 = arith.constant 0 : index
    %315 = vector.load %arg8[%c96_108, %c0_109] : memref<128x256xf32, #tpu.memory_space<vmem>>, vector<32x256xf32>
    %316 = arith.subf %315, %288 : vector<32x256xf32>
    %317 = math.exp %316 : vector<32x256xf32>
    %318 = arith.addf %310, %317 : vector<32x256xf32>
    %c0_110 = arith.constant 0 : index
    %c96_111 = arith.constant 96 : index
    %c0_112 = arith.constant 0 : index
    %319 = vector.load %arg2[%c0_110, %c96_111, %c0_112] : memref<1x128x256xf32, #tpu.memory_space<vmem>>, vector<1x32x256xf32>
    %320 = vector.shape_cast %319 : vector<1x32x256xf32> to vector<32x256xf32>
    %321 = arith.mulf %320, %317 : vector<32x256xf32>
    %322 = arith.addf %314, %321 : vector<32x256xf32>
    %323 = tpu.reciprocal %318 {approx = true} : vector<32x256xf32> -> vector<32x256xf32>
    %324 = arith.mulf %318, %323 : vector<32x256xf32>
    %cst_113 = arith.constant 2.000000e+00 : f32
    %325 = vector.broadcast %cst_113 : f32 to vector<32x256xf32>
    %326 = arith.subf %325, %324 : vector<32x256xf32>
    %327 = arith.mulf %323, %326 : vector<32x256xf32>
    %328 = arith.mulf %322, %327 : vector<32x256xf32>
    %c0_114 = arith.constant 0 : index
    %c0_115 = arith.constant 0 : index
    %c0_116 = arith.constant 0 : index
    %329 = vector.load %arg6[%c0_114, %c0_115, %c0_116] : memref<1x32x256xf32, #tpu.memory_space<vmem>>, vector<1x32x256xf32>
    %330 = vector.shape_cast %329 : vector<1x32x256xf32> to vector<32x256xf32>
    %331 = vector.shape_cast %328 : vector<32x256xf32> to vector<1x32x256xf32>
    tpu.vector_store %arg6[%c0_114, %c0_115, %c0_116], %331 {strides = array<i32>} : memref<1x32x256xf32, #tpu.memory_space<vmem>>, vector<1x32x256xf32>,
    return
  }
  func.func @transform_0(%arg0: i32) -> (i32, i32, i32) {
    %c0_i32 = arith.constant 0 : i32
    %c0_i32_0 = arith.constant 0 : i32
    %c0_i32_1 = arith.constant 0 : i32
    return %arg0, %c0_i32, %c0_i32_0 : i32, i32, i32
  }
  func.func @transform_1(%arg0: i32) -> (i32, i32, i32) {
    %c0_i32 = arith.constant 0 : i32
    %c0_i32_0 = arith.constant 0 : i32
    %c0_i32_1 = arith.constant 0 : i32
    return %arg0, %c0_i32, %c0_i32_0 : i32, i32, i32
  }
  func.func @transform_2(%arg0: i32) -> (i32, i32) {
    %c0_i32 = arith.constant 0 : i32
    %c0_i32_0 = arith.constant 0 : i32
    %c0_i32_1 = arith.constant 0 : i32
    return %c0_i32, %c0_i32_0 : i32, i32
  }
  func.func @transform_3(%arg0: i32) -> (i32, i32) {
    %c0_i32 = arith.constant 0 : i32
    %c0_i32_0 = arith.constant 0 : i32
    %c0_i32_1 = arith.constant 0 : i32
    return %c0_i32, %c0_i32_0 : i32, i32
  }
  func.func @transform_4(%arg0: i32) -> (i32, i32) {
    %c0_i32 = arith.constant 0 : i32
    %c0_i32_0 = arith.constant 0 : i32
    %c0_i32_1 = arith.constant 0 : i32
    return %c0_i32, %c0_i32_0 : i32, i32
  }
  func.func @transform_5(%arg0: i32) -> (i32, i32, i32) {
    %c0_i32 = arith.constant 0 : i32
    %c0_i32_0 = arith.constant 0 : i32
    %c0_i32_1 = arith.constant 0 : i32
    return %arg0, %c0_i32, %c0_i32_0 : i32, i32, i32
  }
}

</mosaic_0001>

<bundles_post_ra>
// kernel: tpu_custom_call.1
= control target key start
LH: loop header
LB: loop body
LE: loop exit
PB: predicated region body
PF: predicated region fallthrough
CT: control target
= control target key end

     0   :  { %10 = vsyncpa [#allocation5], 0  ;;  %s4497_s0 = inlined_call_operand.vmem [shape: f32[2,4,384], index: 0, kind: input, shape index: {}]   ;;  %s4498_s1 = inlined_call_operand.hbm [shape: f32[2,128,256], index: 1, kind: input, shape index: {}]   ;;  %s4499_s2 = inlined_call_operand.vmem [shape: f32[128,200], index: 2, kind: input, shape index: {}]   ;;  %s4500_s3 = inlined_call_operand.vmem [shape: f32[128,128], index: 3, kind: input, shape index: {}]   ;;  %s4501_s4 = inlined_call_operand.vmem [shape: f32[128,128], index: 4, kind: input, shape index: {}]   ;;  %s4502_s5 = inlined_call_operand.hbm [shape: f32[2,32,256], index: 5, kind: output, shape index: {}]  }
   0x1   :  { %12 = vsyncpa [#allocation5 + $0x1], 0 }
   0x2   :  { %13 = vsyncpa [#allocation6], 0 }
   0x3   :  { %15 = vsyncpa [#allocation6 + $0x1], 0  ;;  %s3207_s18 = smov 0   ;;  %s3209_s19 = smov 0  }
   0x4   :  { %s3211_s20 = smov 0   ;;  %s3213_s21 = smov 0  }
   0x5 LB: > { %s3228_s22 = sadd.s32 4294967295, %s3084_s21   ;;  %s2694_s23 = sadd.s32 4294967294, %s3084_s21   ;;  %s3084_s21 = sphi %s3213_s21, %s4597_s21   ;;  %s3080_s20 = sphi %s3211_s20, %s4596_s20   ;;  %s3076_s19 = sphi %s3209_s19, %s4595_s19   ;;  %s3072_s18 = sphi %s3207_s18, %s4594_s18  }
   0x6   : > { %s3232_s24 = sadd.s32 1, %s3084_s21   ;;  %s54_s25 = sadd.s32 1, %s3080_s20 }
   0x7   : > { %s51_s26 = ssub.s32 %s3084_s21, %s3232_s24  ;;  %p61_p0 = scmp.ne.s32.totalorder %s3080_s20, %s3076_s19 }
   0x8   : > { %p52_p1 = scmp.eq.s32.totalorder %s51_s26, 0  ;;  %p62_p2 = scmp.eq.s32.totalorder %s3084_s21, 0 }
   0x9   : > { %p67_p3 = scmp.ne.s32.totalorder %s3076_s19, %s3072_s18  ;;  %p68_p4 = scmp.eq.s32.totalorder %s3228_s22, 0 }
   0xa   : > { %s3244_s27 = scalar_select %p52_p1, %s3080_s20, %s54_s25  }
   0xb   : > { %p3246_p5 = por %p62_p2, %p61_p0  ;;  %p3250_p6 = por %p68_p4, %p67_p3 }
   0xc   : > { %p154_p7 = scmp.eq.s32.totalorder %s3228_s22, 1  ;;  %p160_p8 = scmp.eq.s32.totalorder %s2694_s23, 1 }
   0xd   : > { %s4533_s29 = scalar_select %p3250_p6, 1, 0 }
   0xe   : > { %p2784_p10 = scmp.lt.s32.totalorder %s3084_s21, 2  ;;  %p3257_p11 = por %p154_p7, %p61_p0 }
   0xf   : > { %p3261_p12 = por %p160_p8, %p67_p3  ;;  %s197_s7 = sand.u32 1, %s3080_s20  }
  0x10   : > { %s4534_s30 = scalar_select %p3257_p11, 1, 0 }
  0x11   : > { %s4535_s6 = scalar_select %p3261_p12, 1, 0 }
  0x12   : > { %s2737_s8 = sshll.u32 %s3084_s21, 12  ;;  %s2697_s9 = sshll.u32 %s197_s7, 8 }
  0x13   : > { %s3270_s12 = scalar_lea.hbm %s4498_s1, %s2737_s8  ;;  %s201_s13 = scalar_lea.vmem [#allocation4], %s2697_s9 }
  0x14   : > { %s208_s14 = sshll.u32 %s201_s13, 4  ;;  %p3274_p13 = pnand %p2784_p10, %p3246_p5  ;;  %s3278_s14 = int_to_ptr.vmem [resolvable:$true] %s208_s14 }
  0x15   : > { %s3280_s16 = scalar_lea.sflag [#allocation5], %s197_s7  ;;  %s2992_s17 = scalar_lea.hbm %s3270_s12, 4096 }
  0x16   : > { %p2993_p0 = scmp.ne.s32.totalorder %s3270_s12, %s2992_s17  ;;  %p2994_p1 = pneg %p3274_p13 }
  0x17   : > { %s2997_s26 = scalar_lea.hbm %s4498_s1, 8192  ;;  %p2998_p4 = scmp.lt.s32.totalorder %s3270_s12, %s4498_s1 }
  0x18   : > { %p2995_p2 = pnand %p2994_p1, %p2993_p0  ;;  %p2999_p5 = scmp.lt.s32.totalorder %s2997_s26, %s2992_s17 }
  0x1a   : > { %p2996_p3 = pneg %p2995_p2  ;;  %p3000_p7 = por %p2999_p5, %p2998_p4 }
  0x1c   : > { %p3001_p8 = pnand %p3000_p7, %p2996_p3 }
  0x1e   : > { %3004 = shalt.err (!%p3001_p8)
}
  0x1f   : > { %s3005_s7 = scalar_lea.vmem %s3278_s14, 4096  ;;  %s3086_s9 = smov [#allocation4]  }
  0x20   : > { %p3006_p10 = scmp.ne.s32.totalorder %s3278_s14, %s3005_s7  ;;  %s3010_s10 = sshll.u32 %s3086_s9, 4  ;;  %s3011_s10 = int_to_ptr.vmem [resolvable:$false] %s3010_s10 }
  0x21   : > { %s3012_s11 = scalar_lea.vmem %s3011_s10, 8192  ;;  %p3013_p2 = scmp.lt.s32.totalorder %s3278_s14, %s3011_s10 }
  0x22   : > { %p3008_p9 = pnand %p3006_p10, %p2994_p1  ;;  %p3014_p12 = scmp.lt.s32.totalorder %s3012_s11, %s3005_s7 }
  0x24   : > { %p3009_p0 = pneg %p3008_p9  ;;  %p3015_p11 = por %p3014_p12, %p3013_p2 }
  0x26   : > { %p3016_p6 = pnand %p3015_p11, %p3009_p0 }
  0x28   : > { %3019 = shalt.err (!%p3016_p6)
}
  0x29   : > { %s3087_s13 = smov 256   ;;  %s3088_s17 = smov 16  }
  0x2a   : > { %2779 = dma.hbm_to_vmem [thread:$0]  (!%p3274_p13), %s3270_s12, 4096, %s3278_s14, %s3280_s16, %s3087_s13, %s3087_s13, %s3088_s17  }
  0x2b   : > { %p2700_p9 = scmp.ge.s32.totalorder %s3084_s21, 1  ;;  %p216_p1 = scmp.lt.s32.totalorder %s3084_s21, 3 }
  0x2d   : > { %p217_p3 = pnand %p2700_p9, %p216_p1 }
  0x2f   : > { %220 = sbr.rel (%p217_p3) target bundleno = 1259 (0x4eb), region = 40 }
  0x34   : > { %s3304_s23 = sand.u32 1, %s3076_s19   ;;  %v265_v0 = vlaneseq  ;;  %p4537_p6 = scmp.ne.s32.totalorder %s4533_s29, 0 }
  0x35   : > { %s2701_s25 = sshll.u32 %s3304_s23, 8  ;;  %s223_s26 = scalar_lea.sflag [#allocation5], %s3304_s23 }
  0x36   : > { %s3308_s28 = scalar_lea.vmem [#allocation4], %s2701_s25 }
  0x37   : > { %3063 = dma.done.wait (%p4537_p6), %s223_s26, 4096  }
  0x38   : > { %3065 = vsyncadd (%p4537_p6), %s223_s26, 4294963200  ;;  %v3089_v1 = vmov 0.0   ;;  %v266_v2 = vand.u32 127, %v265_v0  ;;  %s3090_s29 = smov 64   ;;  %s3091_s12 = smov 65   ;;  %vm1034_vm12 = vcmask 523264  }
  0x39   : > { %2007 = vmatprep.mubr.f32.mxu1 %v3089_v1  ;;  %s3092_s14 = smov 66   ;;  %s3093_s15 = smov 53   ;;  %vm1084_vm13 = vcmask 539648   ;;  %vm1058_vm14 = vcmask 531456   ;;  %vm1008_vm15 = vcmask 441344  }
  0x3a   : > { %v267_v3 = vadd.s32 128, %v266_v2  ;;  %v272_v4 = vand.u32 15, %v266_v2  ;;  %s3094_s16 = smov 54   ;;  %s3095_s8 = smov 52  }
  0x3b   : > { %s3096_s7 = smov 49   ;;  %s3097_s9 = smov 50  }
  0x3c   : > { %v279_v5 = vand.u32 15, %v267_v3  ;;  %vm292_vm0 = vcmp.ge.s32.totalorder %v272_v4, 3  ;;  %v302_v6 = vadd.s32 1, %v272_v4  ;;  %v314_v7 = vadd.s32 2, %v272_v4  ;;  %s3098_s10 = smov 38   ;;  %s3099_s11 = smov 48  }
  0x3d   : > { %v2704_v8 = vsel %vm292_vm0, 1.0, %v3089_v1  ;;  %v338_v9 = vadd.s32 5, %v272_v4  ;;  %v350_v10 = vadd.s32 6, %v272_v4  ;;  %v326_v11 = vadd.s32 4, %v272_v4  ;;  %s3100_s13 = smov 36   ;;  %s3101_s17 = smov 37  }
  0x3e   : > { %vm293_vm1 = vcmp.ge.s32.totalorder %v279_v5, 3  ;;  %v303_v12 = vadd.s32 1, %v279_v5  ;;  %vm304_vm2 = vcmp.ge.s32.totalorder %v302_v6, 3  ;;  %v315_v13 = vadd.s32 2, %v279_v5  ;;  %s3102_s25 = smov 34   ;;  %s3103_s26 = smov 32  }
  0x3f   : > { %v2705_v14 = vsel %vm293_vm1, 1.0, %v3089_v1  ;;  %v2706_v15 = vsel %vm304_vm2, 1.0, %v3089_v1  ;;  %vm316_vm3 = vcmp.ge.s32.totalorder %v314_v7, 3  ;;  %v339_v16 = vadd.s32 5, %v279_v5  ;;  %p258_p11 = scmp.lt.s32.totalorder %s3228_s22, 1  ;;  %p4590_p13 = scmp.ne.s32.totalorder %s4534_s30, 0 }
  0x40   : > { %v3318_v17 = vcombine.low %v2704_v8, %v2705_v14  ;;  %vm305_vm4 = vcmp.ge.s32.totalorder %v303_v12, 3  ;;  %vm317_vm5 = vcmp.ge.s32.totalorder %v315_v13, 3  ;;  %v2708_v18 = vsel %vm316_vm3, 1.0, %v3089_v1 }
  0x41   : > { %v2707_v19 = vsel %vm305_vm4, 1.0, %v3089_v1  ;;  %v2709_v20 = vsel %vm317_vm5, 1.0, %v3089_v1  ;;  %vm342_vm6 = vcmp.lt.s32.totalorder %v338_v9, 19  ;;  %vm343_vm7 = vcmp.lt.s32.totalorder %v339_v16, 19 }
  0x42   : > { %1031 = vrot.lane.b32.xlu0 %v3318_v17, %s3090_s29  ;;  %v3325_v21 = vcombine.low %v2706_v15, %v2707_v19  ;;  %v3327_v22 = vcombine.low %v2708_v18, %v2709_v20  ;;  %v2712_v23 = vsel %vm342_vm6, 1.0, %v3089_v1  ;;  %v2713_v24 = vsel %vm343_vm7, 1.0, %v3089_v1 }
  0x43   : > { %v351_v25 = vadd.s32 6, %v279_v5  ;;  %vm354_vm8 = vcmp.lt.s32.totalorder %v350_v10, 19  ;;  %v327_v26 = vadd.s32 4, %v279_v5  ;;  %v3332_v27 = vcombine.low %v2712_v23, %v2713_v24 }
  0x44   : > { %1055 = vrot.lane.b32.xlu1 %v3325_v21, %s3091_s12  ;;  %v2714_v28 = vsel %vm354_vm8, 1.0, %v3089_v1  ;;  %vm330_vm9 = vcmp.lt.s32.totalorder %v326_v11, 19  ;;  %s3104_s12 = smov 33   ;;  %vm983_vm0 = vcmask 433152   ;;  %vm957_vm1 = vcmask 424960  }
  0x45   : > { %vm355_vm10 = vcmp.lt.s32.totalorder %v351_v25, 19  ;;  %vm331_vm11 = vcmp.lt.s32.totalorder %v327_v26, 19  ;;  %v2710_v29 = vsel %vm330_vm9, 1.0, %v3089_v1  ;;  %vm918_vm2 = vcmask 408576  }
  0x46   : > { %1081 = vrot.lane.b32.xlu0 %v3327_v22, %s3092_s14  ;;  %v2715_v30 = vsel %vm355_vm10, 1.0, %v3089_v1  ;;  %v2711_v31 = vsel %vm331_vm11, 1.0, %v3089_v1  ;;  %s3105_s14 = smov 21   ;;  %vm893_vm3 = vcmask 400384   ;;  %vm842_vm4 = vcmask 310272  }
  0x47   : > { %v3339_v32 = vcombine.low %v2714_v28, %v2715_v30  ;;  %v3342_v33 = vcombine.low %v2710_v29, %v2711_v31  ;;  %vm867_vm5 = vcmask 392192   ;;  %vm791_vm6 = vcmask 293888  }
  0x48   : > { %980 = vrot.lane.b32.xlu1 %v3332_v27, %s3093_s15  ;;  %s3106_s15 = smov 22   ;;  %vm816_vm7 = vcmask 302080   ;;  %vm753_vm8 = vcmask 277504   ;;  %vm702_vm9 = vcmask 261120   ;;  %vm1112_vm10 = vcmask 498688  }
  0x49   : > { %vm727_vm11 = vcmask 269312  }
  0x4a   : > { %1005 = vrot.lane.b32.xlu0 %v3339_v32, %s3094_s16  ;;  %s3107_s16 = smov 20  }
  0x4c   : > { %954 = vrot.lane.b32.xlu1 %v3342_v33, %s3095_s8  ;;  %s3108_s8 = smov 17  }
  0x4e   : > { %890 = vrot.lane.b32.xlu0 %v3325_v21, %s3096_s7  ;;  %s3109_s7 = smov 18  }
  0x50   : > { %915 = vrot.lane.b32.xlu1 %v3327_v22, %s3097_s9  ;;  %s3110_s9 = smov 6  }
  0x52   : > { %839 = vrot.lane.b32.xlu0 %v3339_v32, %s3098_s10  ;;  %s4505_s10 = smov 16  }
  0x54   : > { %864 = vrot.lane.b32.xlu1 %v3318_v17, %s3099_s11 }
  0x56   : > { %788 = vrot.lane.b32.xlu0 %v3342_v33, %s3100_s13  ;;  %s3112_s13 = smov 4  }
  0x58   : > { %813 = vrot.lane.b32.xlu1 %v3332_v27, %s3101_s17  ;;  %s3113_s17 = smov 5  }
  0x5a   : > { %750 = vrot.lane.b32.xlu0 %v3327_v22, %s3102_s25  ;;  %s3114_s25 = smov 2  }
  0x5c   : > { %699 = vrot.lane.b32.xlu1 %v3318_v17, %s3103_s26 }
  0x5e   : > { %724 = vrot.lane.b32.xlu0 %v3325_v21, %s3104_s12  ;;  %s3115_s12 = smov 1  }
  0x60   : > { %648 = vrot.lane.b32.xlu1 %v3332_v27, %s3105_s14  ;;  %s3116_s14 = smov 102  }
  0x62   : > { %673 = vrot.lane.b32.xlu0 %v3339_v32, %s3106_s15  ;;  %s3117_s15 = smov 100  }
  0x64   : > { %622 = vrot.lane.b32.xlu1 %v3342_v33, %s3107_s16  ;;  %s3118_s16 = smov 101  }
  0x66   : > { %557 = vrot.lane.b32.xlu0 %v3325_v21, %s3108_s8  ;;  %s3119_s8 = smov 98  }
  0x68   : > { %582 = vrot.lane.b32.xlu1 %v3327_v22, %s3109_s7  ;;  %s3120_s7 = smov 96  }
  0x6a   : > { %506 = vrot.lane.b32.xlu0 %v3339_v32, %s3110_s9  ;;  %s3121_s9 = smov 97  }
  0x6c   : > { %531 = vrot.lane.b32.xlu1 %v3318_v17, %s4505_s10  ;;  %s3131_s10 = smov 61  }
  0x6e   : > { %449 = vrot.lane.b32.xlu0 %v3342_v33, %s3112_s13  ;;  %s3122_s13 = smov 85  }
  0x70   : > { %477 = vrot.lane.b32.xlu1 %v3332_v27, %s3113_s17  ;;  %s3123_s17 = smov 86  }
  0x72   : > { %404 = vrot.lane.b32.xlu0 %v3327_v22, %s3114_s25  ;;  %s259_s25 = scalar_select %p258_p11, %s3228_s22, 1 }
  0x74   : > { %375 = vrot.lane.b32.xlu1 %v3325_v21, %s3115_s12  ;;  %s3124_s12 = smov 84  }
  0x76   : > { %1498 = vrot.lane.b32.xlu0 %v3339_v32, %s3116_s14  ;;  %s3125_s14 = smov 81  }
  0x78   : > { %1447 = vrot.lane.b32.xlu1 %v3342_v33, %s3117_s15  ;;  %s2771_s15 = smul.u32 12, %s259_s25  ;;  %s3129_s25 = smov 68  }
  0x7a   : > { %1472 = vrot.lane.b32.xlu0 %v3332_v27, %s3118_s16  ;;  %s3126_s16 = smov 82  }
  0x7c   : > { %1409 = vrot.lane.b32.xlu1 %v3327_v22, %s3119_s8  ;;  %s3127_s8 = smov 70  }
  0x7e   : > { %1360 = vrot.lane.b32.xlu0 %v3318_v17, %s3120_s7 }
  0x80   : > { %1383 = vrot.lane.b32.xlu1 %v3325_v21, %s3121_s9  ;;  %s3136_s9 = smov 63  }
  0x82   : > { %1309 = vrot.lane.b32.xlu0 %v3332_v27, %s3122_s13  ;;  %s3387_s13 = scalar_lea.vmem %s4497_s0, %s2771_s15  ;;  %s3133_s15 = smov 62  }
  0x83   : > { %v3392_v34 = vld [vmem:[%s3387_s13 + $0x8] sm:$0xf]  ;;  %v3396_v35 = vld [vmem:[%s3387_s13] sm:$0xff] }
  0x84   : > { %1334 = vrot.lane.b32.xlu1 %v3339_v32, %s3123_s17  ;;  %s3128_s17 = smov 80   ;;  %v3401_v36 = vcombine.low %v3392_v34, %v3392_v34  ;;  %v3406_v37 = vcombine.high %v3396_v35, %v3396_v35  ;;  %v3411_v38 = vcombine.low %v3396_v35, %v3396_v35 }
  0x86   : > { %1283 = vrot.lane.b32.xlu0 %v3342_v33, %s3124_s12  ;;  %s3130_s12 = smov 69  }
  0x88   : > { %1219 = vrot.lane.b32.xlu1 %v3325_v21, %s3125_s14  ;;  %s3132_s14 = smov 77  }
  0x8a   : > { %1244 = vrot.lane.b32.xlu0 %v3327_v22, %s3126_s16  ;;  %s3134_s16 = smov 75  }
  0x8c   : > { %1170 = vrot.lane.b32.xlu1 %v3339_v32, %s3127_s8  ;;  %s3135_s8 = smov 79  }
  0x8e   : > { %1195 = vrot.lane.b32.xlu0 %v3318_v17, %s3128_s17 }
  0x90   : > { %1119 = vrot.lane.b32.xlu1 %v3342_v33, %s3129_s25  ;;  %s3138_s25 = smov 76  }
  0x92   : > { %1144 = vrot.lane.b32.xlu0 %v3332_v27, %s3130_s12  ;;  %s3139_s12 = smov 78  }
  0x94   : > { %1108 = vrot.lane.b32.xlu1 %v3396_v35, %s3131_s10 }
  0x96   : > { %1110 = vrot.lane.b32.xlu0 %v3401_v36, %s3131_s10 }
  0x98   : > { %943 = vrot.lane.b32.xlu1 %v3406_v37, %s3132_s14 }
  0x9a   : > { %1106 = vrot.lane.b32.xlu0 %v3411_v38, %s3131_s10  ;;  %s3140_s10 = smov 90  }
  0x9c   : > { %941 = vrot.lane.b32.xlu1 %v3396_v35, %s3132_s14 }
  0x9e   : > { %945 = vrot.lane.b32.xlu0 %v3392_v34, %s3132_s14  ;;  %s3141_s14 = smov 92  }
  0xb4   : > { %v1032_v39 = vpop.permute.xlu0 %1031 }
  0xb5   : > { %v1033_v40 = vrot.slane %v1032_v39, 4 }
  0xb6   : > { %v1056_v41 = vpop.permute.xlu1 %1055 }
  0xb7   : > { %v1035_v42 = vsel %vm1034_vm12, %v1033_v40, %v1032_v39  ;;  %v1039_v43 = vmul.f32 %v1033_v40, %v3392_v34  ;;  %v1057_v53 = vrot.slane %v1056_v41, 4 }
  0xb8   : > { %v1082_v44 = vpop.permute.xlu0 %1081  ;;  %v1038_v45 = vmul.f32 %v1035_v42, %v3396_v35 }
  0xb9   : > { %v1083_v46 = vrot.slane %v1082_v44, 4  ;;  %1047 = vrot.lane.b32.xlu0 %v1039_v43, %s3090_s29  ;;  %v1059_v58 = vsel %vm1058_vm14, %v1057_v53, %v1056_v41  ;;  %v1063_v63 = vmul.f32 %v1057_v53, %v3392_v34  ;;  %vm651_vm14 = vcmask 171008  }
  0xba   : > { %1043 = vrot.lane.b32.xlu1 %v1038_v45, %s3090_s29  ;;  %v981_v47 = vpop.permute.xlu1 %980  ;;  %v1042_v57 = vcombine.high %v1038_v45, %v1038_v45  ;;  %v1062_v0 = vmul.f32 %v1059_v58, %v3396_v35 }
  0xbb   : > { %v1085_v48 = vsel %vm1084_vm13, %v1083_v46, %v1082_v44  ;;  %v982_v49 = vrot.slane %v981_v47, 4  ;;  %v1089_v50 = vmul.f32 %v1083_v46, %v3392_v34  ;;  %v1067_v6 = vcombine.low %v1063_v63, %v1063_v63 }
  0xbc   : > { %v1006_v51 = vpop.permute.xlu0 %1005  ;;  %v3424_v52 = vmul.f32 %v1085_v48, %v3396_v35  ;;  %v1066_v31 = vcombine.low %v1062_v0, %v1062_v0  ;;  %vm947_vm13 = vcmask 629760  }
  0xbd   : > { %1097 = vrot.lane.b32.xlu0 %v1089_v50, %s3133_s15  ;;  %v988_v54 = vmul.f32 %v982_v49, %v3392_v34  ;;  %v1007_v59 = vrot.slane %v1006_v51, 4  ;;  %v984_v10 = vsel %vm983_vm0, %v982_v49, %v981_v47  ;;  %vm625_vm0 = vcmask 162816  }
  0xbe   : > { %1093 = vrot.lane.b32.xlu1 %v3424_v52, %s3133_s15  ;;  %v955_v55 = vpop.permute.xlu1 %954  ;;  %v987_v15 = vmul.f32 %v984_v10, %v3396_v35  ;;  %v1092_v41 = vcombine.high %v3424_v52, %v3424_v52 }
  0xbf   : > { %v1009_v3 = vsel %vm1008_vm15, %v1007_v59, %v1006_v51  ;;  %v956_v4 = vrot.slane %v955_v55, 4  ;;  %v1013_v7 = vmul.f32 %v1007_v59, %v3392_v34  ;;  %vm676_vm15 = vcmask 179200  }
  0xc0   : > { %v891_v56 = vpop.permute.xlu0 %890  ;;  %v1012_v8 = vmul.f32 %v1009_v3, %v3396_v35  ;;  %v991_v46 = vcombine.high %v987_v15, %v987_v15 }
  0xc1   : > { %v892_v60 = vrot.slane %v891_v56, 4  ;;  %996 = vrot.lane.b32.xlu0 %v988_v54, %s3134_s16  ;;  %v962_v12 = vmul.f32 %v956_v4, %v3392_v34  ;;  %v1017_v14 = vcombine.low %v1013_v7, %v1013_v7  ;;  %v958_v18 = vsel %vm957_vm1, %v956_v4, %v955_v55 }
  0xc2   : > { %1045 = vrot.lane.b32.xlu1 %v1042_v57, %s3090_s29  ;;  %v916_v61 = vpop.permute.xlu1 %915  ;;  %s3137_s29 = smov 74   ;;  %v961_v22 = vmul.f32 %v958_v18, %v3396_v35  ;;  %v1016_v40 = vcombine.low %v1012_v8, %v1012_v8  ;;  %vm560_vm1 = vcmask 138240  }
  0xc3   : > { %v898_v62 = vmul.f32 %v892_v60, %v3392_v34  ;;  %v917_v11 = vrot.slane %v916_v61, 4  ;;  %v966_v19 = vcombine.low %v962_v12, %v962_v12  ;;  %v894_v29 = vsel %vm893_vm3, %v892_v60, %v891_v56 }
  0xc4   : > { %v3435_v2 = vpop.permute.xlu0 %839  ;;  %v897_v32 = vmul.f32 %v894_v29, %v3396_v35  ;;  %v965_v45 = vcombine.low %v961_v22, %v961_v22  ;;  %vm509_vm3 = vcmask 48128  }
  0xc5   : > { %906 = vrot.lane.b32.xlu0 %v898_v62, %s3135_s8  ;;  %v923_v20 = vmul.f32 %v917_v11, %v3392_v34  ;;  %v919_v24 = vsel %vm918_vm2, %v917_v11, %v916_v61  ;;  %v841_v43 = vrot.slane %v3435_v2, 4  ;;  %vm585_vm2 = vcmask 146432  }
  0xc6   : > { %1070 = vrot.lane.b32.xlu1 %v1062_v0, %s3136_s9  ;;  %v3439_v5 = vpop.permute.xlu1 %864  ;;  %v922_v27 = vmul.f32 %v919_v24, %v3396_v35  ;;  %v901_v53 = vcombine.high %v897_v32, %v897_v32 }
  0xc7   : > { %v927_v25 = vcombine.low %v923_v20, %v923_v20  ;;  %v843_v48 = vsel %vm842_vm4, %v841_v43, %v3435_v2  ;;  %v866_v52 = vrot.slane %v3439_v5, 4  ;;  %v847_v56 = vmul.f32 %v841_v43, %v3392_v34 }
  0xc8   : > { %v3443_v9 = vpop.permute.xlu0 %788  ;;  %v926_v50 = vcombine.low %v922_v27, %v922_v27  ;;  %v846_v51 = vmul.f32 %v843_v48, %v3396_v35  ;;  %vm534_vm4 = vcmask 130048  }
  0xc9   : > { %1072 = vrot.lane.b32.xlu0 %v1067_v6, %s3136_s9  ;;  %v872_v57 = vmul.f32 %v866_v52, %v3392_v34  ;;  %v868_v58 = vsel %vm867_vm5, %v866_v52, %v3439_v5  ;;  %v790_v61 = vrot.slane %v3443_v9, 4 }
  0xca   : > { %1020 = vrot.lane.b32.xlu1 %v1012_v8, %s3137_s29  ;;  %v3448_v13 = vpop.permute.xlu1 %813  ;;  %v850_v59 = vcombine.high %v846_v51, %v846_v51  ;;  %v871_v0 = vmul.f32 %v868_v58, %v3396_v35 }
  0xcb   : > { %v876_v63 = vcombine.low %v872_v57, %v872_v57  ;;  %v792_v3 = vsel %vm791_vm6, %v790_v61, %v3443_v9  ;;  %v815_v7 = vrot.slane %v3448_v13, 4  ;;  %v796_v9 = vmul.f32 %v790_v61, %v3392_v34 }
  0xcc   : > { %v3451_v16 = vpop.permute.xlu0 %750  ;;  %v875_v5 = vcombine.low %v871_v0, %v871_v0  ;;  %v795_v6 = vmul.f32 %v792_v3, %v3396_v35  ;;  %vm1074_vm6 = vcmask 515072  }
  0xcd   : > { %1022 = vrot.lane.b32.xlu0 %v1017_v14, %s3137_s29  ;;  %v821_v11 = vmul.f32 %v815_v7, %v3392_v34  ;;  %v817_v12 = vsel %vm816_vm7, %v815_v7, %v3448_v13  ;;  %v752_v18 = vrot.slane %v3451_v16, 4  ;;  %vm452_vm7 = vcmask 31744  }
  0xce   : > { %992 = vrot.lane.b32.xlu1 %v987_v15, %s3134_s16  ;;  %v3456_v21 = vpop.permute.xlu1 %699  ;;  %v799_v14 = vcombine.high %v795_v6, %v795_v6 }
  0xcf   : > { %v825_v20 = vcombine.low %v821_v11, %v821_v11 }
  0xd0   : > { %v3459_v23 = vpop.permute.xlu0 %724 }
  0xd1   : > { %971 = vrot.lane.b32.xlu0 %v966_v19, %s3138_s25  ;;  %v726_v52 = vrot.slane %v3459_v23, 4 }
  0xd2   : > { %969 = vrot.lane.b32.xlu1 %v961_v22, %s3138_s25  ;;  %v3463_v26 = vpop.permute.xlu1 %648  ;;  %v820_v22 = vmul.f32 %v817_v12, %v3396_v35 }
  0xd3   : > { %v732_v58 = vmul.f32 %v726_v52, %v3392_v34 }
  0xd4   : > { %v3466_v28 = vpop.permute.xlu0 %673 }
  0xd5   : > { %932 = vrot.lane.b32.xlu0 %v927_v25, %s3139_s12  ;;  %v754_v25 = vsel %vm753_vm8, %v752_v18, %v3451_v16  ;;  %v701_v16 = vrot.slane %v3456_v21, 4  ;;  %vm973_vm8 = vcmask 621568  }
  0xd6   : > { %930 = vrot.lane.b32.xlu1 %v922_v27, %s3139_s12  ;;  %v3470_v30 = vpop.permute.xlu1 %622  ;;  %v824_v27 = vcombine.low %v820_v22, %v820_v22  ;;  %v757_v29 = vmul.f32 %v754_v25, %v3396_v35 }
  0xd7   : > { %v703_v48 = vsel %vm702_vm9, %v701_v16, %v3456_v21  ;;  %v707_v57 = vmul.f32 %v701_v16, %v3392_v34  ;;  %v624_v16 = vrot.slane %v3470_v30, 4 }
  0xd8   : > { %v3473_v33 = vpop.permute.xlu0 %557 }
  0xd9   : > { %1068 = vrot.lane.b32.xlu0 %v1066_v31, %s3136_s9  ;;  %s3146_s9 = smov 107  }
  0xda   : > { %902 = vrot.lane.b32.xlu1 %v897_v32, %s3135_s8  ;;  %v3477_v39 = vpop.permute.xlu1 %582 }
  0xdc   : > { %v3481_v42 = vpop.permute.xlu0 %506 }
  0xdd   : > { %1018 = vrot.lane.b32.xlu0 %v1016_v40, %s3137_s29  ;;  %v758_v40 = vmul.f32 %v752_v18, %v3392_v34  ;;  %s3147_s29 = smov 106  }
  0xde   : > { %1095 = vrot.lane.b32.xlu1 %v1092_v41, %s3133_s15  ;;  %v3486_v44 = vpop.permute.xlu1 %531  ;;  %v761_v41 = vcombine.high %v757_v29, %v757_v29  ;;  %s3143_s15 = smov 94  }
  0xe0   : > { %v3488_v47 = vpop.permute.xlu0 %449 }
  0xe1   : > { %967 = vrot.lane.b32.xlu0 %v965_v45, %s3138_s25  ;;  %s3149_s25 = smov 108  }
  0xe2   : > { %994 = vrot.lane.b32.xlu1 %v991_v46, %s3134_s16  ;;  %v3493_v49 = vpop.permute.xlu1 %477  ;;  %s3144_s16 = smov 93  }
  0xe4   : > { %v3497_v54 = vpop.permute.xlu0 %404 }
  0xe5   : > { %928 = vrot.lane.b32.xlu0 %v926_v50, %s3139_s12  ;;  %s3150_s12 = smov 111  }
  0xe6   : > { %904 = vrot.lane.b32.xlu1 %v901_v53, %s3135_s8  ;;  %v3501_v55 = vpop.permute.xlu1 %375  ;;  %s3145_s8 = smov 95  }
  0xe8   : > { %v3507_v60 = vpop.permute.xlu0 %1498 }
  0xe9   : > { %855 = vrot.lane.b32.xlu0 %v847_v56, %s3140_s10 }
  0xea   : > { %853 = vrot.lane.b32.xlu1 %v850_v59, %s3140_s10  ;;  %v3510_v62 = vpop.permute.xlu1 %1447  ;;  %v728_v59 = vsel %vm727_vm11, %v726_v52, %v3459_v23  ;;  %vm934_vm11 = vcmask 637952  }
  0xeb   : > { %v731_v7 = vmul.f32 %v728_v59, %v3396_v35 }
  0xec   : > { %v3513_v2 = vpop.permute.xlu0 %1472 }
  0xed   : > { %881 = vrot.lane.b32.xlu0 %v876_v63, %s3128_s17 }
  0xee   : > { %879 = vrot.lane.b32.xlu1 %v871_v0, %s3128_s17  ;;  %v3518_v4 = vpop.permute.xlu1 %1409  ;;  %v650_v0 = vrot.slane %v3463_v26, 4 }
  0xf0   : > { %v3522_v8 = vpop.permute.xlu0 %1360  ;;  %v652_v11 = vsel %vm651_vm14, %v650_v0, %v3463_v26  ;;  %v656_v25 = vmul.f32 %v650_v0, %v3392_v34  ;;  %vm1099_vm14 = vcmask 506880  }
  0xf1   : > { %877 = vrot.lane.b32.xlu0 %v875_v5, %s3128_s17  ;;  %s3142_s17 = smov 91   ;;  %v655_v18 = vmul.f32 %v652_v11, %v3396_v35 }
  0xf2   : > { %851 = vrot.lane.b32.xlu1 %v846_v51, %s3140_s10  ;;  %v3525_v10 = vpop.permute.xlu1 %1383  ;;  %v706_v51 = vmul.f32 %v703_v48, %v3396_v35  ;;  %v630_v48 = vmul.f32 %v624_v16, %v3392_v34  ;;  %s3151_s10 = smov 110  }
  0xf4   : > { %v3530_v15 = vpop.permute.xlu0 %1309  ;;  %v710_v61 = vcombine.high %v706_v51, %v706_v51  ;;  %v634_v52 = vcombine.low %v630_v48, %v630_v48  ;;  %v451_v48 = vrot.slane %v3488_v47, 4 }
  0xf5   : > { %804 = vrot.lane.b32.xlu0 %v796_v9, %s3141_s14 }
  0xf6   : > { %802 = vrot.lane.b32.xlu1 %v799_v14, %s3141_s14  ;;  %v3533_v19 = vpop.permute.xlu1 %1334  ;;  %v735_v14 = vcombine.low %v731_v7, %v731_v7 }
  0xf8   : > { %v3536_v24 = vpop.permute.xlu0 %1283 }
  0xf9   : > { %830 = vrot.lane.b32.xlu0 %v825_v20, %s3142_s17  ;;  %v675_v20 = vrot.slane %v3466_v28, 4 }
  0xfa   : > { %828 = vrot.lane.b32.xlu1 %v820_v22, %s3142_s17  ;;  %v3539_v13 = vpop.permute.xlu1 %1219 }
  0xfb   : > { %v681_v22 = vmul.f32 %v675_v20, %v3392_v34  ;;  %v677_v26 = vsel %vm676_vm15, %v675_v20, %v3466_v28  ;;  %v626_v28 = vsel %vm625_vm0, %v624_v16, %v3470_v30  ;;  %vm998_vm15 = vcmask 613376  }
  0xfc   : > { %v3542_v31 = vpop.permute.xlu0 %1244  ;;  %vm908_vm0 = vcmask 646144  }
  0xfd   : > { %826 = vrot.lane.b32.xlu0 %v824_v27, %s3142_s17  ;;  %v659_v27 = vcombine.high %v655_v18, %v655_v18  ;;  %s3153_s17 = smov 112  }
  0xfe   : > { %800 = vrot.lane.b32.xlu1 %v795_v6, %s3141_s14  ;;  %v3544_v32 = vpop.permute.xlu1 %1170  ;;  %v736_v6 = vcombine.low %v732_v58, %v732_v58  ;;  %s3152_s14 = smov 122  }
 0x100   : > { %v3547_v43 = vpop.permute.xlu0 %1195 }
 0x101   : > { %766 = vrot.lane.b32.xlu0 %v758_v40, %s3143_s15  ;;  %v680_v40 = vmul.f32 %v677_v26, %v3396_v35 }
 0x102   : > { %764 = vrot.lane.b32.xlu1 %v761_v41, %s3143_s15  ;;  %v3550_v45 = vpop.permute.xlu1 %1119 }
 0x103   : > { %v684_v41 = vcombine.low %v680_v40, %v680_v40 }
 0x104   : > { %v3552_v46 = vpop.permute.xlu0 %1144 }
 0x105   : > { %779 = vrot.lane.b32.xlu0 %v3401_v36, %s3144_s16 }
 0x106   : > { %777 = vrot.lane.b32.xlu1 %v3396_v35, %s3144_s16  ;;  %v1109_v50 = vpop.permute.xlu1 %1108 }
 0x108   : > { %v1111_v53 = vpop.permute.xlu0 %1110 }
 0x109   : > { %775 = vrot.lane.b32.xlu0 %v3411_v38, %s3144_s16  ;;  %v1114_v56 = vsel %vm1112_vm10, %v1109_v50, %v1111_v53  ;;  %s3155_s16 = smov 123  }
 0x10a   : > { %762 = vrot.lane.b32.xlu1 %v757_v29, %s3143_s15  ;;  %1118 = vst [vmem:[#allocation2 + $0x140] sm:$0xf0] %v1114_v56  ;;  %v944_v21 = vpop.permute.xlu1 %943  ;;  %v685_v29 = vcombine.low %v681_v22, %v681_v22  ;;  %v533_v22 = vrot.slane %v3486_v44, 4  ;;  %s3154_s15 = smov 124  }
 0x10c   : > { %v1107_v63 = vpop.permute.xlu0 %1106  ;;  %v539_v26 = vmul.f32 %v533_v22, %v3392_v34 }
 0x10d   : > { %715 = vrot.lane.b32.xlu0 %v707_v57, %s3120_s7  ;;  %v1113_v3 = vsel %vm1112_vm10, %v1107_v63, %v1109_v50  ;;  %v559_v50 = vrot.slane %v3473_v33, 4  ;;  %v584_v57 = vrot.slane %v3477_v39, 4  ;;  %vm480_vm10 = vcmask 39936  }
 0x10e   : > { %713 = vrot.lane.b32.xlu1 %v710_v61, %s3120_s7  ;;  %1117 = vst [vmem:[#allocation2 + $0xf0] sm:$0xf0] %v1113_v3  ;;  %v942_v5 = vpop.permute.xlu1 %941 }
 0x10f   : > { %v948_v9 = vsel %vm947_vm13, %v942_v5, %v944_v21  ;;  %v561_v53 = vsel %vm560_vm1, %v559_v50, %v3473_v33  ;;  %v565_v59 = vmul.f32 %v559_v50, %v3392_v34  ;;  %v590_v61 = vmul.f32 %v584_v57, %v3392_v34 }
 0x110   : > { %952 = vst [vmem:[#allocation2 + $0xe8] sm:$0xf] %v948_v9  ;;  %v946_v23 = vpop.permute.xlu0 %945  ;;  %v564_v30 = vmul.f32 %v561_v53, %v3396_v35  ;;  %v586_v0 = vsel %vm585_vm2, %v584_v57, %v3477_v39  ;;  %v508_v5 = vrot.slane %v3481_v42, 4  ;;  %v543_v50 = vcombine.low %v539_v26, %v539_v26 }
 0x111   : > { %741 = vrot.lane.b32.xlu0 %v736_v6, %s3145_s8  ;;  %v949_v12 = vsel %vm947_vm13, %v944_v21, %v946_v23  ;;  %v589_v6 = vmul.f32 %v586_v0, %v3396_v35  ;;  %v479_v57 = vrot.slane %v3493_v49, 4  ;;  %vm407_vm13 = vcmask 15360  }
 0x112   : > { %739 = vrot.lane.b32.xlu1 %v731_v7, %s3145_s8  ;;  %953 = vst [vmem:[#allocation2 + $0xf8] sm:$0xf] %v949_v12  ;;  %v568_v33 = vcombine.high %v564_v30, %v564_v30  ;;  %v594_v7 = vcombine.low %v590_v61, %v590_v61  ;;  %v510_v11 = vsel %vm509_vm3, %v508_v5, %v3481_v42  ;;  %vm1501_vm1 = vcmask 834560  }
 0x113   : > { %v513_v20 = vmul.f32 %v510_v11, %v3396_v35  ;;  %v514_v42 = vmul.f32 %v508_v5, %v3392_v34  ;;  %v485_v61 = vmul.f32 %v479_v57, %v3392_v34  ;;  %v481_v5 = vsel %vm480_vm10, %v479_v57, %v3493_v49 }
 0x114   : > { %v484_v11 = vmul.f32 %v481_v5, %v3396_v35  ;;  %vm378_vm2 = vcmask 7168   ;;  %vm857_vm3 = vcmask 736256   ;;  %vm1412_vm10 = vcmask 801792  }
 0x115   : > { %737 = vrot.lane.b32.xlu0 %v735_v14, %s3145_s8  ;;  %v593_v14 = vcombine.low %v589_v6, %v589_v6  ;;  %s3156_s8 = smov 126  }
 0x116   : > { %711 = vrot.lane.b32.xlu1 %v706_v51, %s3120_s7  ;;  %s3148_s7 = smov 109   ;;  %v629_v51 = vmul.f32 %v626_v28, %v3396_v35  ;;  %v488_v49 = vcombine.low %v484_v11, %v484_v11 }
 0x118   : > { %v633_v56 = vcombine.low %v629_v51, %v629_v51 }
 0x119   : > { %664 = vrot.lane.b32.xlu0 %v656_v25, %s3146_s9 }
 0x11a   : > { %662 = vrot.lane.b32.xlu1 %v659_v27, %s3146_s9 }
 0x11d   : > { %690 = vrot.lane.b32.xlu0 %v685_v29, %s3147_s29  ;;  %v517_v29 = vcombine.high %v513_v20, %v513_v20 }
 0x11e   : > { %688 = vrot.lane.b32.xlu1 %v680_v40, %s3147_s29  ;;  %v535_v40 = vsel %vm534_vm4, %v533_v22, %v3486_v44  ;;  %v453_v44 = vsel %vm452_vm7, %v451_v48, %v3488_v47  ;;  %v457_v47 = vmul.f32 %v451_v48, %v3392_v34  ;;  %vm883_vm4 = vcmask 654336  }
 0x11f   : > { %v538_v28 = vmul.f32 %v535_v40, %v3396_v35  ;;  %vm1475_vm7 = vcmask 826368  }
 0x121   : > { %686 = vrot.lane.b32.xlu0 %v684_v41, %s3147_s29  ;;  %s3159_s29 = smov 127  }
 0x122   : > { %660 = vrot.lane.b32.xlu1 %v655_v18, %s3146_s9  ;;  %s3157_s9 = smov 125  }
 0x125   : > { %613 = vrot.lane.b32.xlu0 %v3392_v34, %s3148_s7 }
 0x126   : > { %611 = vrot.lane.b32.xlu1 %v3406_v37, %s3148_s7 }
 0x129   : > { %639 = vrot.lane.b32.xlu0 %v634_v52, %s3149_s25 }
 0x12a   : > { %637 = vrot.lane.b32.xlu1 %v629_v51, %s3149_s25 }
 0x12b   : > { %v1048_v21 = vpop.permute.xlu0 %1047 }
 0x12c   : > { %v1044_v58 = vpop.permute.xlu1 %1043 }
 0x12d   : > { %635 = vrot.lane.b32.xlu0 %v633_v56, %s3149_s25  ;;  %v542_v56 = vcombine.low %v538_v28, %v538_v28  ;;  %s3161_s25 = smov 28  }
 0x12e   : > { %609 = vrot.lane.b32.xlu1 %v3396_v35, %s3148_s7  ;;  %s3160_s7 = smov 26  }
 0x12f   : > { %v3593_v63 = vpop.permute.xlu0 %1097 }
 0x130   : > { %v3596_v3 = vpop.permute.xlu1 %1093 }
 0x131   : > { %573 = vrot.lane.b32.xlu0 %v565_v59, %s3150_s12 }
 0x132   : > { %571 = vrot.lane.b32.xlu1 %v568_v33, %s3150_s12 }
 0x133   : > { %v3600_v9 = vpop.permute.xlu0 %996 }
 0x134   : > { %v1046_v23 = vpop.permute.xlu1 %1045 }
 0x135   : > { %v1049_v12 = vsel %vm1034_vm12, %v1044_v58, %v1046_v23  ;;  %v1050_v39 = vsel %vm1034_vm12, %v1046_v23, %v1048_v21  ;;  %599 = vrot.lane.b32.xlu0 %v594_v7, %s3151_s10  ;;  %vm1024_vm12 = vcmask 605184   ;;  %v406_v7 = vrot.slane %v3497_v54, 4 }
 0x136   : > { %1053 = vst [vmem:[#allocation2 + $0xa0] sm:$0xf] %v1049_v12  ;;  %1054 = vst [vmem:[#allocation2 + $0x170] sm:$0xf] %v1050_v39  ;;  %597 = vrot.lane.b32.xlu1 %v589_v6, %s3151_s10  ;;  %v489_v12 = vcombine.low %v485_v61, %v485_v61 }
 0x137   : > { %v3605_v18 = vpop.permute.xlu0 %906  ;;  %v408_v22 = vsel %vm407_vm13, %v406_v7, %v3497_v54  ;;  %v366_v54 = vmul.f32 %v3318_v17, %v3396_v35  ;;  %vm781_vm13 = vcmask 760832  }
 0x138   : > { %v1071_v25 = vpop.permute.xlu1 %1070  ;;  %v3631_v26 = vmul.f32 %v408_v22, %v3396_v35 }
 0x139   : > { %595 = vrot.lane.b32.xlu0 %v593_v14, %s3151_s10  ;;  %370 = vst [vmem:[#allocation2 + $0xb0] sm:$0xf] %v366_v54  ;;  %s3163_s10 = smov 30  }
 0x13a   : > { %569 = vrot.lane.b32.xlu1 %v564_v30, %s3150_s12  ;;  %v456_v30 = vmul.f32 %v453_v44, %v3396_v35  ;;  %s3162_s12 = smov 27  }
 0x13b   : > { %v1073_v27 = vpop.permute.xlu0 %1072 }
 0x13c   : > { %v1076_v41 = vsel %vm1074_vm6, %v1071_v25, %v1073_v27  ;;  %v1021_v16 = vpop.permute.xlu1 %1020  ;;  %v460_v0 = vcombine.high %v456_v30, %v456_v30 }
 0x13d   : > { %1080 = vst [vmem:[#allocation2 + $0x170] sm:$0xf0] %v1076_v41  ;;  %522 = vrot.lane.b32.xlu0 %v514_v42, %s3152_s14  ;;  %v412_v41 = vmul.f32 %v406_v7, %v3392_v34 }
 0x13e   : > { %520 = vrot.lane.b32.xlu1 %v517_v29, %s3152_s14 }
 0x13f   : > { %v1023_v51 = vpop.permute.xlu0 %1022 }
 0x140   : > { %v1026_v52 = vsel %vm1024_vm12, %v1021_v16, %v1023_v51  ;;  %v3616_v53 = vpop.permute.xlu1 %992 }
 0x141   : > { %1030 = vst [vmem:[#allocation2 + $0x88] sm:$0xf0] %v1026_v52  ;;  %548 = vrot.lane.b32.xlu0 %v543_v50, %s3153_s17  ;;  %v1500_v52 = vrot.slane %v3507_v60, 4 }
 0x142   : > { %546 = vrot.lane.b32.xlu1 %v538_v28, %s3153_s17 }
 0x143   : > { %v972_v21 = vpop.permute.xlu0 %971 }
 0x144   : > { %v970_v58 = vpop.permute.xlu1 %969 }
 0x145   : > { %v975_v59 = vsel %vm973_vm8, %v970_v58, %v972_v21  ;;  %544 = vrot.lane.b32.xlu0 %v542_v56, %s3153_s17  ;;  %v377_v21 = vrot.slane %v3501_v55, 4  ;;  %s3166_s17 = smov 43  }
 0x146   : > { %979 = vst [vmem:[#allocation2 + $0xf8] sm:$0xf0] %v975_v59  ;;  %518 = vrot.lane.b32.xlu1 %v513_v20, %s3152_s14  ;;  %s3164_s14 = smov 29  }
 0x147   : > { %v933_v33 = vpop.permute.xlu0 %932 }
 0x148   : > { %v931_v6 = vpop.permute.xlu1 %930 }
 0x149   : > { %v936_v23 = vsel %vm934_vm11, %v931_v6, %v933_v33  ;;  %465 = vrot.lane.b32.xlu0 %v457_v47, %s3154_s15  ;;  %v1586_v47 = vld [vmem:[#allocation2 + $0x170] sm:$0xff] }
 0x14a   : > { %940 = vst [vmem:[#allocation2 + $0x168] sm:$0xf0] %v936_v23  ;;  %463 = vrot.lane.b32.xlu1 %v460_v0, %s3154_s15  ;;  %v379_v0 = vsel %vm378_vm2, %v377_v21, %v3501_v55  ;;  %v3158_v23 = vmov 1.0   ;;  %vm666_vm2 = vcmask 875520  }
 0x14b   : > { %v1069_v39 = vpop.permute.xlu0 %1068  ;;  %1524 = vst [vmem:[#allocation2 + $0x150] sm:$0xf0] %v3158_v23  ;;  %1523 = vst [vmem:[#allocation2 + $0x78] sm:$0xf0] %v3158_v23 }
 0x14c   : > { %v1075_v14 = vsel %vm1074_vm6, %v1069_v39, %v1071_v25  ;;  %v903_v20 = vpop.permute.xlu1 %902  ;;  %vm1450_vm6 = vcmask 818176  }
 0x14d   : > { %1079 = vst [vmem:[#allocation2 + $0xa0] sm:$0xf0] %v1075_v14  ;;  %494 = vrot.lane.b32.xlu0 %v489_v12, %s3155_s16  ;;  %v1582_v39 = vld [vmem:[#allocation2 + $0xf8] sm:$0xff]  ;;  %v382_v14 = vmul.f32 %v379_v0, %v3396_v35 }
 0x14e   : > { %492 = vrot.lane.b32.xlu1 %v484_v11, %s3155_s16 }
 0x14f   : > { %v1019_v42 = vpop.permute.xlu0 %1018 }
 0x150   : > { %v1025_v27 = vsel %vm1024_vm12, %v1019_v42, %v1021_v16  ;;  %v1096_v29 = vpop.permute.xlu1 %1095  ;;  %v415_v16 = vcombine.high %v3631_v26, %v3631_v26  ;;  %vm806_vm12 = vcmask 752640  }
 0x151   : > { %1029 = vst [vmem:[#allocation2 + $0x20] sm:$0xf0] %v1025_v27  ;;  %v1100_v40 = vsel %vm1099_vm14, %v3596_v3, %v1096_v29  ;;  %v1101_v25 = vsel %vm1099_vm14, %v1096_v29, %v3593_v63  ;;  %490 = vrot.lane.b32.xlu0 %v488_v49, %s3155_s16  ;;  %v368_v3 = vcombine.high %v366_v54, %v366_v54  ;;  %v1449_v49 = vrot.slane %v3510_v62, 4  ;;  %s3169_s16 = smov 44  }
 0x152   : > { %1104 = vst [vmem:[#allocation2 + $0xf0] sm:$0xf] %v1100_v40  ;;  %1105 = vst [vmem:[#allocation2 + $0x140] sm:$0xf] %v1101_v25  ;;  %461 = vrot.lane.b32.xlu1 %v456_v30, %s3154_s15  ;;  %v386_v25 = vcombine.low %v382_v14, %v382_v14  ;;  %vm717_vm14 = vcmask 785408   ;;  %s3168_s15 = smov 45  }
 0x153   : > { %v968_v48 = vpop.permute.xlu0 %967  ;;  %371 = vst [vmem:[#allocation2 + $0xd0] sm:$0xf] %v368_v3 }
 0x154   : > { %v974_v28 = vsel %vm973_vm8, %v968_v48, %v970_v58  ;;  %v995_v50 = vpop.permute.xlu1 %994  ;;  %v383_v58 = vmul.f32 %v377_v21, %v3392_v34  ;;  %v1585_v33 = vld [vmem:[#allocation2 + $0xa0] sm:$0xff]  ;;  %v1451_v48 = vsel %vm1450_vm6, %v1449_v49, %v3510_v62  ;;  %vm832_vm8 = vcmask 744448  }
 0x155   : > { %978 = vst [vmem:[#allocation2 + $0xe8] sm:$0xf0] %v974_v28  ;;  %v999_v63 = vsel %vm998_vm15, %v3616_v53, %v995_v50  ;;  %v1000_v51 = vsel %vm998_vm15, %v995_v50, %v3600_v9  ;;  %420 = vrot.lane.b32.xlu0 %v412_v41, %s3156_s8  ;;  %v1506_v50 = vmul.f32 %v1500_v52, %v3392_v34  ;;  %vm1386_vm15 = vcmask 793600  }
 0x156   : > { %1003 = vst [vmem:[#allocation2 + $0x20] sm:$0xf] %v999_v63  ;;  %1004 = vst [vmem:[#allocation2 + $0x88] sm:$0xf] %v1000_v51  ;;  %418 = vrot.lane.b32.xlu1 %v415_v16, %s3156_s8  ;;  %v387_v11 = vcombine.low %v383_v58, %v383_v58  ;;  %v1454_v3 = vmul.f32 %v1451_v48, %v3396_v35  ;;  %v1474_v63 = vrot.slane %v3513_v2, 4  ;;  %vm692_vm6 = vcmask 867328  }
 0x157   : > { %v929_v17 = vpop.permute.xlu0 %928 }
 0x158   : > { %v935_v44 = vsel %vm934_vm11, %v929_v17, %v931_v6  ;;  %v905_v56 = vpop.permute.xlu1 %904  ;;  %v1476_v21 = vsel %vm1475_vm7, %v1474_v63, %v3513_v2  ;;  %vm768_vm11 = vcmask 769024   ;;  %vm1286_vm7 = vcmask 687104  }
 0x159   : > { %939 = vst [vmem:[#allocation2 + $0xb8] sm:$0xf0] %v935_v44  ;;  %v909_v9 = vsel %vm908_vm0, %v903_v20, %v905_v56  ;;  %v910_v53 = vsel %vm908_vm0, %v905_v56, %v3605_v18  ;;  %437 = vrot.lane.b32.xlu0 %v3401_v36, %s3157_s9  ;;  %v1588_v30 = vld [vmem:[#allocation2 + $0x140] sm:$0xff]  ;;  %v1587_v57 = vld [vmem:[#allocation2 + $0xf0] sm:$0xff]  ;;  %v1502_v18 = vsel %vm1501_vm1, %v1500_v52, %v3507_v60  ;;  %vm743_vm0 = vcmask 777216  }
 0x15a   : > { %913 = vst [vmem:[#allocation2 + $0xb8] sm:$0xf] %v909_v9  ;;  %914 = vst [vmem:[#allocation2 + $0x168] sm:$0xf] %v910_v53  ;;  %1656 = vmatprep.subr.mxu0 %v1588_v30  ;;  %435 = vrot.lane.b32.xlu1 %v3396_v35, %s3157_s9  ;;  %v1505_v12 = vmul.f32 %v1502_v18, %v3396_v35  ;;  %v1455_v44 = vmul.f32 %v1449_v49, %v3392_v34  ;;  %v1411_v53 = vrot.slane %v3518_v4, 4  ;;  %vm1312_vm1 = vcmask 695296  }
 0x15b   : > { %1657 = vmatpush1.msra.mxu0 %v1587_v57  ;;  %v856_v59 = vpop.permute.xlu0 %855  ;;  %v1480_v56 = vmul.f32 %v1474_v63, %v3392_v34  ;;  %v1458_v52 = vcombine.high %v1454_v3, %v1454_v3  ;;  %v1479_v58 = vmul.f32 %v1476_v21, %v3396_v35 }
 0x15c   : > { %v854_v61 = vpop.permute.xlu1 %853  ;;  %1658 = vmatprep.subr.mxu0 %v1586_v47  ;;  %v1581_v22 = vld [vmem:[#allocation2 + $0xe8] sm:$0xff]  ;;  %v1509_v29 = vcombine.high %v1505_v12, %v1505_v12  ;;  %v1413_v2 = vsel %vm1412_vm10, %v1411_v53, %v3518_v4  ;;  %vm1222_vm10 = vcmask 662528  }
 0x15d   : > { %v859_v5 = vsel %vm857_vm3, %v854_v61, %v856_v59  ;;  %433 = vrot.lane.b32.xlu0 %v3411_v38, %s3157_s9  ;;  %1659 = vmatpush1.msra.mxu0 %v1585_v33  ;;  %v1584_v6 = vld [vmem:[#allocation2 + $0x88] sm:$0xff]  ;;  %v1583_v7 = vld [vmem:[#allocation2 + $0x20] sm:$0xff]  ;;  %v1484_v59 = vcombine.low %v1480_v56, %v1480_v56  ;;  %v1483_v33 = vcombine.low %v1479_v58, %v1479_v58  ;;  %s3171_s9 = smov 46  }
 0x15e   : > { %863 = vst [vmem:[#allocation2 + $0xa8] sm:$0xf] %v859_v5  ;;  %1660 = vmatprep.subr.mxu0 %v1584_v6  ;;  %416 = vrot.lane.b32.xlu1 %v3631_v26, %s3156_s8  ;;  %v1416_v5 = vmul.f32 %v1413_v2, %v3396_v35  ;;  %v3687_v4 = vld [vmem:[%s3387_s13 + $0x8] sm:$0xf]  ;;  %s3170_s8 = smov 47  }
 0x15f   : > { %1661 = vmatpush1.msra.mxu0 %v1583_v7  ;;  %v882_v55 = vpop.permute.xlu0 %881 }
 0x160   : > { %v880_v20 = vpop.permute.xlu1 %879  ;;  %1662 = vmatprep.subr.mxu0 %v1582_v39 }
 0x161   : > { %v885_v42 = vsel %vm883_vm4, %v880_v20, %v882_v55  ;;  %392 = vrot.lane.b32.xlu0 %v387_v11, %s3159_s29  ;;  %1663 = vmatpush1.msra.mxu0 %v1581_v22  ;;  %v1580_v26 = vld [vmem:[#allocation2 + $0x168] sm:$0xff]  ;;  %v1579_v27 = vld [vmem:[#allocation2 + $0xb8] sm:$0xff]  ;;  %v1417_v11 = vmul.f32 %v3687_v4, %v1411_v53  ;;  %v1420_v55 = vcombine.high %v1416_v5, %v1416_v5 }
 0x162   : > { %889 = vst [vmem:[#allocation2 + $0xa8] sm:$0xf0] %v885_v42  ;;  %1664 = vmatprep.subr.mxu0 %v1580_v26  ;;  %390 = vrot.lane.b32.xlu1 %v382_v14, %s3159_s29  ;;  %v1362_v14 = vrot.slane %v3522_v8, 4 }
 0x163   : > { %1665 = vmatpush1.msra.mxu0 %v1579_v27  ;;  %v878_v40 = vpop.permute.xlu0 %877 }
 0x164   : > { %v884_v54 = vsel %vm883_vm4, %v878_v40, %v880_v20  ;;  %v852_v41 = vpop.permute.xlu1 %851  ;;  %v1363_v26 = vsel %vm717_vm14, %v1362_v14, %v3522_v8 }
 0x165   : > { %888 = vst [vmem:[#allocation2 + $0xe0] sm:$0xf0] %v884_v54  ;;  %v858_v16 = vsel %vm857_vm3, %v852_v41, %v854_v61  ;;  %1512 = vrot.lane.b32.xlu0 %v1509_v29, %s3160_s7  ;;  %v3698_v29 = vld [vmem:[%s3387_s13] sm:$0xff]  ;;  %v1385_v54 = vrot.slane %v3525_v10, 4  ;;  %s3165_s13 = smov 31   ;;  %vm1337_vm3 = vcmask 703488  }
 0x166   : > { %862 = vst [vmem:[#allocation2 + $0xe0] sm:$0xf] %v858_v16  ;;  %388 = vrot.lane.b32.xlu1 %v386_v25, %s3159_s29  ;;  %v1366_v25 = vmul.f32 %v3698_v29, %v1363_v26  ;;  %s3172_s29 = smov 58  }
 0x167   : > { %v805_v28 = vpop.permute.xlu0 %804  ;;  %v1391_v16 = vmul.f32 %v3687_v4, %v1385_v54 }
 0x168   : > { %v803_v51 = vpop.permute.xlu1 %802 }
 0x169   : > { %v808_v62 = vsel %vm806_vm12, %v803_v51, %v805_v28  ;;  %1510 = vrot.lane.b32.xlu0 %v1505_v12, %s3160_s7  ;;  %v1578_v17 = vld [vmem:[#allocation2 + $0xa8] sm:$0xff] }
 0x16a   : > { %812 = vst [vmem:[#allocation2 + $0x120] sm:$0xf] %v808_v62  ;;  %1666 = vmatprep.subr.mxu0 %v1578_v17  ;;  %1514 = vrot.lane.b32.xlu1 %v1506_v50, %s3160_s7  ;;  %v1370_v50 = vcombine.high %v1366_v25, %v1366_v25  ;;  %s3173_s7 = smov 60  }
 0x16b   : > { %v831_v60 = vpop.permute.xlu0 %830 }
 0x16c   : > { %v829_v9 = vpop.permute.xlu1 %828 }
 0x16d   : > { %v834_v30 = vsel %vm832_vm8, %v829_v9, %v831_v60  ;;  %1463 = vrot.lane.b32.xlu0 %v1455_v44, %s3161_s25  ;;  %v1577_v57 = vld [vmem:[#allocation2 + $0xe0] sm:$0xff]  ;;  %v1395_v44 = vcombine.low %v1391_v16, %v1391_v16 }
 0x16e   : > { %838 = vst [vmem:[#allocation2 + $0x120] sm:$0xf0] %v834_v30  ;;  %1667 = vmatpush1.msra.mxu0 %v1577_v57  ;;  %1461 = vrot.lane.b32.xlu1 %v1458_v52, %s3161_s25  ;;  %v1336_v57 = vrot.slane %v3533_v19, 4 }
 0x16f   : > { %v827_v34 = vpop.permute.xlu0 %826 }
 0x170   : > { %v833_v47 = vsel %vm832_vm8, %v827_v34, %v829_v9  ;;  %v801_v18 = vpop.permute.xlu1 %800  ;;  %vm641_vm8 = vcmask 883712  }
 0x171   : > { %837 = vst [vmem:[#allocation2 + $0x138] sm:$0xf0] %v833_v47  ;;  %v807_v61 = vsel %vm806_vm12, %v801_v18, %v803_v51  ;;  %1489 = vrot.lane.b32.xlu0 %v1484_v59, %s3162_s12  ;;  %v1311_v51 = vrot.slane %v3530_v15, 4  ;;  %v1342_v47 = vmul.f32 %v3687_v4, %v1336_v57  ;;  %vm615_vm12 = vcmask 891904  }
 0x172   : > { %811 = vst [vmem:[#allocation2 + $0x138] sm:$0xf] %v807_v61  ;;  %1487 = vrot.lane.b32.xlu1 %v1479_v58, %s3162_s12  ;;  %v1338_v61 = vsel %vm1337_vm3, %v1336_v57, %v3533_v19  ;;  %vm1147_vm3 = vcmask 564224  }
 0x173   : > { %v767_v0 = vpop.permute.xlu0 %766  ;;  %v1313_v52 = vsel %vm1312_vm1, %v1311_v51, %v3530_v15  ;;  %v1317_v34 = vmul.f32 %v3687_v4, %v1311_v51  ;;  %vm550_vm1 = vcmask 916480  }
 0x174   : > { %v765_v6 = vpop.permute.xlu1 %764  ;;  %v1316_v30 = vmul.f32 %v3698_v29, %v1313_v52  ;;  %v1172_v52 = vrot.slane %v3544_v32, 4 }
 0x175   : > { %v770_v7 = vsel %vm768_vm11, %v765_v6, %v767_v0  ;;  %1485 = vrot.lane.b32.xlu0 %v1483_v33, %s3162_s12  ;;  %v1576_v23 = vld [vmem:[#allocation2 + $0x120] sm:$0xff] }
 0x176   : > { %774 = vst [vmem:[#allocation2 + $0x130] sm:$0xf] %v770_v7  ;;  %1668 = vmatprep.subr.mxu0 %v1576_v23  ;;  %1459 = vrot.lane.b32.xlu1 %v1454_v3, %s3161_s25  ;;  %v1387_v3 = vsel %vm1386_vm15, %v1385_v54, %v3525_v10  ;;  %v1320_v2 = vcombine.high %v1316_v30, %v1316_v30  ;;  %vm1173_vm15 = vcmask 572416  }
 0x177   : > { %v780_v12 = vpop.permute.xlu0 %779  ;;  %v1390_v17 = vmul.f32 %v3698_v29, %v1387_v3  ;;  %v1346_v7 = vcombine.low %v1342_v47, %v1342_v47 }
 0x178   : > { %v778_v39 = vpop.permute.xlu1 %777 }
 0x179   : > { %v783_v35 = vsel %vm781_vm13, %v778_v39, %v780_v12  ;;  %1425 = vrot.lane.b32.xlu0 %v1417_v11, %s3163_s10  ;;  %v1575_v20 = vld [vmem:[#allocation2 + $0x138] sm:$0xff]  ;;  %v1394_v9 = vcombine.low %v1390_v17, %v1390_v17 }
 0x17a   : > { %787 = vst [vmem:[#allocation2 + $0x130] sm:$0xf0] %v783_v35  ;;  %1669 = vmatpush1.msra.mxu0 %v1575_v20  ;;  %1423 = vrot.lane.b32.xlu1 %v1420_v55, %s3163_s10 }
 0x17b   : > { %v776_v22 = vpop.permute.xlu0 %775 }
 0x17c   : > { %v782_v49 = vsel %vm781_vm13, %v776_v22, %v778_v39  ;;  %v763_v42 = vpop.permute.xlu1 %762  ;;  %vm1247_vm13 = vcmask 670720  }
 0x17d   : > { %786 = vst [vmem:[#allocation2 + $0x180] sm:$0xf0] %v782_v49  ;;  %v769_v27 = vsel %vm768_vm11, %v763_v42, %v765_v6  ;;  %1438 = vrot.lane.b32.xlu0 %v3401_v36, %s3164_s14  ;;  %v1367_v36 = vmul.f32 %v3687_v4, %v1362_v14  ;;  %v1341_v6 = vmul.f32 %v3698_v29, %v1338_v61  ;;  %v1285_v14 = vrot.slane %v3536_v24, 4 }
 0x17e   : > { %773 = vst [vmem:[#allocation2 + $0x180] sm:$0xf] %v769_v27  ;;  %1436 = vrot.lane.b32.xlu1 %v3698_v29, %s3164_s14  ;;  %vm575_vm11 = vcmask 908288  }
 0x17f   : > { %v716_v40 = vpop.permute.xlu0 %715  ;;  %v1345_v19 = vcombine.low %v1341_v6, %v1341_v6  ;;  %v1291_v49 = vmul.f32 %v3687_v4, %v1285_v14  ;;  %v1287_v26 = vsel %vm1286_vm7, %v1285_v14, %v3536_v24  ;;  %vm422_vm7 = vcmask 1031168  }
 0x180   : > { %v714_v41 = vpop.permute.xlu1 %713 }
 0x181   : > { %v719_v8 = vsel %vm717_vm14, %v714_v41, %v716_v40  ;;  %1434 = vrot.lane.b32.xlu0 %v3411_v38, %s3164_s14  ;;  %v1574_v48 = vld [vmem:[#allocation2 + $0x130] sm:$0xff]  ;;  %v1221_v40 = vrot.slane %v3539_v13, 4 }
 0x182   : > { %723 = vst [vmem:[#allocation2 + $0xd8] sm:$0xf] %v719_v8  ;;  %1670 = vmatprep.subr.mxu0 %v1574_v48  ;;  %1421 = vrot.lane.b32.xlu1 %v1416_v5, %s3163_s10  ;;  %v1295_v8 = vcombine.low %v1291_v49, %v1291_v49  ;;  %s2702_s10 = sshll.u32 %s3304_s23, 6 }
 0x183   : > { %v742_v28 = vpop.permute.xlu0 %741  ;;  %v1223_v16 = vsel %vm1222_vm10, %v1221_v40, %v3539_v13  ;;  %vm394_vm10 = vcmask 1039360   ;;  %s4421_s14 = scalar_lea.vmem [#allocation7], %s2702_s10 }
 0x184   : > { %v740_v63 = vpop.permute.xlu1 %739 }
 0x185   : > { %v745_v62 = vsel %vm743_vm0, %v740_v63, %v742_v28  ;;  %1375 = vrot.lane.b32.xlu0 %v1367_v36, %s3103_s26  ;;  %v1573_v38 = vld [vmem:[#allocation2 + $0x180] sm:$0xff] }
 0x186   : > { %749 = vst [vmem:[#allocation2 + $0xd8] sm:$0xf0] %v745_v62  ;;  %1671 = vmatpush1.msra.mxu0 %v1573_v38  ;;  %1373 = vrot.lane.b32.xlu1 %v1370_v50, %s3103_s26  ;;  %v1227_v38 = vmul.f32 %v3687_v4, %v1221_v40  ;;  %v1146_v40 = vrot.slane %v3552_v46, 4 }
 0x187   : > { %v738_v56 = vpop.permute.xlu0 %737 }
 0x188   : > { %v744_v60 = vsel %vm743_vm0, %v738_v56, %v740_v63  ;;  %v712_v10 = vpop.permute.xlu1 %711  ;;  %v1246_v63 = vrot.slane %v3542_v31, 4  ;;  %vm524_vm0 = vcmask 998400  }
 0x189   : > { %748 = vst [vmem:[#allocation2 + $0x58] sm:$0xf0] %v744_v60  ;;  %v718_v21 = vsel %vm717_vm14, %v712_v10, %v714_v41  ;;  %1400 = vrot.lane.b32.xlu0 %v1395_v44, %s3165_s13  ;;  %v1290_v41 = vmul.f32 %v3698_v29, %v1287_v26  ;;  %vm601_vm14 = vcmask 900096  }
 0x18a   : > { %722 = vst [vmem:[#allocation2 + $0x58] sm:$0xf] %v718_v21  ;;  %1398 = vrot.lane.b32.xlu1 %v1390_v17, %s3165_s13  ;;  %v1252_v17 = vmul.f32 %v3687_v4, %v1246_v63  ;;  %v1248_v60 = vsel %vm1247_vm13, %v1246_v63, %v3542_v31  ;;  %v1174_v31 = vsel %vm1173_vm15, %v1172_v52, %v3544_v32  ;;  %vm1465_vm13 = vcmask 228352  }
 0x18b   : > { %v665_v53 = vpop.permute.xlu0 %664  ;;  %v1294_v50 = vcombine.low %v1290_v41, %v1290_v41  ;;  %v1178_v32 = vmul.f32 %v3687_v4, %v1172_v52  ;;  %vm1427_vm15 = vcmask 244736  }
 0x18c   : > { %v663_v58 = vpop.permute.xlu1 %662 }
 0x18d   : > { %v668_v59 = vsel %vm666_vm2, %v663_v58, %v665_v53  ;;  %1396 = vrot.lane.b32.xlu0 %v1394_v9, %s3165_s13  ;;  %v1572_v15 = vld [vmem:[#allocation2 + $0xd8] sm:$0xff]  ;;  %v1251_v53 = vmul.f32 %v3698_v29, %v1248_v60  ;;  %s2609_s13 = sshll.u32 %s4421_s14, 4  ;;  %s4452_s13 = int_to_ptr.vmem [resolvable:$true] %s2609_s13 }
 0x18e   : > { %672 = vst [vmem:[#allocation2 + $0x100] sm:$0xf] %v668_v59  ;;  %1672 = vmatprep.subr.mxu0 %v1572_v15  ;;  %1371 = vrot.lane.b32.xlu1 %v1366_v25, %s3103_s26  ;;  %s3167_s26 = smov 42  }
 0x18f   : > { %v691_v18 = vpop.permute.xlu0 %690 }
 0x190   : > { %v689_v33 = vpop.permute.xlu1 %688 }
 0x191   : > { %v694_v0 = vsel %vm692_vm6, %v689_v33, %v691_v18  ;;  %1325 = vrot.lane.b32.xlu0 %v1317_v34, %s3166_s17  ;;  %v1571_v5 = vld [vmem:[#allocation2 + $0x58] sm:$0xff]  ;;  %v1255_v34 = vcombine.low %v1251_v53, %v1251_v53  ;;  %v1177_v18 = vmul.f32 %v3698_v29, %v1174_v31 }
 0x192   : > { %698 = vst [vmem:[#allocation2 + $0x100] sm:$0xf0] %v694_v0  ;;  %1673 = vmatpush1.msra.mxu0 %v1571_v5  ;;  %1323 = vrot.lane.b32.xlu1 %v1320_v2, %s3166_s17  ;;  %v1197_v2 = vrot.slane %v3547_v43, 4 }
 0x193   : > { %v687_v23 = vpop.permute.xlu0 %686 }
 0x194   : > { %v693_v11 = vsel %vm692_vm6, %v687_v23, %v689_v33  ;;  %v661_v12 = vpop.permute.xlu1 %660  ;;  %v1202_v5 = vmul.f32 %v3687_v4, %v1197_v2  ;;  %v1198_v23 = vsel %vm883_vm4, %v1197_v2, %v3547_v43  ;;  %vm467_vm4 = vcmask 1014784  }
 0x195   : > { %697 = vst [vmem:[#allocation2 + $0x148] sm:$0xf0] %v693_v11  ;;  %v667_v55 = vsel %vm666_vm2, %v661_v12, %v663_v58  ;;  %1351 = vrot.lane.b32.xlu0 %v1346_v7, %s3167_s26  ;;  %v1181_v7 = vcombine.high %v1177_v18, %v1177_v18  ;;  %v1121_v12 = vrot.slane %v3550_v45, 4  ;;  %vm1122_vm2 = vcmask 556032  }
 0x196   : > { %671 = vst [vmem:[#allocation2 + $0x148] sm:$0xf] %v667_v55  ;;  %1349 = vrot.lane.b32.xlu1 %v1341_v6, %s3167_s26  ;;  %v1206_v14 = vcombine.low %v1202_v5, %v1202_v5  ;;  %vm496_vm6 = vcmask 1006592  }
 0x197   : > { %v614_v39 = vpop.permute.xlu0 %613  ;;  %v1123_v43 = vsel %vm1122_vm2, %v1121_v12, %v3550_v45  ;;  %vm1327_vm2 = vcmask 351232  }
 0x198   : > { %v612_v35 = vpop.permute.xlu1 %611 }
 0x199   : > { %v617_v20 = vsel %vm615_vm12, %v612_v35, %v614_v39  ;;  %1347 = vrot.lane.b32.xlu0 %v1345_v19, %s3167_s26  ;;  %v1570_v22 = vld [vmem:[#allocation2 + $0x100] sm:$0xff]  ;;  %v1201_v39 = vmul.f32 %v3698_v29, %v1198_v23 }
 0x19a   : > { %621 = vst [vmem:[#allocation2 + $0x118] sm:$0xf] %v617_v20  ;;  %1674 = vmatprep.subr.mxu0 %v1570_v22  ;;  %1321 = vrot.lane.b32.xlu1 %v1316_v30, %s3166_s17  ;;  %v1256_v30 = vcombine.low %v1252_v17, %v1252_v17 }
 0x19b   : > { %v640_v42 = vpop.permute.xlu0 %639 }
 0x19c   : > { %v638_v27 = vpop.permute.xlu1 %637 }
 0x19d   : > { %v643_v25 = vsel %vm641_vm8, %v638_v27, %v640_v42  ;;  %1274 = vrot.lane.b32.xlu0 %v3687_v4, %s3168_s15  ;;  %v1569_v54 = vld [vmem:[#allocation2 + $0x148] sm:$0xff]  ;;  %v1205_v42 = vcombine.low %v1201_v39, %v1201_v39 }
 0x19e   : > { %647 = vst [vmem:[#allocation2 + $0x118] sm:$0xf0] %v643_v25  ;;  %1675 = vmatpush1.msra.mxu0 %v1569_v54  ;;  %1272 = vrot.lane.b32.xlu1 %v3406_v37, %s3168_s15  ;;  %v1226_v37 = vmul.f32 %v3698_v29, %v1223_v16 }
 0x19f   : > { %v636_v24 = vpop.permute.xlu0 %635 }
 0x1a0   : > { %v642_v48 = vsel %vm641_vm8, %v636_v24, %v638_v27  ;;  %v610_v36 = vpop.permute.xlu1 %609  ;;  %v1230_v56 = vcombine.high %v1226_v37, %v1226_v37  ;;  %v1126_v27 = vmul.f32 %v3698_v29, %v1123_v43  ;;  %vm439_vm8 = vcmask 1022976  }
 0x1a1   : > { %646 = vst [vmem:[#allocation2 + $0x90] sm:$0xf0] %v642_v48  ;;  %v616_v28 = vsel %vm615_vm12, %v610_v36, %v612_v35  ;;  %1300 = vrot.lane.b32.xlu0 %v1295_v8, %s3169_s16  ;;  %v1152_v8 = vmul.f32 %v3687_v4, %v1146_v40  ;;  %v1148_v36 = vsel %vm1147_vm3, %v1146_v40, %v3552_v46  ;;  %v1526_v46 = vld [vmem:[%s4499_s2 + $0x8] sm:$0xff]  ;;  %vm1607_vm12 = vcmask 588800  }
 0x1a2   : > { %620 = vst [vmem:[#allocation2 + $0x90] sm:$0xf] %v616_v28  ;;  %1298 = vrot.lane.b32.xlu1 %v1290_v41, %s3169_s16  ;;  %v1127_v41 = vmul.f32 %v3687_v4, %v1121_v12  ;;  %v1130_v48 = vcombine.high %v1126_v27, %v1126_v27  ;;  %2716 = vmatprep.mubr.msk.f32.mxu0 %vm1607_vm12, %v1526_v46  ;;  %vm1302_vm3 = vcmask 359424  }
 0x1a3   : > { %v574_v3 = vpop.permute.xlu0 %573 }
 0x1a4   : > { %v572_v51 = vpop.permute.xlu1 %571 }
 0x1a5   : > { %v577_v62 = vsel %vm575_vm11, %v572_v51, %v574_v3  ;;  %1296 = vrot.lane.b32.xlu0 %v1294_v50, %s3169_s16  ;;  %v1568_v13 = vld [vmem:[#allocation2 + $0x118] sm:$0xff]  ;;  %v1151_v3 = vmul.f32 %v3698_v29, %v1148_v36  ;;  %s2596_s16 = scalar_lea.sflag [#allocation6], %s3304_s23 }
 0x1a6   : > { %581 = vst [vmem:[#allocation2 + $0x110] sm:$0xf] %v577_v62  ;;  %1676 = vmatprep.subr.mxu0 %v1568_v13  ;;  %1270 = vrot.lane.b32.xlu1 %v3698_v29, %s3168_s15 }
 0x1a7   : > { %v600_v44 = vpop.permute.xlu0 %599  ;;  %v1155_v29 = vcombine.low %v1151_v3, %v1151_v3 }
 0x1a8   : > { %v598_v10 = vpop.permute.xlu1 %597 }
 0x1a9   : > { %v603_v21 = vsel %vm601_vm14, %v598_v10, %v600_v44  ;;  %1235 = vrot.lane.b32.xlu0 %v1227_v38, %s3170_s8  ;;  %v1567_v9 = vld [vmem:[#allocation2 + $0x90] sm:$0xff] }
 0x1aa   : > { %607 = vst [vmem:[#allocation2 + $0x110] sm:$0xf0] %v603_v21  ;;  %1677 = vmatpush1.msra.mxu0 %v1567_v9  ;;  %1233 = vrot.lane.b32.xlu1 %v1230_v56, %s3170_s8 }
 0x1ab   : > { %v596_v57 = vpop.permute.xlu0 %595 }
 0x1ac   : > { %v602_v58 = vsel %vm601_vm14, %v596_v57, %v598_v10  ;;  %v570_v59 = vpop.permute.xlu1 %569  ;;  %vm1491_vm14 = vcmask 220160  }
 0x1ad   : > { %606 = vst [vmem:[#allocation2 + $0x108] sm:$0xf0] %v602_v58  ;;  %v576_v15 = vsel %vm575_vm11, %v570_v59, %v572_v51  ;;  %1261 = vrot.lane.b32.xlu0 %v1256_v30, %s3171_s9  ;;  %vm1516_vm11 = vcmask 211968  }
 0x1ae   : > { %580 = vst [vmem:[#allocation2 + $0x108] sm:$0xf] %v576_v15  ;;  %1259 = vrot.lane.b32.xlu1 %v1251_v53, %s3171_s9 }
 0x1af   : > { %v523_v47 = vpop.permute.xlu0 %522 }
 0x1b0   : > { %v521_v61 = vpop.permute.xlu1 %520 }
 0x1b1   : > { %v526_v33 = vsel %vm524_vm0, %v521_v61, %v523_v47  ;;  %1257 = vrot.lane.b32.xlu0 %v1255_v34, %s3171_s9  ;;  %v1566_v0 = vld [vmem:[#allocation2 + $0x110] sm:$0xff] }
 0x1b2   : > { %530 = vst [vmem:[#allocation2 + $0x178] sm:$0xf] %v526_v33  ;;  %1678 = vmatprep.subr.mxu0 %v1566_v0  ;;  %1231 = vrot.lane.b32.xlu1 %v1226_v37, %s3170_s8  ;;  %v1156_v37 = vcombine.low %v1152_v8, %v1152_v8  ;;  %s3020_s8 = scalar_lea.vmem %s4452_s13, 1024 }
 0x1b3   : > { %v549_v6 = vpop.permute.xlu0 %548  ;;  %p3021_p12 = scmp.ne.s32.totalorder %s4452_s13, %s3020_s8 }
 0x1b4   : > { %v547_v11 = vpop.permute.xlu1 %546 }
 0x1b5   : > { %v552_v55 = vsel %vm550_vm1, %v547_v11, %v549_v6  ;;  %1186 = vrot.lane.b32.xlu0 %v1178_v32, %s3172_s29  ;;  %v1565_v19 = vld [vmem:[#allocation2 + $0x108] sm:$0xff]  ;;  %p3022_p4 = pnand %p3021_p12, %p4590_p13 }
 0x1b6   : > { %556 = vst [vmem:[#allocation2 + $0x178] sm:$0xf0] %v552_v55  ;;  %1679 = vmatpush1.msra.mxu0 %v1565_v19  ;;  %1184 = vrot.lane.b32.xlu1 %v1181_v7, %s3172_s29 }
 0x1b7   : > { %v545_v35 = vpop.permute.xlu0 %544  ;;  %p3023_p5 = pneg %p3022_p4 }
 0x1b8   : > { %v551_v20 = vsel %vm550_vm1, %v545_v35, %v547_v11  ;;  %v519_v22 = vpop.permute.xlu1 %518  ;;  %vm1402_vm1 = vcmask 252928  }
 0x1b9   : > { %555 = vst [vmem:[#allocation2 + $0x40] sm:$0xf0] %v551_v20  ;;  %v525_v49 = vsel %vm524_vm0, %v519_v22, %v521_v61  ;;  %1211 = vrot.lane.b32.xlu0 %v1206_v14, %s3099_s11  ;;  %vm1440_vm0 = vcmask 236544  }
 0x1ba   : > { %529 = vst [vmem:[#allocation2 + $0x40] sm:$0xf] %v525_v49  ;;  %1209 = vrot.lane.b32.xlu1 %v1201_v39, %s3099_s11 }
 0x1bb   : > { %v466_v26 = vpop.permute.xlu0 %465 }
 0x1bc   : > { %v464_v25 = vpop.permute.xlu1 %463 }
 0x1bd   : > { %v469_v54 = vsel %vm467_vm4, %v464_v25, %v466_v26  ;;  %1207 = vrot.lane.b32.xlu0 %v1205_v42, %s3099_s11  ;;  %v1564_v45 = vld [vmem:[#allocation2 + $0x178] sm:$0xff]  ;;  %s3174_s11 = smov 59  }
 0x1be   : > { %473 = vst [vmem:[#allocation2 + $0x128] sm:$0xf] %v469_v54  ;;  %1680 = vmatprep.subr.mxu0 %v1564_v45  ;;  %1182 = vrot.lane.b32.xlu1 %v1177_v18, %s3172_s29 }
 0x1bf   : > { %v495_v24 = vpop.permute.xlu0 %494 }
 0x1c0   : > { %v493_v16 = vpop.permute.xlu1 %492 }
 0x1c1   : > { %v498_v28 = vsel %vm496_vm6, %v493_v16, %v495_v24  ;;  %1135 = vrot.lane.b32.xlu0 %v1127_v41, %s3173_s7  ;;  %v1563_v50 = vld [vmem:[#allocation2 + $0x40] sm:$0xff] }
 0x1c2   : > { %502 = vst [vmem:[#allocation2 + $0x128] sm:$0xf0] %v498_v28  ;;  %1681 = vmatpush1.msra.mxu0 %v1563_v50  ;;  %1133 = vrot.lane.b32.xlu1 %v1130_v48, %s3173_s7 }
 0x1c3   : > { %v491_v63 = vpop.permute.xlu0 %490 }
 0x1c4   : > { %v497_v51 = vsel %vm496_vm6, %v491_v63, %v493_v16  ;;  %v462_v4 = vpop.permute.xlu1 %461  ;;  %vm1237_vm6 = vcmask 384000  }
 0x1c5   : > { %501 = vst [vmem:[#allocation2 + $0x160] sm:$0xf0] %v497_v51  ;;  %v468_v62 = vsel %vm467_vm4, %v462_v4, %v464_v25  ;;  %1161 = vrot.lane.b32.xlu0 %v1156_v37, %s3174_s11  ;;  %vm1353_vm4 = vcmask 343040  }
 0x1c6   : > { %472 = vst [vmem:[#allocation2 + $0x160] sm:$0xf] %v468_v62  ;;  %1159 = vrot.lane.b32.xlu1 %v1151_v3, %s3174_s11 }
 0x1c7   : > { %v421_v13 = vpop.permute.xlu0 %420 }
 0x1c8   : > { %v419_v38 = vpop.permute.xlu1 %418 }
 0x1c9   : > { %v424_v17 = vsel %vm422_vm7, %v419_v38, %v421_v13  ;;  %1157 = vrot.lane.b32.xlu0 %v1155_v29, %s3174_s11  ;;  %v1562_v44 = vld [vmem:[#allocation2 + $0x128] sm:$0xff] }
 0x1ca   : > { %428 = vst [vmem:[#allocation2 + $0x48] sm:$0xf] %v424_v17  ;;  %1682 = vmatprep.subr.mxu0 %v1562_v44  ;;  %1131 = vrot.lane.b32.xlu1 %v1126_v27, %s3173_s7 }
 0x1cb   : > { %v438_v56 = vpop.permute.xlu0 %437 }
 0x1cc   : > { %v436_v60 = vpop.permute.xlu1 %435 }
 0x1cd   : > { %v441_v10 = vsel %vm439_vm8, %v436_v60, %v438_v56  ;;  %v1561_v52 = vld [vmem:[#allocation2 + $0x160] sm:$0xff] }
 0x1ce   : > { %445 = vst [vmem:[#allocation2 + $0x48] sm:$0xf0] %v441_v10  ;;  %1683 = vmatpush1.msra.mxu0 %v1561_v52 }
 0x1cf   : > { %v434_v21 = vpop.permute.xlu0 %433 }
 0x1d0   : > { %v440_v9 = vsel %vm439_vm8, %v434_v21, %v436_v60  ;;  %v417_v53 = vpop.permute.xlu1 %416  ;;  %vm1188_vm8 = vcmask 474112  }
 0x1d1   : > { %444 = vst [vmem:[#allocation2 + $0x10] sm:$0xf0] %v440_v9  ;;  %v423_v30 = vsel %vm422_vm7, %v417_v53, %v419_v38  ;;  %vm1263_vm7 = vcmask 375808  }
 0x1d2   : > { %427 = vst [vmem:[#allocation2 + $0x10] sm:$0xf] %v423_v30 }
 0x1d3   : > { %v393_v57 = vpop.permute.xlu0 %392 }
 0x1d4   : > { %v391_v58 = vpop.permute.xlu1 %390 }
 0x1d5   : > { %v396_v59 = vsel %vm394_vm10, %v391_v58, %v393_v57  ;;  %v1560_v31 = vld [vmem:[#allocation2 + $0x48] sm:$0xff] }
 0x1d6   : > { %400 = vst [vmem:[#allocation2 + $0xd0] sm:$0xf0] %v396_v59  ;;  %1684 = vmatprep.subr.mxu0 %v1560_v31 }
 0x1d7   : > { %v1513_v15 = vpop.permute.xlu0 %1512 }
 0x1d8   : > { %v389_v34 = vpop.permute.xlu1 %388 }
 0x1d9   : > { %v395_v47 = vsel %vm394_vm10, %v389_v34, %v391_v58  ;;  %v1559_v18 = vld [vmem:[#allocation2 + $0x10] sm:$0xff]  ;;  %vm1137_vm10 = vcmask 490496  }
 0x1da   : > { %399 = vst [vmem:[#allocation2 + $0xb0] sm:$0xf0] %v395_v47  ;;  %1685 = vmatpush1.msra.mxu0 %v1559_v18 }
 0x1db   : > { %v1511_v2 = vpop.permute.xlu0 %1510 }
 0x1dc   : > { %v1517_v61 = vsel %vm1516_vm11, %v1511_v2, %v1513_v15  ;;  %v1515_v33 = vpop.permute.xlu1 %1514 }
 0x1dd   : > { %1521 = vst [vmem:[#allocation2 + $0x78] sm:$0xf] %v1517_v61  ;;  %v1518_v0 = vsel %vm1516_vm11, %v1513_v15, %v1515_v33  ;;  %v1558_v32 = vld [vmem:[#allocation2 + $0xd0] sm:$0xff]  ;;  %vm1163_vm11 = vcmask 482304  }
 0x1de   : > { %1522 = vst [vmem:[#allocation2 + $0x150] sm:$0xf] %v1518_v0  ;;  %1686 = vmatprep.subr.mxu0 %v1558_v32 }
 0x1df   : > { %v1464_v5 = vpop.permute.xlu0 %1463 }
 0x1e0   : > { %v1462_v6 = vpop.permute.xlu1 %1461 }
 0x1e1   : > { %v1467_v7 = vsel %vm1465_vm13, %v1462_v6, %v1464_v5  ;;  %v1557_v23 = vld [vmem:[#allocation2 + $0xb0] sm:$0xff] }
 0x1e2   : > { %1471 = vst [vmem:[#allocation2 + $0x60] sm:$0xf] %v1467_v7  ;;  %1687 = vmatpush1.msra.mxu0 %v1557_v23 }
 0x1e3   : > { %v1490_v11 = vpop.permute.xlu0 %1489 }
 0x1e4   : > { %v1488_v12 = vpop.permute.xlu1 %1487  ;;  %v1605_v39 = vld [vmem:[#allocation2 + $0x78] sm:$0xff] }
 0x1e5   : > { %v1493_v55 = vsel %vm1491_vm14, %v1488_v12, %v1490_v11  ;;  %v1606_v19 = vld [vmem:[#allocation2 + $0x150] sm:$0xff] }
 0x1e6   : > { %1497 = vst [vmem:[#allocation2 + $0x60] sm:$0xf0] %v1493_v55  ;;  %1702 = vmatprep.subr.mxu0 %v1606_v19 }
 0x1e7   : > { %v1486_v14 = vpop.permute.xlu0 %1485  ;;  %1703 = vmatpush2.msra.mxu0 %v1605_v39 }
 0x1e8   : > { %v1492_v35 = vsel %vm1491_vm14, %v1486_v14, %v1488_v12  ;;  %v1460_v20 = vpop.permute.xlu1 %1459 }
 0x1e9   : > { %1496 = vst [vmem:[#allocation2 + $0xc8] sm:$0xf0] %v1492_v35  ;;  %v1466_v22 = vsel %vm1465_vm13, %v1460_v20, %v1462_v6 }
 0x1ea   : > { %1470 = vst [vmem:[#allocation2 + $0xc8] sm:$0xf] %v1466_v22 }
 0x1eb   : > { %v1426_v43 = vpop.permute.xlu0 %1425 }
 0x1ec   : > { %v1424_v49 = vpop.permute.xlu1 %1423 }
 0x1ed   : > { %v1429_v42 = vsel %vm1427_vm15, %v1424_v49, %v1426_v43  ;;  %v1604_v26 = vld [vmem:[#allocation2 + $0x60] sm:$0xff] }
 0x1ee   : > { %1433 = vst [vmem:[#allocation2 + $0x80] sm:$0xf] %v1429_v42  ;;  %1704 = vmatprep.subr.mxu0 %v1604_v26 }
 0x1ef   : > { %v1439_v27 = vpop.permute.xlu0 %1438 }
 0x1f0   : > { %v1437_v40 = vpop.permute.xlu1 %1436 }
 0x1f1   : > { %v1442_v25 = vsel %vm1440_vm0, %v1437_v40, %v1439_v27  ;;  %v1603_v54 = vld [vmem:[#allocation2 + $0xc8] sm:$0xff] }
 0x1f2   : > { %1446 = vst [vmem:[#allocation2 + $0x80] sm:$0xf0] %v1442_v25  ;;  %1705 = vmatpush2.msra.mxu0 %v1603_v54 }
 0x1f3   : > { %v1435_v45 = vpop.permute.xlu0 %1434 }
 0x1f4   : > { %v1441_v41 = vsel %vm1440_vm0, %v1435_v45, %v1437_v40  ;;  %v1422_v8 = vpop.permute.xlu1 %1421 }
 0x1f5   : > { %1445 = vst [vmem:[#allocation2 + $0x68] sm:$0xf0] %v1441_v41  ;;  %v1428_v24 = vsel %vm1427_vm15, %v1422_v8, %v1424_v49 }
 0x1f6   : > { %1432 = vst [vmem:[#allocation2 + $0x68] sm:$0xf] %v1428_v24 }
 0x1f7   : > { %v1376_v48 = vpop.permute.xlu0 %1375 }
 0x1f8   : > { %v1374_v36 = vpop.permute.xlu1 %1373 }
 0x1f9   : > { %v1378_v16 = vsel %vm702_vm9, %v1374_v36, %v1376_v48  ;;  %v1602_v28 = vld [vmem:[#allocation2 + $0x80] sm:$0xff] }
 0x1fa   : > { %1382 = vst [vmem:[#allocation2 + $0x70] sm:$0xf] %v1378_v16  ;;  %1706 = vmatprep.subr.mxu0 %v1602_v28 }
 0x1fb   : > { %v1401_v50 = vpop.permute.xlu0 %1400 }
 0x1fc   : > { %v1399_v3 = vpop.permute.xlu1 %1398 }
 0x1fd   : > { %v1404_v37 = vsel %vm1402_vm1, %v1399_v3, %v1401_v50  ;;  %v1601_v63 = vld [vmem:[#allocation2 + $0x68] sm:$0xff] }
 0x1fe   : > { %1408 = vst [vmem:[#allocation2 + $0x70] sm:$0xf0] %v1404_v37  ;;  %1707 = vmatpush2.msra.mxu0 %v1601_v63 }
 0x1ff   : > { %v1397_v51 = vpop.permute.xlu0 %1396 }
 0x200   : > { %v1403_v4 = vsel %vm1402_vm1, %v1397_v51, %v1399_v3  ;;  %v1372_v62 = vpop.permute.xlu1 %1371 }
 0x201   : > { %1407 = vst [vmem:[#allocation2 + $0x38] sm:$0xf0] %v1403_v4  ;;  %v1377_v46 = vsel %vm702_vm9, %v1372_v62, %v1374_v36  ;;  %vm1276_vm9 = vcmask 367616   ;;  %v1525_v62 = vld [vmem:[%s4499_s2] sm:$0xff] }
 0x202   : > { %1381 = vst [vmem:[#allocation2 + $0x38] sm:$0xf] %v1377_v46 }
 0x203   : > { %v1326_v29 = vpop.permute.xlu0 %1325 }
 0x204   : > { %v1324_v13 = vpop.permute.xlu1 %1323 }
 0x205   : > { %v1329_v38 = vsel %vm1327_vm2, %v1324_v13, %v1326_v29  ;;  %v1600_v17 = vld [vmem:[#allocation2 + $0x70] sm:$0xff]  ;;  %v1528_v29 = vld [vmem:[%s4499_s2 + $0x18] sm:$0xff] }
 0x206   : > { %1333 = vst [vmem:[#allocation2 + $0x158] sm:$0xf] %v1329_v38  ;;  %1708 = vmatprep.subr.mxu0 %v1600_v17  ;;  %v1530_v38 = vld [vmem:[%s4499_s2 + $0x28] sm:$0xff]  ;;  %v1529_v17 = vld [vmem:[%s4499_s2 + $0x20] sm:$0xff] }
 0x207   : > { %v1352_v44 = vpop.permute.xlu0 %1351 }
 0x208   : > { %v1350_v56 = vpop.permute.xlu1 %1349 }
 0x209   : > { %v1355_v60 = vsel %vm1353_vm4, %v1350_v56, %v1352_v44  ;;  %v1599_v10 = vld [vmem:[#allocation2 + $0x38] sm:$0xff] }
 0x20a   : > { %1359 = vst [vmem:[#allocation2 + $0x158] sm:$0xf0] %v1355_v60  ;;  %1709 = vmatpush2.msra.mxu0 %v1599_v10  ;;  %v1532_v44 = vld [vmem:[%s4499_s2 + $0x38] sm:$0xff]  ;;  %v1534_v60 = vld [vmem:[%s4499_s2 + $0x48] sm:$0xff]  ;;  %v1533_v10 = vld [vmem:[%s4499_s2 + $0x40] sm:$0xff] }
 0x20b   : > { %v1348_v52 = vpop.permute.xlu0 %1347 }
 0x20c   : > { %v1354_v21 = vsel %vm1353_vm4, %v1348_v52, %v1350_v56  ;;  %v1322_v9 = vpop.permute.xlu1 %1321  ;;  %v1531_v56 = vld [vmem:[%s4499_s2 + $0x30] sm:$0xff]  ;;  %v1536_v52 = vld [vmem:[%s4499_s2 + $0x58] sm:$0xff] }
 0x20d   : > { %1358 = vst [vmem:[#allocation2 + $0x28] sm:$0xf0] %v1354_v21  ;;  %v1328_v53 = vsel %vm1327_vm2, %v1322_v9, %v1324_v13  ;;  %v1527_v13 = vld [vmem:[%s4499_s2 + $0x10] sm:$0xff]  ;;  %v1538_v9 = vld [vmem:[%s4499_s2 + $0x68] sm:$0xff] }
 0x20e   : > { %1332 = vst [vmem:[#allocation2 + $0x28] sm:$0xf] %v1328_v53  ;;  %v1535_v21 = vld [vmem:[%s4499_s2 + $0x50] sm:$0xff]  ;;  %v1537_v53 = vld [vmem:[%s4499_s2 + $0x60] sm:$0xff] }
 0x20f   : > { %v1275_v30 = vpop.permute.xlu0 %1274 }
 0x210   : > { %v1273_v57 = vpop.permute.xlu1 %1272 }
 0x211   : > { %v1278_v58 = vsel %vm1276_vm9, %v1273_v57, %v1275_v30  ;;  %v1598_v59 = vld [vmem:[#allocation2 + $0x158] sm:$0xff] }
 0x212   : > { %1282 = vst [vmem:[#allocation2 + $0x18] sm:$0xf] %v1278_v58  ;;  %1710 = vmatprep.subr.mxu0 %v1598_v59  ;;  %v1540_v30 = vld [vmem:[%s4499_s2 + $0x78] sm:$0xff]  ;;  %v1542_v58 = vld [vmem:[%s4499_s2 + $0x88] sm:$0xff]  ;;  %v1541_v59 = vld [vmem:[%s4499_s2 + $0x80] sm:$0xff] }
 0x213   : > { %v1301_v31 = vpop.permute.xlu0 %1300 }
 0x214   : > { %v1299_v15 = vpop.permute.xlu1 %1298 }
 0x215   : > { %v1304_v34 = vsel %vm1302_vm3, %v1299_v15, %v1301_v31  ;;  %v1597_v47 = vld [vmem:[#allocation2 + $0x28] sm:$0xff]  ;;  %v1544_v31 = vld [vmem:[%s4499_s2 + $0x98] sm:$0xff] }
 0x216   : > { %1308 = vst [vmem:[#allocation2 + $0x18] sm:$0xf0] %v1304_v34  ;;  %1711 = vmatpush2.msra.mxu0 %v1597_v47  ;;  %v1546_v34 = vld [vmem:[%s4499_s2 + $0xa8] sm:$0xff]  ;;  %v1545_v47 = vld [vmem:[%s4499_s2 + $0xa0] sm:$0xff] }
 0x217   : > { %v1297_v18 = vpop.permute.xlu0 %1296 }
 0x218   : > { %v1303_v2 = vsel %vm1302_vm3, %v1297_v18, %v1299_v15  ;;  %v1271_v61 = vpop.permute.xlu1 %1270  ;;  %v1543_v15 = vld [vmem:[%s4499_s2 + $0x90] sm:$0xff]  ;;  %v1548_v18 = vld [vmem:[%s4499_s2 + $0xb8] sm:$0xff] }
 0x219   : > { %1307 = vst [vmem:[#allocation2 + $0x188] sm:$0xf0] %v1303_v2  ;;  %v1277_v33 = vsel %vm1276_vm9, %v1271_v61, %v1273_v57  ;;  %v1539_v57 = vld [vmem:[%s4499_s2 + $0x70] sm:$0xff]  ;;  %v1550_v61 = vld [vmem:[%s4499_s2 + $0xc8] sm:$0xff] }
 0x21a   : > { %1281 = vst [vmem:[#allocation2 + $0x188] sm:$0xf] %v1277_v33  ;;  %v1547_v2 = vld [vmem:[%s4499_s2 + $0xb0] sm:$0xff]  ;;  %v1549_v33 = vld [vmem:[%s4499_s2 + $0xc0] sm:$0xff] }
 0x21b   : > { %v1236_v0 = vpop.permute.xlu0 %1235 }
 0x21c   : > { %v1234_v32 = vpop.permute.xlu1 %1233 }
 0x21d   : > { %v1239_v5 = vsel %vm1237_vm6, %v1234_v32, %v1236_v0  ;;  %v1596_v6 = vld [vmem:[#allocation2 + $0x18] sm:$0xff] }
 0x21e   : > { %1243 = vst [vmem:[#allocation2 + $0x30] sm:$0xf] %v1239_v5  ;;  %1712 = vmatprep.subr.mxu0 %v1596_v6  ;;  %v1552_v0 = vld [vmem:[%s4499_s2 + $0xd8] sm:$0xff]  ;;  %v1554_v5 = vld [vmem:[%s4499_s2 + $0xe8] sm:$0xff]  ;;  %v1553_v6 = vld [vmem:[%s4499_s2 + $0xe0] sm:$0xff] }
 0x21f   : > { %v1262_v7 = vpop.permute.xlu0 %1261 }
 0x220   : > { %v1260_v23 = vpop.permute.xlu1 %1259 }
 0x221   : > { %v1265_v11 = vsel %vm1263_vm7, %v1260_v23, %v1262_v7  ;;  %v1595_v12 = vld [vmem:[#allocation2 + $0x188] sm:$0xff]  ;;  %v1556_v7 = vld [vmem:[%s4499_s2 + $0xf8] sm:$0xff] }
 0x222   : > { %1269 = vst [vmem:[#allocation2 + $0x30] sm:$0xf0] %v1265_v11  ;;  %1713 = vmatpush2.msra.mxu0 %v1595_v12 }
 0x223   : > { %v1258_v55 = vpop.permute.xlu0 %1257 }
 0x224   : > { %v1264_v19 = vsel %vm1263_vm7, %v1258_v55, %v1260_v23  ;;  %v1232_v39 = vpop.permute.xlu1 %1231  ;;  %v1555_v23 = vld [vmem:[%s4499_s2 + $0xf0] sm:$0xff] }
 0x225   : > { %1268 = vst [vmem:[#allocation2 + $0x98] sm:$0xf0] %v1264_v19  ;;  %v1238_v14 = vsel %vm1237_vm6, %v1232_v39, %v1234_v32  ;;  %v1551_v32 = vld [vmem:[%s4499_s2 + $0xd0] sm:$0xff] }
 0x226   : > { %1242 = vst [vmem:[#allocation2 + $0x98] sm:$0xf] %v1238_v14 }
 0x227   : > { %v1187_v35 = vpop.permute.xlu0 %1186 }
 0x228   : > { %v1185_v20 = vpop.permute.xlu1 %1184 }
 0x229   : > { %v1190_v22 = vsel %vm1188_vm8, %v1185_v20, %v1187_v35  ;;  %v1594_v43 = vld [vmem:[#allocation2 + $0x30] sm:$0xff] }
 0x22a   : > { %1194 = vst [vmem:[#allocation2 + $0xc0] sm:$0xf] %v1190_v22  ;;  %1714 = vmatprep.subr.mxu0 %v1594_v43 }
 0x22b   : > { %v1212_v49 = vpop.permute.xlu0 %1211 }
 0x22c   : > { %v1210_v42 = vpop.permute.xlu1 %1209 }
 0x22d   : > { %v1214_v26 = vsel %vm867_vm5, %v1210_v42, %v1212_v49  ;;  %v1593_v27 = vld [vmem:[#allocation2 + $0x98] sm:$0xff] }
 0x22e   : > { %1218 = vst [vmem:[#allocation2 + $0xc0] sm:$0xf0] %v1214_v26  ;;  %1715 = vmatpush2.msra.mxu0 %v1593_v27 }
 0x22f   : > { %v1208_v40 = vpop.permute.xlu0 %1207 }
 0x230   : > { %v1213_v25 = vsel %vm867_vm5, %v1208_v40, %v1210_v42  ;;  %v1183_v54 = vpop.permute.xlu1 %1182 }
 0x231   : > { %1217 = vst [vmem:[#allocation2 + $0x8] sm:$0xf0] %v1213_v25  ;;  %v1189_v45 = vsel %vm1188_vm8, %v1183_v54, %v1185_v20 }
 0x232   : > { %1193 = vst [vmem:[#allocation2 + $0x8] sm:$0xf] %v1189_v45 }
 0x233   : > { %v1136_v41 = vpop.permute.xlu0 %1135 }
 0x234   : > { %v1134_v8 = vpop.permute.xlu1 %1133 }
 0x235   : > { %v1139_v24 = vsel %vm1137_vm10, %v1134_v8, %v1136_v41  ;;  %v1592_v48 = vld [vmem:[#allocation2 + $0xc0] sm:$0xff] }
 0x236   : > { %1143 = vst [vmem:[#allocation2] sm:$0xf] %v1139_v24  ;;  %1716 = vmatprep.subr.mxu0 %v1592_v48 }
 0x237   : > { %v1162_v36 = vpop.permute.xlu0 %1161 }
 0x238   : > { %v1160_v16 = vpop.permute.xlu1 %1159 }
 0x239   : > { %v1165_v28 = vsel %vm1163_vm11, %v1160_v16, %v1162_v36  ;;  %v1591_v50 = vld [vmem:[#allocation2 + $0x8] sm:$0xff] }
 0x23a   : > { %1169 = vst [vmem:[#allocation2] sm:$0xf0] %v1165_v28  ;;  %1717 = vmatpush2.msra.mxu0 %v1591_v50 }
 0x23b   : > { %v1158_v3 = vpop.permute.xlu0 %1157 }
 0x23c   : > { %v1164_v37 = vsel %vm1163_vm11, %v1158_v3, %v1160_v16  ;;  %v1132_v63 = vpop.permute.xlu1 %1131 }
 0x23d   : > { %1168 = vst [vmem:[#allocation2 + $0x50] sm:$0xf0] %v1164_v37  ;;  %v1138_v51 = vsel %vm1137_vm10, %v1132_v63, %v1134_v8 }
 0x23e   : > { %1142 = vst [vmem:[#allocation2 + $0x50] sm:$0xf] %v1138_v51 }
 0x241   : > { %v1590_v4 = vld [vmem:[#allocation2] sm:$0xff] }
 0x242   : > { %1718 = vmatprep.subr.mxu0 %v1590_v4 }
 0x245   : > { %v1589_v46 = vld [vmem:[#allocation2 + $0x50] sm:$0xff] }
 0x246   : > { %1719 = vmatpush2.msra.mxu0 %v1589_v46 }
 0x247   : > { %1721 = vmatmul.mubr.f32.vlgmr.msra.gmra.mxu0 %v1525_v62 }
 0x248   : > { %2717 = vmatprep.mubr.msk.f32.mxu0 %vm1607_vm12, %v1528_v29 }
 0x24b   : > { %1727 = vmatmul.mubr.f32.gmra.mxu0 %v1527_v13 }
 0x24c   : > { %2718 = vmatprep.mubr.msk.f32.mxu0 %vm1607_vm12, %v1530_v38 }
 0x24f   : > { %1733 = vmatmul.mubr.f32.gmra.mxu0 %v1529_v17 }
 0x250   : > { %2719 = vmatprep.mubr.msk.f32.mxu0 %vm1607_vm12, %v1532_v44 }
 0x253   : > { %1739 = vmatmul.mubr.f32.gmra.mxu0 %v1531_v56 }
 0x254   : > { %2720 = vmatprep.mubr.msk.f32.mxu0 %vm1607_vm12, %v1534_v60 }
 0x257   : > { %1745 = vmatmul.mubr.f32.gmra.mxu0 %v1533_v10 }
 0x258   : > { %2721 = vmatprep.mubr.msk.f32.mxu0 %vm1607_vm12, %v1536_v52 }
 0x25b   : > { %1751 = vmatmul.mubr.f32.gmra.mxu0 %v1535_v21 }
 0x25c   : > { %2722 = vmatprep.mubr.msk.f32.mxu0 %vm1607_vm12, %v1538_v9 }
 0x25f   : > { %1757 = vmatmul.mubr.f32.gmra.mxu0 %v1537_v53 }
 0x260   : > { %2723 = vmatprep.mubr.msk.f32.mxu0 %vm1607_vm12, %v1540_v30 }
 0x263   : > { %1763 = vmatmul.mubr.f32.gmra.mxu0 %v1539_v57 }
 0x264   : > { %2724 = vmatprep.mubr.msk.f32.mxu0 %vm1607_vm12, %v1542_v58 }
 0x267   : > { %1769 = vmatmul.mubr.f32.gmra.mxu0 %v1541_v59 }
 0x268   : > { %2725 = vmatprep.mubr.msk.f32.mxu0 %vm1607_vm12, %v1544_v31 }
 0x26b   : > { %1775 = vmatmul.mubr.f32.gmra.mxu0 %v1543_v15 }
 0x26c   : > { %2726 = vmatprep.mubr.msk.f32.mxu0 %vm1607_vm12, %v1546_v34 }
 0x26f   : > { %1781 = vmatmul.mubr.f32.gmra.mxu0 %v1545_v47 }
 0x270   : > { %2727 = vmatprep.mubr.msk.f32.mxu0 %vm1607_vm12, %v1548_v18 }
 0x273   : > { %1787 = vmatmul.mubr.f32.gmra.mxu0 %v1547_v2 }
 0x274   : > { %2728 = vmatprep.mubr.msk.f32.mxu0 %vm1607_vm12, %v1550_v61 }
 0x277   : > { %1793 = vmatmul.mubr.f32.gmra.mxu0 %v1549_v33 }
 0x278   : > { %2729 = vmatprep.mubr.msk.f32.mxu0 %vm1607_vm12, %v1552_v0 }
 0x27b   : > { %1799 = vmatmul.mubr.f32.gmra.mxu0 %v1551_v32 }
 0x27c   : > { %2730 = vmatprep.mubr.msk.f32.mxu0 %vm1607_vm12, %v1554_v5 }
 0x27f   : > { %1805 = vmatmul.mubr.f32.gmra.mxu0 %v1553_v6 }
 0x280   : > { %2731 = vmatprep.mubr.msk.f32.mxu0 %vm1607_vm12, %v1556_v7 }
 0x283   : > { %1811 = vmatmul.mubr.f32.gmra.mxu0 %v1555_v23 }
 0x284   : > { %1977 = vmatprep.mubr.f32.mxu0 %v3089_v1 }
 0x307   : > { %v3914_v11 = vpop.f32.mrf.mxu0 }
 0x309   : > { %v3916_v12 = vpop.f32.mrf.mxu0 }
 0x30a   : > { %v1818_v23 = vmax.f32 %v3916_v12, 0.0  ;;  %v3973_v12 = vld [vmem:[%s3308_s28 + $0xe8] sm:$0xff] }
 0x30b   : > { %v3918_v55 = vpop.f32.mrf.mxu0  ;;  %4539 = vst [vmem:[#allocation11_spill] sm:$0xff] %v3973_v12 }
 0x30c   : > { %v1819_v7 = vmax.f32 %v3918_v55, 0.0  ;;  %v3970_v55 = vld [vmem:[%s3308_s28 + $0xf0] sm:$0xff] }
 0x30d   : > { %v3920_v19 = vpop.f32.mrf.mxu0  ;;  %4538 = vst [vmem:[#allocation10_spill] sm:$0xff] %v3970_v55 }
 0x30e   : > { %v1820_v6 = vmax.f32 %v3920_v19, 0.0  ;;  %v1902_v19 = vld [vmem:[%s4501_s4 + $0x28] sm:$0xff] }
 0x30f   : > { %v3922_v39 = vpop.f32.mrf.mxu0 }
 0x310   : > { %v1821_v5 = vmax.f32 %v3922_v39, 0.0  ;;  %v1817_v39 = vmax.f32 %v3914_v11, 0.0  ;;  %v1897_v11 = vld [vmem:[%s4501_s4] sm:$0xff] }
 0x311   : > { %v3924_v14 = vpop.f32.mrf.mxu0 }
 0x312   : > { %v1822_v32 = vmax.f32 %v3924_v14, 0.0  ;;  %v1880_v14 = vld [vmem:[%s3308_s28 + $0xf8] sm:$0xff] }
 0x313   : > { %v3926_v35 = vpop.f32.mrf.mxu0 }
 0x314   : > { %v1823_v0 = vmax.f32 %v3926_v35, 0.0  ;;  %v3979_v35 = vld [vmem:[%s3308_s28 + $0xe0] sm:$0xff] }
 0x315   : > { %v3928_v20 = vpop.f32.mrf.mxu0  ;;  %4540 = vst [vmem:[#allocation12_spill] sm:$0xff] %v3979_v35 }
 0x316   : > { %v1824_v33 = vmax.f32 %v3928_v20, 0.0  ;;  %v1903_v20 = vld [vmem:[%s4501_s4 + $0x30] sm:$0xff] }
 0x317   : > { %v3930_v22 = vpop.f32.mrf.mxu0 }
 0x318   : > { %v1825_v61 = vmax.f32 %v3930_v22, 0.0  ;;  %v3987_v22 = vld [vmem:[%s3308_s28 + $0xd8] sm:$0xff] }
 0x319   : > { %v3932_v43 = vpop.f32.mrf.mxu0  ;;  %4541 = vst [vmem:[#allocation13_spill] sm:$0xff] %v3987_v22 }
 0x31a   : > { %v1826_v2 = vmax.f32 %v3932_v43, 0.0  ;;  %v3991_v43 = vld [vmem:[%s3308_s28 + $0xd0] sm:$0xff] }
 0x31b   : > { %v3934_v49 = vpop.f32.mrf.mxu0  ;;  %4542 = vst [vmem:[#allocation14_spill] sm:$0xff] %v3991_v43 }
 0x31c   : > { %v1827_v18 = vmax.f32 %v3934_v49, 0.0  ;;  %v3995_v49 = vld [vmem:[%s3308_s28 + $0xc8] sm:$0xff] }
 0x31d   : > { %v3936_v42 = vpop.f32.mrf.mxu0 }
 0x31e   : > { %v1828_v47 = vmax.f32 %v3936_v42, 0.0  ;;  %v1898_v42 = vld [vmem:[%s4501_s4 + $0x8] sm:$0xff] }
 0x31f   : > { %v3938_v26 = vpop.f32.mrf.mxu0 }
 0x320   : > { %v1829_v34 = vmax.f32 %v3938_v26, 0.0  ;;  %v4003_v26 = vld [vmem:[%s3308_s28 + $0xc0] sm:$0xff] }
 0x321   : > { %v3940_v27 = vpop.f32.mrf.mxu0 }
 0x322   : > { %v1830_v15 = vmax.f32 %v3940_v27, 0.0  ;;  %v1904_v27 = vld [vmem:[%s4501_s4 + $0x38] sm:$0xff] }
 0x323   : > { %v3942_v40 = vpop.f32.mrf.mxu0 }
 0x324   : > { %v1831_v31 = vmax.f32 %v3942_v40, 0.0  ;;  %v4011_v40 = vld [vmem:[%s3308_s28 + $0xb8] sm:$0xff] }
 0x325   : > { %v3944_v25 = vpop.f32.mrf.mxu0  ;;  %4543 = vst [vmem:[#allocation15_spill] sm:$0xff] %v4011_v40 }
 0x326   : > { %v1832_v59 = vmax.f32 %v3944_v25, 0.0  ;;  %v4015_v25 = vld [vmem:[%s3308_s28 + $0xb0] sm:$0xff] }
 0x327   : > { %v3946_v54 = vpop.f32.mrf.mxu0  ;;  %4544 = vst [vmem:[#allocation16_spill] sm:$0xff] %v4015_v25 }
 0x328   : > { %v1833_v58 = vmax.f32 %v3946_v54, 0.0  ;;  %v4019_v54 = vld [vmem:[%s3308_s28 + $0xa8] sm:$0xff] }
 0x329   : > { %v1772_v45 = vpop.f32.mrf.mxu0  ;;  %4545 = vst [vmem:[#allocation17_spill] sm:$0xff] %v4019_v54 }
 0x32a   : > { %v1834_v57 = vmax.f32 %v1772_v45, 0.0  ;;  %v1899_v45 = vld [vmem:[%s4501_s4 + $0x10] sm:$0xff] }
 0x32b   : > { %v1776_v41 = vpop.f32.mrf.mxu0 }
 0x32c   : > { %v1835_v30 = vmax.f32 %v1776_v41, 0.0  ;;  %v4027_v41 = vld [vmem:[%s3308_s28 + $0xa0] sm:$0xff] }
 0x32d   : > { %v1778_v8 = vpop.f32.mrf.mxu0  ;;  %4546 = vst [vmem:[#allocation18_spill] sm:$0xff] %v4027_v41 }
 0x32e   : > { %v1836_v53 = vmax.f32 %v1778_v8, 0.0  ;;  %v1905_v8 = vld [vmem:[%s4501_s4 + $0x40] sm:$0xff] }
 0x32f   : > { %v1782_v24 = vpop.f32.mrf.mxu0 }
 0x330   : > { %v1837_v9 = vmax.f32 %v1782_v24, 0.0  ;;  %v4035_v24 = vld [vmem:[%s3308_s28 + $0x98] sm:$0xff] }
 0x331   : > { %v1784_v48 = vpop.f32.mrf.mxu0  ;;  %4547 = vst [vmem:[#allocation19_spill] sm:$0xff] %v4035_v24 }
 0x332   : > { %v1838_v21 = vmax.f32 %v1784_v48, 0.0  ;;  %v4039_v48 = vld [vmem:[%s3308_s28 + $0x90] sm:$0xff] }
 0x333   : > { %v1788_v36 = vpop.f32.mrf.mxu0  ;;  %4548 = vst [vmem:[#allocation20_spill] sm:$0xff] %v4039_v48 }
 0x334   : > { %v1839_v52 = vmax.f32 %v1788_v36, 0.0  ;;  %v4043_v36 = vld [vmem:[%s3308_s28 + $0x88] sm:$0xff] }
 0x335   : > { %v1790_v16 = vpop.f32.mrf.mxu0 }
 0x336   : > { %v1840_v10 = vmax.f32 %v1790_v16, 0.0  ;;  %v1900_v16 = vld [vmem:[%s4501_s4 + $0x18] sm:$0xff] }
 0x337   : > { %v1794_v28 = vpop.f32.mrf.mxu0 }
 0x338   : > { %v1841_v60 = vmax.f32 %v1794_v28, 0.0  ;;  %v4051_v28 = vld [vmem:[%s3308_s28 + $0x80] sm:$0xff] }
 0x339   : > { %v1796_v50 = vpop.f32.mrf.mxu0 }
 0x33a   : > { %v1842_v56 = vmax.f32 %v1796_v50, 0.0  ;;  %v1906_v50 = vld [vmem:[%s4501_s4 + $0x48] sm:$0xff] }
 0x33b   : > { %v1800_v3 = vpop.f32.mrf.mxu0 }
 0x33c   : > { %v1843_v44 = vmax.f32 %v1800_v3, 0.0  ;;  %v4059_v3 = vld [vmem:[%s3308_s28 + $0x78] sm:$0xff] }
 0x33d   : > { %v1802_v37 = vpop.f32.mrf.mxu0  ;;  %4549 = vst [vmem:[#allocation21_spill] sm:$0xff] %v4059_v3 }
 0x33e   : > { %v1844_v17 = vmax.f32 %v1802_v37, 0.0  ;;  %v4063_v37 = vld [vmem:[%s3308_s28 + $0x70] sm:$0xff] }
 0x33f   : > { %v1806_v63 = vpop.f32.mrf.mxu0  ;;  %4550 = vst [vmem:[#allocation22_spill] sm:$0xff] %v4063_v37 }
 0x340   : > { %v1845_v38 = vmax.f32 %v1806_v63, 0.0  ;;  %v4067_v63 = vld [vmem:[%s3308_s28 + $0x68] sm:$0xff] }
 0x341   : > { %v1808_v51 = vpop.f32.mrf.mxu0  ;;  %4551 = vst [vmem:[#allocation23_spill] sm:$0xff] %v4067_v63 }
 0x342   : > { %v1846_v13 = vmax.f32 %v1808_v51, 0.0  ;;  %v1901_v51 = vld [vmem:[%s4501_s4 + $0x20] sm:$0xff] }
 0x343   : > { %v1812_v4 = vpop.f32.mrf.mxu0 }
 0x344   : > { %v1847_v29 = vmax.f32 %v1812_v4, 0.0  ;;  %v4075_v4 = vld [vmem:[%s3308_s28 + $0x60] sm:$0xff] }
 0x345   : > { %v1814_v62 = vpop.f32.mrf.mxu0  ;;  %4552 = vst [vmem:[#allocation24_spill] sm:$0xff] %v4075_v4 }
 0x346   : > { %v1848_v46 = vmax.f32 %v1814_v62, 0.0  ;;  %v1907_v62 = vld [vmem:[%s4501_s4 + $0x50] sm:$0xff] }
 0x348   : > { %1913 = vmatprep.subr.mxu0 %v1848_v46  ;;  %2739 = vmatprep.subr.mxu1 %v1848_v46  ;;  %v4083_v46 = vld [vmem:[%s3308_s28 + $0x58] sm:$0xff] }
 0x349   : > { %1914 = vmatpush1.msra.mxu0 %v1847_v29  ;;  %2755 = vmatpush1.msra.mxu1 %v1847_v29  ;;  %4553 = vst [vmem:[#allocation25_spill] sm:$0xff] %v4083_v46  ;;  %v4087_v29 = vld [vmem:[%s3308_s28 + $0x50] sm:$0xff] }
 0x34a   : > { %1915 = vmatprep.subr.mxu0 %v1846_v13  ;;  %2740 = vmatprep.subr.mxu1 %v1846_v13  ;;  %4554 = vst [vmem:[#allocation26_spill] sm:$0xff] %v4087_v29  ;;  %v4091_v13 = vld [vmem:[%s3308_s28 + $0x48] sm:$0xff] }
 0x34b   : > { %1916 = vmatpush1.msra.mxu0 %v1845_v38  ;;  %2756 = vmatpush1.msra.mxu1 %v1845_v38  ;;  %v4095_v38 = vld [vmem:[%s3308_s28 + $0x40] sm:$0xff] }
 0x34c   : > { %1917 = vmatprep.subr.mxu0 %v1844_v17  ;;  %2741 = vmatprep.subr.mxu1 %v1844_v17  ;;  %v1908_v17 = vld [vmem:[%s4501_s4 + $0x58] sm:$0xff] }
 0x34d   : > { %1918 = vmatpush1.msra.mxu0 %v1843_v44  ;;  %2757 = vmatpush1.msra.mxu1 %v1843_v44  ;;  %v4103_v44 = vld [vmem:[%s3308_s28 + $0x38] sm:$0xff] }
 0x34e   : > { %1919 = vmatprep.subr.mxu0 %v1842_v56  ;;  %2742 = vmatprep.subr.mxu1 %v1842_v56  ;;  %4555 = vst [vmem:[#allocation27_spill] sm:$0xff] %v4103_v44  ;;  %v4107_v56 = vld [vmem:[%s3308_s28 + $0x30] sm:$0xff] }
 0x34f   : > { %1920 = vmatpush1.msra.mxu0 %v1841_v60  ;;  %2758 = vmatpush1.msra.mxu1 %v1841_v60  ;;  %4556 = vst [vmem:[#allocation28_spill] sm:$0xff] %v4107_v56  ;;  %v4111_v60 = vld [vmem:[%s3308_s28 + $0x28] sm:$0xff] }
 0x350   : > { %1921 = vmatprep.subr.mxu0 %v1840_v10  ;;  %2743 = vmatprep.subr.mxu1 %v1840_v10  ;;  %4557 = vst [vmem:[#allocation29_spill] sm:$0xff] %v4111_v60  ;;  %v4115_v10 = vld [vmem:[%s3308_s28 + $0x20] sm:$0xff] }
 0x351   : > { %1922 = vmatpush1.msra.mxu0 %v1839_v52  ;;  %2759 = vmatpush1.msra.mxu1 %v1839_v52  ;;  %4558 = vst [vmem:[#allocation30_spill] sm:$0xff] %v4115_v10  ;;  %v1909_v52 = vld [vmem:[%s4501_s4 + $0x60] sm:$0xff] }
 0x352   : > { %1923 = vmatprep.subr.mxu0 %v1838_v21  ;;  %2744 = vmatprep.subr.mxu1 %v1838_v21  ;;  %v4123_v21 = vld [vmem:[%s3308_s28 + $0x18] sm:$0xff] }
 0x353   : > { %1924 = vmatpush1.msra.mxu0 %v1837_v9  ;;  %2760 = vmatpush1.msra.mxu1 %v1837_v9  ;;  %4559 = vst [vmem:[#allocation31_spill] sm:$0xff] %v4123_v21  ;;  %v4127_v9 = vld [vmem:[%s3308_s28 + $0x10] sm:$0xff] }
 0x354   : > { %1925 = vmatprep.subr.mxu0 %v1836_v53  ;;  %2745 = vmatprep.subr.mxu1 %v1836_v53  ;;  %4560 = vst [vmem:[#allocation32_spill] sm:$0xff] %v4127_v9  ;;  %v4131_v53 = vld [vmem:[%s3308_s28 + $0x8] sm:$0xff] }
 0x355   : > { %1926 = vmatpush1.msra.mxu0 %v1835_v30  ;;  %2761 = vmatpush1.msra.mxu1 %v1835_v30  ;;  %v4135_v30 = vld [vmem:[%s3308_s28] sm:$0xff] }
 0x356   : > { %1927 = vmatprep.subr.mxu0 %v1834_v57  ;;  %2746 = vmatprep.subr.mxu1 %v1834_v57  ;;  %v1910_v57 = vld [vmem:[%s4501_s4 + $0x68] sm:$0xff] }
 0x357   : > { %1928 = vmatpush1.msra.mxu0 %v1833_v58  ;;  %2762 = vmatpush1.msra.mxu1 %v1833_v58  ;;  %v1911_v58 = vld [vmem:[%s4501_s4 + $0x70] sm:$0xff] }
 0x358   : > { %1929 = vmatprep.subr.mxu0 %v1832_v59  ;;  %2747 = vmatprep.subr.mxu1 %v1832_v59  ;;  %v1912_v59 = vld [vmem:[%s4501_s4 + $0x78] sm:$0xff] }
 0x359   : > { %1930 = vmatpush1.msra.mxu0 %v1831_v31  ;;  %2763 = vmatpush1.msra.mxu1 %v1831_v31  ;;  %v1881_v31 = vld [vmem:[%s4500_s3] sm:$0xff] }
 0x35a   : > { %1931 = vmatprep.subr.mxu0 %v1830_v15  ;;  %2748 = vmatprep.subr.mxu1 %v1830_v15  ;;  %v1882_v15 = vld [vmem:[%s4500_s3 + $0x8] sm:$0xff] }
 0x35b   : > { %1932 = vmatpush1.msra.mxu0 %v1829_v34  ;;  %2764 = vmatpush1.msra.mxu1 %v1829_v34  ;;  %v1883_v34 = vld [vmem:[%s4500_s3 + $0x10] sm:$0xff] }
 0x35c   : > { %1933 = vmatprep.subr.mxu0 %v1828_v47  ;;  %2749 = vmatprep.subr.mxu1 %v1828_v47  ;;  %v1884_v47 = vld [vmem:[%s4500_s3 + $0x18] sm:$0xff] }
 0x35d   : > { %1934 = vmatpush1.msra.mxu0 %v1827_v18  ;;  %2765 = vmatpush1.msra.mxu1 %v1827_v18  ;;  %v1885_v18 = vld [vmem:[%s4500_s3 + $0x20] sm:$0xff] }
 0x35e   : > { %1935 = vmatprep.subr.mxu0 %v1826_v2  ;;  %2750 = vmatprep.subr.mxu1 %v1826_v2  ;;  %v1886_v2 = vld [vmem:[%s4500_s3 + $0x28] sm:$0xff] }
 0x35f   : > { %1936 = vmatpush1.msra.mxu0 %v1825_v61  ;;  %2766 = vmatpush1.msra.mxu1 %v1825_v61  ;;  %v1887_v61 = vld [vmem:[%s4500_s3 + $0x30] sm:$0xff] }
 0x360   : > { %1937 = vmatprep.subr.mxu0 %v1824_v33  ;;  %2751 = vmatprep.subr.mxu1 %v1824_v33  ;;  %v1888_v33 = vld [vmem:[%s4500_s3 + $0x38] sm:$0xff] }
 0x361   : > { %1938 = vmatpush1.msra.mxu0 %v1823_v0  ;;  %2767 = vmatpush1.msra.mxu1 %v1823_v0  ;;  %v1889_v0 = vld [vmem:[%s4500_s3 + $0x40] sm:$0xff] }
 0x362   : > { %1939 = vmatprep.subr.mxu0 %v1822_v32  ;;  %2752 = vmatprep.subr.mxu1 %v1822_v32  ;;  %v1890_v32 = vld [vmem:[%s4500_s3 + $0x48] sm:$0xff] }
 0x363   : > { %1940 = vmatpush1.msra.mxu0 %v1821_v5  ;;  %2768 = vmatpush1.msra.mxu1 %v1821_v5  ;;  %v1891_v5 = vld [vmem:[%s4500_s3 + $0x50] sm:$0xff] }
 0x364   : > { %1941 = vmatprep.subr.mxu0 %v1820_v6  ;;  %2753 = vmatprep.subr.mxu1 %v1820_v6  ;;  %v1892_v6 = vld [vmem:[%s4500_s3 + $0x58] sm:$0xff] }
 0x365   : > { %1942 = vmatpush1.msra.mxu0 %v1819_v7  ;;  %2769 = vmatpush1.msra.mxu1 %v1819_v7  ;;  %v1893_v7 = vld [vmem:[%s4500_s3 + $0x60] sm:$0xff] }
 0x366   : > { %1943 = vmatprep.subr.mxu0 %v1818_v23  ;;  %2754 = vmatprep.subr.mxu1 %v1818_v23  ;;  %v1894_v23 = vld [vmem:[%s4500_s3 + $0x68] sm:$0xff] }
 0x367   : > { %1944 = vmatpush1.msra.mxu0 %v1817_v39  ;;  %2770 = vmatpush1.msra.mxu1 %v1817_v39  ;;  %v1895_v39 = vld [vmem:[%s4500_s3 + $0x70] sm:$0xff] }
 0x368   : > { %2008 = vmatmul.mubr.f32.vlgmr.msra.gmra.mxu1 %v1902_v19  ;;  %2074 = vmatprep.subr.mxu1 %v1880_v14  ;;  %v1896_v19 = vld [vmem:[%s4500_s3 + $0x78] sm:$0xff] }
 0x369   : > { %2075 = vmatpush1.msra.mxu1 %v3970_v55  ;;  %2013 = vmatprep.mubr.f32.mxu1 %v3089_v1 }
 0x36a   : > { %2076 = vmatprep.subr.mxu1 %v3973_v12  ;;  %1978 = vmatmul.mubr.f32.vlgmr.msra.gmra.mxu0 %v1897_v11 }
 0x36b   : > { %2077 = vmatpush1.msra.mxu1 %v3979_v35  ;;  %1983 = vmatprep.mubr.f32.mxu0 %v3089_v1 }
 0x36c   : > { %2014 = vmatmul.mubr.f32.gmra.mxu1 %v1903_v20  ;;  %2078 = vmatprep.subr.mxu1 %v3987_v22 }
 0x36d   : > { %2019 = vmatprep.mubr.f32.mxu1 %v3089_v1  ;;  %2079 = vmatpush1.msra.mxu1 %v3991_v43 }
 0x36e   : > { %2080 = vmatprep.subr.mxu1 %v3995_v49  ;;  %1984 = vmatmul.mubr.f32.gmra.mxu0 %v1898_v42 }
 0x36f   : > { %2081 = vmatpush1.msra.mxu1 %v4003_v26  ;;  %1989 = vmatprep.mubr.f32.mxu0 %v3089_v1 }
 0x370   : > { %2020 = vmatmul.mubr.f32.gmra.mxu1 %v1904_v27  ;;  %2082 = vmatprep.subr.mxu1 %v4011_v40 }
 0x371   : > { %2025 = vmatprep.mubr.f32.mxu1 %v3089_v1  ;;  %2083 = vmatpush1.msra.mxu1 %v4015_v25 }
 0x372   : > { %2084 = vmatprep.subr.mxu1 %v4019_v54  ;;  %1990 = vmatmul.mubr.f32.gmra.mxu0 %v1899_v45 }
 0x373   : > { %2085 = vmatpush1.msra.mxu1 %v4027_v41  ;;  %1995 = vmatprep.mubr.f32.mxu0 %v3089_v1 }
 0x374   : > { %2026 = vmatmul.mubr.f32.gmra.mxu1 %v1905_v8  ;;  %2086 = vmatprep.subr.mxu1 %v4035_v24 }
 0x375   : > { %2031 = vmatprep.mubr.f32.mxu1 %v3089_v1  ;;  %2087 = vmatpush1.msra.mxu1 %v4039_v48 }
 0x376   : > { %2088 = vmatprep.subr.mxu1 %v4043_v36  ;;  %1996 = vmatmul.mubr.f32.gmra.mxu0 %v1900_v16 }
 0x377   : > { %2089 = vmatpush1.msra.mxu1 %v4051_v28  ;;  %2001 = vmatprep.mubr.f32.mxu0 %v3089_v1 }
 0x378   : > { %2032 = vmatmul.mubr.f32.gmra.mxu1 %v1906_v50  ;;  %2090 = vmatprep.subr.mxu1 %v4059_v3 }
 0x379   : > { %2037 = vmatprep.mubr.f32.mxu1 %v3089_v1  ;;  %2091 = vmatpush1.msra.mxu1 %v4063_v37 }
 0x37a   : > { %2092 = vmatprep.subr.mxu1 %v4067_v63  ;;  %2002 = vmatmul.mubr.f32.gmra.mxu0 %v1901_v51 }
 0x37b   : > { %2093 = vmatpush1.msra.mxu1 %v4075_v4 }
 0x37c   : > { %2038 = vmatmul.mubr.f32.gmra.mxu1 %v1907_v62  ;;  %2094 = vmatprep.subr.mxu1 %v4083_v46 }
 0x37d   : > { %2043 = vmatprep.mubr.f32.mxu1 %v3089_v1  ;;  %2095 = vmatpush1.msra.mxu1 %v4087_v29 }
 0x37e   : > { %2096 = vmatprep.subr.mxu1 %v4091_v13 }
 0x37f   : > { %2097 = vmatpush1.msra.mxu1 %v4095_v38 }
 0x380   : > { %2044 = vmatmul.mubr.f32.gmra.mxu1 %v1908_v17  ;;  %2098 = vmatprep.subr.mxu1 %v4103_v44 }
 0x381   : > { %2049 = vmatprep.mubr.f32.mxu1 %v3089_v1  ;;  %2099 = vmatpush1.msra.mxu1 %v4107_v56 }
 0x382   : > { %2100 = vmatprep.subr.mxu1 %v4111_v60 }
 0x383   : > { %2101 = vmatpush1.msra.mxu1 %v4115_v10 }
 0x384   : > { %2050 = vmatmul.mubr.f32.gmra.mxu1 %v1909_v52  ;;  %2102 = vmatprep.subr.mxu1 %v4123_v21 }
 0x385   : > { %2055 = vmatprep.mubr.f32.mxu1 %v3089_v1  ;;  %2103 = vmatpush1.msra.mxu1 %v4127_v9 }
 0x386   : > { %2104 = vmatprep.subr.mxu1 %v4131_v53 }
 0x387   : > { %2105 = vmatpush1.msra.mxu1 %v4135_v30 }
 0x388   : > { %2056 = vmatmul.mubr.f32.gmra.mxu1 %v1910_v57 }
 0x389   : > { %2061 = vmatprep.mubr.f32.mxu1 %v3089_v1 }
 0x38c   : > { %2062 = vmatmul.mubr.f32.gmra.mxu1 %v1911_v58 }
 0x38d   : > { %2067 = vmatprep.mubr.f32.mxu1 %v3089_v1 }
 0x390   : > { %2068 = vmatmul.mubr.f32.gmra.mxu1 %v1912_v59 }
 0x391   : > { %2138 = vmatprep.mubr.f32.mxu1 %v3089_v1 }
 0x394   : > { %2139 = vmatmul.mubr.f32.vlgmr.msra.gmra.mxu1 %v1881_v31 }
 0x395   : > { %2144 = vmatprep.mubr.f32.mxu1 %v3089_v1 }
 0x398   : > { %2145 = vmatmul.mubr.f32.gmra.mxu1 %v1882_v15 }
 0x399   : > { %2150 = vmatprep.mubr.f32.mxu1 %v3089_v1 }
 0x39c   : > { %2151 = vmatmul.mubr.f32.gmra.mxu1 %v1883_v34 }
 0x39d   : > { %2156 = vmatprep.mubr.f32.mxu1 %v3089_v1 }
 0x3a0   : > { %2157 = vmatmul.mubr.f32.gmra.mxu1 %v1884_v47 }
 0x3a1   : > { %2162 = vmatprep.mubr.f32.mxu1 %v3089_v1 }
 0x3a4   : > { %2163 = vmatmul.mubr.f32.gmra.mxu1 %v1885_v18 }
 0x3a5   : > { %2168 = vmatprep.mubr.f32.mxu1 %v3089_v1 }
 0x3a8   : > { %2169 = vmatmul.mubr.f32.gmra.mxu1 %v1886_v2 }
 0x3a9   : > { %2174 = vmatprep.mubr.f32.mxu1 %v3089_v1 }
 0x3ac   : > { %2175 = vmatmul.mubr.f32.gmra.mxu1 %v1887_v61 }
 0x3ad   : > { %2180 = vmatprep.mubr.f32.mxu1 %v3089_v1 }
 0x3b0   : > { %2181 = vmatmul.mubr.f32.gmra.mxu1 %v1888_v33 }
 0x3b1   : > { %2186 = vmatprep.mubr.f32.mxu1 %v3089_v1 }
 0x3b4   : > { %2187 = vmatmul.mubr.f32.gmra.mxu1 %v1889_v0 }
 0x3b5   : > { %2192 = vmatprep.mubr.f32.mxu1 %v3089_v1 }
 0x3b8   : > { %2193 = vmatmul.mubr.f32.gmra.mxu1 %v1890_v32 }
 0x3b9   : > { %2198 = vmatprep.mubr.f32.mxu1 %v3089_v1 }
 0x3bc   : > { %2199 = vmatmul.mubr.f32.gmra.mxu1 %v1891_v5 }
 0x3bd   : > { %2204 = vmatprep.mubr.f32.mxu1 %v3089_v1 }
 0x3c0   : > { %2205 = vmatmul.mubr.f32.gmra.mxu1 %v1892_v6 }
 0x3c1   : > { %2210 = vmatprep.mubr.f32.mxu1 %v3089_v1 }
 0x3c4   : > { %2211 = vmatmul.mubr.f32.gmra.mxu1 %v1893_v7 }
 0x3c5   : > { %2216 = vmatprep.mubr.f32.mxu1 %v3089_v1 }
 0x3c8   : > { %2217 = vmatmul.mubr.f32.gmra.mxu1 %v1894_v23 }
 0x3c9   : > { %2222 = vmatprep.mubr.f32.mxu1 %v3089_v1 }
 0x3cc   : > { %2223 = vmatmul.mubr.f32.gmra.mxu1 %v1895_v39 }
 0x3cd   : > { %2228 = vmatprep.mubr.f32.mxu1 %v3089_v1 }
 0x3d0   : > { %2229 = vmatmul.mubr.f32.gmra.mxu1 %v1896_v19 }
 0x428   : > { %v2009_v14 = vpop.f32.mrf.mxu1 }
 0x42a   : > { %v2011_v11 = vpop.f32.mrf.mxu1  ;;  %v1979_v2 = vpop.f32.mrf.mxu0 }
 0x42c   : > { %v2015_v20 = vpop.f32.mrf.mxu1  ;;  %v4246_v0 = vpop.f32.mrf.mxu0 }
 0x42e   : > { %v2017_v42 = vpop.f32.mrf.mxu1  ;;  %v1985_v6 = vpop.f32.mrf.mxu0 }
 0x430   : > { %v4216_v27 = vpop.f32.mrf.mxu1  ;;  %v1987_v39 = vpop.f32.mrf.mxu0 }
 0x432   : > { %v2023_v45 = vpop.f32.mrf.mxu1  ;;  %v1991_v3 = vpop.f32.mrf.mxu0 }
 0x434   : > { %v4218_v8 = vpop.f32.mrf.mxu1  ;;  %v1993_v25 = vpop.f32.mrf.mxu0 }
 0x436   : > { %v4220_v16 = vpop.f32.mrf.mxu1  ;;  %v1997_v12 = vpop.f32.mrf.mxu0 }
 0x438   : > { %v2033_v50 = vpop.f32.mrf.mxu1  ;;  %v1999_v60 = vpop.f32.mrf.mxu0 }
 0x43a   : > { %v2035_v51 = vpop.f32.mrf.mxu1 }
 0x43c   : > { %v2039_v62 = vpop.f32.mrf.mxu1 }
 0x43e   : > { %v4222_v1 = vpop.f32.mrf.mxu1 }
 0x440   : > { %v4224_v17 = vpop.f32.mrf.mxu1 }
 0x442   : > { %v4226_v52 = vpop.f32.mrf.mxu1 }
 0x444   : > { %v4228_v57 = vpop.f32.mrf.mxu1 }
 0x446   : > { %v4230_v58 = vpop.f32.mrf.mxu1 }
 0x448   : > { %v4232_v59 = vpop.f32.mrf.mxu1 }
 0x44a   : > { %v4234_v31 = vpop.f32.mrf.mxu1 }
 0x44c   : > { %v4236_v15 = vpop.f32.mrf.mxu1 }
 0x44e   : > { %v4238_v34 = vpop.f32.mrf.mxu1 }
 0x450   : > { %v4240_v47 = vpop.f32.mrf.mxu1 }
 0x452   : > { %v4242_v18 = vpop.f32.mrf.mxu1 }
 0x454   : > { %v2140_v61 = vpop.f32.mrf.mxu1 }
 0x456   : > { %v4244_v33 = vpop.f32.mrf.mxu1 }
 0x458   : > { %v2146_v32 = vpop.f32.mrf.mxu1 }
 0x459   : > { %v4256_v43 = vadd.f32 %v2146_v32, %v1985_v6 }
 0x45a   : > { %v2148_v5 = vpop.f32.mrf.mxu1 }
 0x45b   : > { %v4260_v9 = vadd.f32 %v2148_v5, %v1987_v39 }
 0x45c   : > { %v2152_v7 = vpop.f32.mrf.mxu1 }
 0x45e   : > { %v2154_v23 = vpop.f32.mrf.mxu1 }
 0x45f   : > { %v4277_v5 = vadd.f32 %v2154_v23, %v1993_v25 }
 0x460   : > { %v2158_v19 = vpop.f32.mrf.mxu1 }
 0x462   : > { %v2160_v40 = vpop.f32.mrf.mxu1 }
 0x463   : > { %v4248_v4 = vadd.f32 %v2160_v40, %v1999_v60 }
 0x464   : > { %v2164_v44 = vpop.f32.mrf.mxu1 }
 0x465   : > { %4561 = vst [vmem:[#allocation33_spill] sm:$0xff] %v4248_v4 }
 0x466   : > { %v2166_v55 = vpop.f32.mrf.mxu1 }
 0x468   : > { %v2170_v37 = vpop.f32.mrf.mxu1 }
 0x469   : > { %v4252_v24 = vadd.f32 %v2170_v37, %v2009_v14  ;;  %v4268_v37 = vadd.f32 %v2152_v7, %v1991_v3 }
 0x46a   : > { %v2172_v56 = vpop.f32.mrf.mxu1 }
 0x46b   : > { %v4258_v48 = vadd.f32 %v2172_v56, %v2011_v11  ;;  %v2269_v40 = vmax.f32 %v4256_v43, %v4252_v24 }
 0x46c   : > { %v2176_v54 = vpop.f32.mrf.mxu1 }
 0x46d   : > { %v4264_v60 = vadd.f32 %v2176_v54, %v2015_v20  ;;  %v2270_v32 = vmax.f32 %v4260_v9, %v4258_v48 }
 0x46e   : > { %v2178_v63 = vpop.f32.mrf.mxu1 }
 0x46f   : > { %v4272_v6 = vadd.f32 %v2178_v63, %v2017_v42  ;;  %v2271_v54 = vmax.f32 %v4268_v37, %v4264_v60 }
 0x470   : > { %v2182_v35 = vpop.f32.mrf.mxu1 }
 0x471   : > { %v4282_v3 = vadd.f32 %v2182_v35, %v4216_v27  ;;  %v2272_v25 = vmax.f32 %v4277_v5, %v4272_v6  ;;  %v2141_v35 = vadd.f32 %v2140_v61, %v1979_v2  ;;  %v2143_v2 = vadd.f32 %v4244_v33, %v4246_v0 }
 0x472   : > { %v2184_v41 = vpop.f32.mrf.mxu1 }
 0x473   : > { %v4250_v10 = vadd.f32 %v2184_v41, %v2023_v45  ;;  %v2003_v45 = vpop.f32.mrf.mxu0 }
 0x474   : > { %v2188_v22 = vpop.f32.mrf.mxu1  ;;  %v2165_v42 = vadd.f32 %v2164_v44, %v2003_v45 }
 0x475   : > { %4562 = vst [vmem:[#allocation34_spill] sm:$0xff] %v4250_v10  ;;  %v2274_v46 = vmax.f32 %v4248_v4, %v4250_v10  ;;  %v2005_v7 = vpop.f32.mrf.mxu0 }
 0x476   : > { %v2190_v21 = vpop.f32.mrf.mxu1  ;;  %v2267_v45 = vmax.f32 %v2141_v35, %v2165_v42 }
 0x478   : > { %v2194_v29 = vpop.f32.mrf.mxu1 }
 0x479   : > { %v4266_v41 = vadd.f32 %v2194_v29, %v2033_v50  ;;  %v4287_v50 = vadd.f32 %v2158_v19, %v1997_v12  ;;  %v2189_v12 = vadd.f32 %v2188_v22, %v4218_v8  ;;  %v2191_v22 = vadd.f32 %v2190_v21, %v4220_v16 }
 0x47a   : > { %v2196_v14 = vpop.f32.mrf.mxu1 }
 0x47b   : > { %v2277_v56 = vmax.f32 %v2269_v40, %v4266_v41  ;;  %v4275_v11 = vadd.f32 %v2196_v14, %v2035_v51  ;;  %v2167_v40 = vadd.f32 %v2166_v55, %v2005_v7  ;;  %v2275_v61 = vmax.f32 %v2267_v45, %v2189_v12 }
 0x47c   : > { %v2200_v39 = vpop.f32.mrf.mxu1 }
 0x47d   : > { %v2278_v29 = vmax.f32 %v2270_v32, %v4275_v11  ;;  %v4285_v20 = vadd.f32 %v2200_v39, %v2039_v62  ;;  %v2273_v62 = vmax.f32 %v4287_v50, %v4282_v3 }
 0x47e   : > { %v2202_v63 = vpop.f32.mrf.mxu1 }
 0x47f   : > { %v4292_v51 = vmax.f32 %v2271_v54, %v4285_v20  ;;  %v4295_v23 = vadd.f32 %v2202_v63, %v4222_v1 }
 0x480   : > { %v2206_v27 = vpop.f32.mrf.mxu1 }
 0x481   : > { %v4301_v19 = vmax.f32 %v2272_v25, %v4295_v23  ;;  %v4304_v44 = vadd.f32 %v2206_v27, %v4224_v17  ;;  %v2268_v17 = vmax.f32 %v2143_v2, %v2167_v40 }
 0x482   : > { %v2208_v14 = vpop.f32.mrf.mxu1 }
 0x483   : > { %v4307_v32 = vmax.f32 %v2273_v62, %v4304_v44  ;;  %v4310_v1 = vadd.f32 %v2208_v14, %v4226_v52  ;;  %v2276_v25 = vmax.f32 %v2268_v17, %v2191_v22 }
 0x484   : > { %v2212_v8 = vpop.f32.mrf.mxu1 }
 0x485   : > { %4563 = vst [vmem:[#allocation35_spill] sm:$0xff] %v4310_v1  ;;  %v4316_v39 = vmax.f32 %v2274_v46, %v4310_v1  ;;  %v2213_v55 = vadd.f32 %v2212_v8, %v4228_v57 }
 0x486   : > { %v2214_v54 = vpop.f32.mrf.mxu1 }
 0x487   : > { %v2283_v63 = vmax.f32 %v2275_v61, %v2213_v55  ;;  %v2215_v7 = vadd.f32 %v2214_v54, %v4230_v58 }
 0x488   : > { %v2218_v52 = vpop.f32.mrf.mxu1 }
 0x489   : > { %v2299_v27 = vsub.f32 %v2141_v35, %v2283_v63  ;;  %v2363_v62 = vsub.f32 %v2165_v42, %v2283_v63  ;;  %v2427_v14 = vsub.f32 %v2189_v12, %v2283_v63  ;;  %v2491_v33 = vsub.f32 %v2213_v55, %v2283_v63 }
 0x48a   : > { %v2284_v0 = vmax.f32 %v2276_v25, %v2215_v7  ;;  %v2219_v21 = vadd.f32 %v2218_v52, %v4232_v59  ;;  %v2220_v16 = vpop.f32.mrf.mxu1 }
 0x48b   : > { %v2307_v45 = vmul.f32 1.442695, %v2299_v27  ;;  %v2371_v46 = vmul.f32 1.442695, %v2363_v62  ;;  %v2435_v1 = vmul.f32 1.442695, %v2427_v14  ;;  %v2221_v57 = vadd.f32 %v2220_v16, %v4234_v31 }
 0x48c   : > { %v2499_v8 = vmul.f32 1.442695, %v2491_v33  ;;  %v2300_v10 = vsub.f32 %v2143_v2, %v2284_v0  ;;  %v2364_v61 = vsub.f32 %v2167_v40, %v2284_v0  ;;  %v2428_v4 = vsub.f32 %v2191_v22, %v2284_v0  ;;  %v2224_v58 = vpop.f32.mrf.mxu1 }
 0x48d   : > { %2910 = vpow2.f32 %v2307_v45  ;;  %v2492_v17 = vsub.f32 %v2215_v7, %v2284_v0  ;;  %v2285_v35 = vmax.f32 %v2277_v56, %v2219_v21  ;;  %v2286_v42 = vmax.f32 %v2278_v29, %v2221_v57 }
 0x48e   : > { %2912 = vpow2.f32 %v2371_v46  ;;  %v2309_v12 = vmul.f32 1.442695, %v2300_v10  ;;  %v2373_v55 = vmul.f32 1.442695, %v2364_v61  ;;  %v2226_v54 = vpop.f32.mrf.mxu1  ;;  %v2437_v59 = vmul.f32 1.442695, %v2428_v4 }
 0x48f   : > { %2914 = vpow2.f32 %v2435_v1  ;;  %v2301_v63 = vsub.f32 %v4256_v43, %v2285_v35  ;;  %v2365_v25 = vsub.f32 %v4252_v24, %v2285_v35  ;;  %v2501_v31 = vmul.f32 1.442695, %v2492_v17 }
 0x490   : > { %2916 = vpow2.f32 %v2499_v8  ;;  %v2429_v40 = vsub.f32 %v4266_v41, %v2285_v35  ;;  %v2493_v2 = vsub.f32 %v2219_v21, %v2285_v35  ;;  %v2230_v22 = vpop.f32.mrf.mxu1  ;;  %v2302_v56 = vsub.f32 %v4260_v9, %v2286_v42 }
 0x491   : > { %2918 = vpow2.f32 %v2309_v12  ;;  %v2311_v7 = vmul.f32 1.442695, %v2301_v63  ;;  %v2366_v10 = vsub.f32 %v4258_v48, %v2286_v42  ;;  %v2375_v29 = vmul.f32 1.442695, %v2365_v25 }
 0x492   : > { %2920 = vpow2.f32 %v2373_v55  ;;  %v2439_v1 = vmul.f32 1.442695, %v2429_v40  ;;  %v2232_v4 = vpop.f32.mrf.mxu1  ;;  %v2503_v43 = vmul.f32 1.442695, %v2493_v2  ;;  %v2430_v24 = vsub.f32 %v4275_v11, %v2286_v42 }
 0x493   : > { %2922 = vpow2.f32 %v2437_v59  ;;  %v2494_v52 = vsub.f32 %v2221_v57, %v2286_v42  ;;  %v2225_v41 = vadd.f32 %v2224_v58, %v4236_v15  ;;  %v2227_v27 = vadd.f32 %v2226_v54, %v4238_v34 }
 0x494   : > { %2924 = vpow2.f32 %v2501_v31  ;;  %v4331_v62 = vadd.f32 %v2230_v22, %v4240_v47  ;;  %v2313_v9 = vmul.f32 1.442695, %v2302_v56  ;;  %v2377_v48 = vmul.f32 1.442695, %v2366_v10 }
 0x495   : > { %2926 = vpow2.f32 %v2311_v7  ;;  %v4334_v14 = vadd.f32 %v2232_v4, %v4242_v18  ;;  %v2441_v33 = vmul.f32 1.442695, %v2430_v24  ;;  %v2287_v0 = vmax.f32 %v4292_v51, %v2225_v41  ;;  %v4564_v24 = vld [vmem:[#allocation32_spill] sm:$0xff] }
 0x496   : > { %2928 = vpow2.f32 %v2375_v29  ;;  %v2288_v11 = vmax.f32 %v4301_v19, %v2227_v27  ;;  %v2505_v21 = vmul.f32 1.442695, %v2494_v52  ;;  %v4340_v15 = vmax.f32 %v4307_v32, %v4331_v62 }
 0x497   : > { %2930 = vpow2.f32 %v2439_v1  ;;  %v4344_v34 = vmax.f32 %v4316_v39, %v4334_v14  ;;  %v2303_v47 = vsub.f32 %v4268_v37, %v2287_v0  ;;  %v2367_v18 = vsub.f32 %v4264_v60, %v2287_v0 }
 0x498   : > { %2932 = vpow2.f32 %v2503_v43  ;;  %v2431_v16 = vsub.f32 %v4285_v20, %v2287_v0  ;;  %v2495_v51 = vsub.f32 %v2225_v41, %v2287_v0  ;;  %v2304_v19 = vsub.f32 %v4277_v5, %v2288_v11  ;;  %v4566_v0 = vld [vmem:[#allocation20_spill] sm:$0xff] }
 0x499   : > { %2934 = vpow2.f32 %v2313_v9  ;;  %v2368_v45 = vsub.f32 %v4272_v6, %v2288_v11  ;;  %v2315_v32 = vmul.f32 1.442695, %v2303_v47  ;;  %v2379_v57 = vmul.f32 1.442695, %v2367_v18 }
 0x49a   : > { %v2911_v46 = vpop.eup %2910  ;;  %2936 = vpow2.f32 %v2377_v48  ;;  %v2443_v8 = vmul.f32 1.442695, %v2431_v16  ;;  %v2507_v37 = vmul.f32 1.442695, %v2495_v51  ;;  %v2317_v58 = vmul.f32 1.442695, %v2304_v19 }
 0x49b   : > { %v2913_v39 = vpop.eup %2912  ;;  %v2339_v61 = vmul.f32 %v2911_v46, %v4135_v30  ;;  %2938 = vpow2.f32 %v2441_v33  ;;  %v2381_v35 = vmul.f32 1.442695, %v2368_v45  ;;  %v2432_v42 = vsub.f32 %v4295_v23, %v2288_v11  ;;  %v4567_v45 = vld [vmem:[#allocation14_spill] sm:$0xff] }
 0x49c   : > { %v2915_v60 = vpop.eup %2914  ;;  %v2387_v17 = vadd.f32 %v2913_v39, %v2911_v46  ;;  %v2403_v20 = vmul.f32 %v2913_v39, %v4095_v38  ;;  %2940 = vpow2.f32 %v2505_v21  ;;  %v2496_v12 = vsub.f32 %v2227_v27, %v2288_v11 }
 0x49d   : > { %v2917_v5 = vpop.eup %2916  ;;  %v2467_v6 = vmul.f32 %v2915_v60, %v4051_v28  ;;  %2942 = vpow2.f32 %v2315_v32  ;;  %v2445_v38 = vmul.f32 1.442695, %v2432_v42  ;;  %v2433_v47 = vsub.f32 %v4304_v44, %v4340_v15  ;;  %v4568_v32 = vld [vmem:[#allocation31_spill] sm:$0xff]  ;;  %v4569_v44 = vld [vmem:[#allocation25_spill] sm:$0xff] }
 0x49e   : > { %v2919_v55 = vpop.eup %2918  ;;  %v2411_v54 = vadd.f32 %v2403_v20, %v2339_v61  ;;  %v2451_v59 = vadd.f32 %v2915_v60, %v2387_v17  ;;  %v2531_v30 = vmul.f32 %v2917_v5, %v4003_v26  ;;  %2944 = vpow2.f32 %v2379_v57  ;;  %v4570_v20 = vld [vmem:[#allocation19_spill] sm:$0xff] }
 0x49f   : > { %v2921_v63 = vpop.eup %2920  ;;  %v2340_v25 = vmul.f32 %v2919_v55, %v4131_v53  ;;  %2946 = vpow2.f32 %v2443_v8  ;;  %v2509_v31 = vmul.f32 1.442695, %v2496_v12  ;;  %v2305_v26 = vsub.f32 %v4287_v50, %v4340_v15 }
 0x4a0   : > { %v2923_v40 = vpop.eup %2922  ;;  %v2475_v2 = vadd.f32 %v2467_v6, %v2411_v54  ;;  %v4357_v22 = vadd.f32 %v2917_v5, %v2451_v59  ;;  %v2388_v28 = vadd.f32 %v2921_v63, %v2919_v55  ;;  %v2404_v23 = vmul.f32 %v2921_v63, %v4091_v13  ;;  %v4571_v6 = vld [vmem:[#allocation33_spill] sm:$0xff] }
 0x4a1   : > { %v2925_v7 = vpop.eup %2924  ;;  %v2468_v56 = vmul.f32 %v2923_v40, %v4043_v36  ;;  %2948 = vpow2.f32 %v2507_v37  ;;  %v2369_v53 = vsub.f32 %v4282_v3, %v4340_v15  ;;  %v2319_v36 = vmul.f32 1.442695, %v2305_v26  ;;  %v4565_v3 = vld [vmem:[#allocation26_spill] sm:$0xff]  ;;  %v4572_v63 = vld [vmem:[#allocation13_spill] sm:$0xff] }
 0x4a2   : > { %v2927_v10 = vpop.eup %2926  ;;  %v4365_v29 = vadd.f32 %v2531_v30, %v2475_v2  ;;  %2950 = vrcp.f32 %v4357_v22  ;;  %v2412_v1 = vadd.f32 %v2404_v23, %v2340_v25  ;;  %v2452_v4 = vadd.f32 %v2923_v40, %v2388_v28  ;;  %v4574_v23 = vld [vmem:[#allocation24_spill] sm:$0xff] }
 0x4a3   : > { %v2929_v43 = vpop.eup %2928  ;;  %v2532_v13 = vmul.f32 %v2925_v7, %v3995_v49  ;;  %v2341_v52 = vmul.f32 %v2927_v10, %v4564_v24  ;;  %2952 = vpow2.f32 %v2317_v58  ;;  %v2383_v21 = vmul.f32 1.442695, %v2369_v53 }
 0x4a4   : > { %v2931_v41 = vpop.eup %2930  ;;  %v2476_v27 = vadd.f32 %v2468_v56, %v2412_v1  ;;  %v4370_v50 = vadd.f32 %v2925_v7, %v2452_v4  ;;  %v2389_v9 = vadd.f32 %v2929_v43, %v2927_v10  ;;  %v2405_v48 = vmul.f32 %v2929_v43, %v4565_v3  ;;  %v4575_v56 = vld [vmem:[#allocation18_spill] sm:$0xff] }
 0x4a5   : > { %v2933_v33 = vpop.eup %2932  ;;  %v2469_v11 = vmul.f32 %v2931_v41, %v4566_v0  ;;  %2954 = vpow2.f32 %v2381_v35  ;;  %v2447_v8 = vmul.f32 1.442695, %v2433_v47  ;;  %v2497_v5 = vsub.f32 %v4331_v62, %v4340_v15  ;;  %v4576_v10 = vld [vmem:[#allocation34_spill] sm:$0xff] }
 0x4a6   : > { %v2935_v49 = vpop.eup %2934  ;;  %v4376_v18 = vadd.f32 %v2532_v13, %v2476_v27  ;;  %2956 = vrcp.f32 %v4370_v50  ;;  %v2413_v16 = vadd.f32 %v2405_v48, %v2341_v52  ;;  %v2453_v51 = vadd.f32 %v2931_v41, %v2389_v9  ;;  %v4578_v9 = vld [vmem:[#allocation35_spill] sm:$0xff] }
 0x4a7   : > { %v2937_v19 = vpop.eup %2936  ;;  %v2533_v46 = vmul.f32 %v2933_v33, %v4567_v45  ;;  %v2342_v57 = vmul.f32 %v2935_v49, %v4568_v32  ;;  %2958 = vpow2.f32 %v2445_v38  ;;  %v2306_v42 = vsub.f32 %v4571_v6, %v4344_v34  ;;  %v4573_v38 = vld [vmem:[#allocation30_spill] sm:$0xff]  ;;  %v4580_v32 = vld [vmem:[#allocation23_spill] sm:$0xff] }
 0x4a8   : > { %v2939_v39 = vpop.eup %2938  ;;  %v2477_v61 = vadd.f32 %v2469_v11, %v2413_v16  ;;  %v4381_v37 = vadd.f32 %v2933_v33, %v2453_v51  ;;  %v2390_v58 = vadd.f32 %v2937_v19, %v2935_v49  ;;  %v2406_v60 = vmul.f32 %v2937_v19, %v4569_v44 }
 0x4a9   : > { %v2941_v17 = vpop.eup %2940  ;;  %v2470_v35 = vmul.f32 %v2939_v39, %v4570_v20  ;;  %2960 = vpow2.f32 %v2509_v31  ;;  %v2511_v31 = vmul.f32 1.442695, %v2497_v5  ;;  %v2321_v53 = vmul.f32 1.442695, %v2306_v42 }
 0x4aa   : > { %v2943_v12 = vpop.eup %2942  ;;  %v4389_v55 = vadd.f32 %v2533_v46, %v2477_v61  ;;  %2962 = vrcp.f32 %v4381_v37  ;;  %v2414_v54 = vadd.f32 %v2406_v60, %v2342_v57  ;;  %v2454_v59 = vadd.f32 %v2939_v39, %v2390_v58 }
 0x4ab   : > { %v2945_v30 = vpop.eup %2944  ;;  %v2534_v25 = vmul.f32 %v2941_v17, %v4572_v63  ;;  %v2343_v40 = vmul.f32 %v2943_v12, %v4573_v38  ;;  %2964 = vpow2.f32 %v2319_v36  ;;  %v2370_v1 = vsub.f32 %v4576_v10, %v4344_v34  ;;  %v4577_v36 = vld [vmem:[#allocation12_spill] sm:$0xff] }
 0x4ac   : > { %v2947_v2 = vpop.eup %2946  ;;  %v2478_v28 = vadd.f32 %v2470_v35, %v2414_v54  ;;  %v4394_v62 = vadd.f32 %v2941_v17, %v2454_v59  ;;  %v2391_v15 = vadd.f32 %v2945_v30, %v2943_v12  ;;  %v2407_v7 = vmul.f32 %v2945_v30, %v4574_v23  ;;  %v4582_v12 = vld [vmem:[#allocation11_spill] sm:$0xff] }
 0x4ad   : > { %v2471_v26 = vmul.f32 %v2947_v2, %v4575_v56  ;;  %2966 = vpow2.f32 %v2383_v21  ;;  %v2385_v27 = vmul.f32 1.442695, %v2370_v1  ;;  %v2434_v3 = vsub.f32 %v4578_v9, %v4344_v34  ;;  %v4579_v21 = vld [vmem:[#allocation29_spill] sm:$0xff]  ;;  %v4585_v1 = vld [vmem:[#allocation16_spill] sm:$0xff] }
 0x4ae   : > { %v2949_v4 = vpop.eup %2948  ;;  %v4400_v43 = vadd.f32 %v2534_v25, %v2478_v28  ;;  %2968 = vrcp.f32 %v4394_v62  ;;  %v2415_v13 = vadd.f32 %v2407_v7, %v2343_v40  ;;  %v2455_v24 = vadd.f32 %v2947_v2, %v2391_v15  ;;  %v4583_v25 = vld [vmem:[#allocation28_spill] sm:$0xff]  ;;  %v4584_v15 = vld [vmem:[#allocation22_spill] sm:$0xff] }
 0x4af   : > { %v2951_v52 = vpop.eup %2950  ;;  %v2535_v41 = vmul.f32 %v2949_v4, %v4577_v36  ;;  %2970 = vpow2.f32 %v2447_v8  ;;  %v2449_v49 = vmul.f32 1.442695, %v2434_v3  ;;  %v2498_v16 = vsub.f32 %v4334_v14, %v4344_v34  ;;  %v4581_v34 = vld [vmem:[#allocation17_spill] sm:$0xff]  ;;  %v4587_v3 = vld [vmem:[#allocation27_spill] sm:$0xff] }
 0x4b0   : > { %v2953_v48 = vpop.eup %2952  ;;  %v2555_v33 = vmul.f32 %v2951_v52, %v4357_v22  ;;  %v2479_v0 = vadd.f32 %v2471_v26, %v2415_v13  ;;  %v4407_v11 = vadd.f32 %v2949_v4, %v2455_v24  ;;  %2972 = vpow2.f32 %v2511_v31 }
 0x4b1   : > { %v2344_v47 = vmul.f32 %v2953_v48, %v4579_v21  ;;  %2974 = vpow2.f32 %v2321_v53  ;;  %v2513_v8 = vmul.f32 1.442695, %v2498_v16 }
 0x4b2   : > { %v2955_v51 = vpop.eup %2954  ;;  %v2563_v19 = vsub.f32 2.0, %v2555_v33  ;;  %v4413_v45 = vadd.f32 %v2535_v41, %v2479_v0  ;;  %2976 = vrcp.f32 %v4407_v11 }
 0x4b3   : > { %v2957_v46 = vpop.eup %2956  ;;  %v2392_v22 = vadd.f32 %v2955_v51, %v2953_v48  ;;  %v2408_v57 = vmul.f32 %v2955_v51, %v4580_v32  ;;  %2978 = vpow2.f32 %v2385_v27  ;;  %v4586_v27 = vld [vmem:[#allocation10_spill] sm:$0xff] }
 0x4b4   : > { %v2959_v39 = vpop.eup %2958  ;;  %v2571_v61 = vmul.f32 %v2951_v52, %v2563_v19  ;;  %v2556_v58 = vmul.f32 %v2957_v46, %v4370_v50  ;;  %2980 = vpow2.f32 %v2449_v49 }
 0x4b5   : > { %v2416_v44 = vadd.f32 %v2408_v57, %v2344_v47  ;;  %v2456_v14 = vadd.f32 %v2959_v39, %v2392_v22  ;;  %v2472_v60 = vmul.f32 %v2959_v39, %v4581_v34  ;;  %2982 = vpow2.f32 %v2513_v8  ;;  %v2530_v22 = vld [vmem:[%s3308_s28 + $0xf8] sm:$0xff]  ;;  %v4589_v8 = vld [vmem:[#allocation15_spill] sm:$0xff]  ;;  %s2738_s28 = sshll.u32 %s3228_s22, 10  ;;  %s3175_s22 = smov [#allocation7]  }
 0x4b6   : > { %v2961_v17 = vpop.eup %2960  ;;  %v2579_v20 = vmul.f32 %v2571_v61, %v4365_v29  ;;  %v2564_v35 = vsub.f32 2.0, %v2556_v58  ;;  %s4450_s15 = scalar_lea.hbm %s4502_s5, %s2738_s28  ;;  %s3024_s9 = sshll.u32 %s3175_s22, 4  ;;  %s3025_s9 = int_to_ptr.vmem [resolvable:$false] %s3024_s9 }
 0x4b7   : > { %v2963_v5 = vpop.eup %2962  ;;  %v2480_v6 = vadd.f32 %v2472_v60, %v2416_v44  ;;  %v2520_v42 = vadd.f32 %v2961_v17, %v2456_v14  ;;  %v2536_v54 = vmul.f32 %v2961_v17, %v4582_v12  ;;  %s3026_s29 = scalar_lea.vmem %s3025_s9, 2048  ;;  %p3027_p7 = scmp.lt.s32.totalorder %s4452_s13, %s3025_s9 }
 0x4b8   : > { %v2965_v59 = vpop.eup %2964  ;;  %2587 = vst [vmem:[%s4421_s14] sm:$0xff] %v2579_v20  ;;  %v2572_v50 = vmul.f32 %v2957_v46, %v2564_v35  ;;  %v2557_v30 = vmul.f32 %v2963_v5, %v4381_v37  ;;  %p3028_p8 = scmp.lt.s32.totalorder %s3026_s29, %s3020_s8 }
 0x4b9   : > { %v2544_v63 = vadd.f32 %v2536_v54, %v2480_v6  ;;  %2984 = vrcp.f32 %v2520_v42  ;;  %v2345_v38 = vmul.f32 %v2965_v59, %v4583_v25 }
 0x4ba   : > { %v2967_v29 = vpop.eup %2966  ;;  %v2580_v40 = vmul.f32 %v2572_v50, %v4376_v18  ;;  %v2565_v31 = vsub.f32 2.0, %v2557_v30  ;;  %p3029_p10 = por %p3028_p8, %p3027_p7 }
 0x4bb   : > { %v2969_v2 = vpop.eup %2968  ;;  %v2393_v28 = vadd.f32 %v2967_v29, %v2965_v59  ;;  %v2409_v23 = vmul.f32 %v2967_v29, %v4584_v15 }
 0x4bc   : > { %v2971_v7 = vpop.eup %2970  ;;  %2588 = vst [vmem:[%s4421_s14 + $0x8] sm:$0xff] %v2580_v40  ;;  %v2573_v56 = vmul.f32 %v2963_v5, %v2565_v31  ;;  %v2558_v26 = vmul.f32 %v2969_v2, %v4394_v62  ;;  %p3030_p0 = pnand %p3029_p10, %p3023_p5 }
 0x4bd   : > { %v2973_v53 = vpop.eup %2972  ;;  %v2417_v37 = vadd.f32 %v2409_v23, %v2345_v38  ;;  %v2457_v10 = vadd.f32 %v2971_v7, %v2393_v28  ;;  %v2473_v4 = vmul.f32 %v2971_v7, %v4585_v1 }
 0x4be   : > { %v2975_v13 = vpop.eup %2974  ;;  %v2581_v24 = vmul.f32 %v2573_v56, %v4389_v55  ;;  %v2566_v18 = vsub.f32 2.0, %v2558_v26  ;;  %v2537_v9 = vmul.f32 %v2973_v53, %v4586_v27  ;;  %v4588_v55 = vld [vmem:[#allocation21_spill] sm:$0xff] }
 0x4bf   : > { %v2977_v52 = vpop.eup %2976  ;;  %v2481_v36 = vadd.f32 %v2473_v4, %v2417_v37  ;;  %v2521_v41 = vadd.f32 %v2973_v53, %v2457_v10  ;;  %v2346_v48 = vmul.f32 %v2975_v13, %v4587_v3 }
 0x4c0   : > { %v2979_v33 = vpop.eup %2978  ;;  %2589 = vst [vmem:[%s4421_s14 + $0x10] sm:$0xff] %v2581_v24  ;;  %v2574_v62 = vmul.f32 %v2969_v2, %v2566_v18  ;;  %v2559_v0 = vmul.f32 %v2977_v52, %v4407_v11 }
 0x4c1   : > { %v2981_v21 = vpop.eup %2980  ;;  %v2545_v47 = vadd.f32 %v2537_v9, %v2481_v36  ;;  %2986 = vrcp.f32 %v2521_v41  ;;  %v2394_v49 = vadd.f32 %v2979_v33, %v2975_v13  ;;  %v2410_v16 = vmul.f32 %v2979_v33, %v4588_v55 }
 0x4c2   : > { %v2983_v51 = vpop.eup %2982  ;;  %v2582_v19 = vmul.f32 %v2574_v62, %v4400_v43  ;;  %v2567_v46 = vsub.f32 2.0, %v2559_v0  ;;  %v2474_v39 = vmul.f32 %v2981_v21, %v4589_v8 }
 0x4c3   : > { %v2418_v32 = vadd.f32 %v2410_v16, %v2346_v48  ;;  %v2458_v57 = vadd.f32 %v2981_v21, %v2394_v49  ;;  %v2538_v44 = vmul.f32 %v2983_v51, %v2530_v22 }
 0x4c4   : > { %2590 = vst [vmem:[%s4421_s14 + $0x18] sm:$0xff] %v2582_v19  ;;  %v2575_v61 = vmul.f32 %v2977_v52, %v2567_v46 }
 0x4c5   : > { %v2482_v11 = vadd.f32 %v2474_v39, %v2418_v32  ;;  %v2522_v58 = vadd.f32 %v2983_v51, %v2458_v57 }
 0x4c6   : > { %v2985_v14 = vpop.eup %2984  ;;  %v2583_v34 = vmul.f32 %v2575_v61, %v4413_v45 }
 0x4c7   : > { %v2560_v60 = vmul.f32 %v2985_v14, %v2520_v42  ;;  %v2546_v17 = vadd.f32 %v2538_v44, %v2482_v11  ;;  %2988 = vrcp.f32 %v2522_v58 }
 0x4c8   : > { %2591 = vst [vmem:[%s4421_s14 + $0x20] sm:$0xff] %v2583_v34 }
 0x4c9   : > { %v2568_v43 = vsub.f32 2.0, %v2560_v60 }
 0x4cb   : > { %v2576_v20 = vmul.f32 %v2985_v14, %v2568_v43 }
 0x4cd   : > { %v2584_v35 = vmul.f32 %v2576_v20, %v2544_v63 }
 0x4ce   : > { %v2987_v5 = vpop.eup %2986 }
 0x4cf   : > { %2592 = vst [vmem:[%s4421_s14 + $0x28] sm:$0xff] %v2584_v35  ;;  %v2561_v6 = vmul.f32 %v2987_v5, %v2521_v41 }
 0x4d1   : > { %v2569_v12 = vsub.f32 2.0, %v2561_v6 }
 0x4d3   : > { %v2577_v54 = vmul.f32 %v2987_v5, %v2569_v12 }
 0x4d4   : > { %v2989_v59 = vpop.eup %2988 }
 0x4d5   : > { %v2585_v45 = vmul.f32 %v2577_v54, %v2545_v47  ;;  %v2562_v50 = vmul.f32 %v2989_v59, %v2522_v58 }
 0x4d7   : > { %2593 = vst [vmem:[%s4421_s14 + $0x30] sm:$0xff] %v2585_v45  ;;  %v2570_v42 = vsub.f32 2.0, %v2562_v50 }
 0x4d9   : > { %v2578_v30 = vmul.f32 %v2989_v59, %v2570_v42 }
 0x4db   : > { %v2586_v63 = vmul.f32 %v2578_v30, %v2546_v17 }
 0x4dd   : > { %2594 = vst [vmem:[%s4421_s14 + $0x38] sm:$0xff] %v2586_v63 }
 0x4de   : > { %3033 = shalt.err (!%p3030_p0)
}
 0x4df   : > { %s3034_s7 = scalar_lea.hbm %s4450_s15, 1024  ;;  %s3038_s12 = scalar_lea.hbm %s4502_s5, 2048 }
 0x4e0   : > { %p3035_p2 = scmp.ne.s32.totalorder %s4450_s15, %s3034_s7  ;;  %p3039_p3 = scmp.lt.s32.totalorder %s4450_s15, %s4502_s5 }
 0x4e1   : > { %p3040_p6 = scmp.lt.s32.totalorder %s3038_s12, %s3034_s7 }
 0x4e2   : > { %p3036_p9 = pnand %p3035_p2, %p4590_p13 }
 0x4e3   : > { %p3041_p11 = por %p3040_p6, %p3039_p3 }
 0x4e4   : > { %p3037_p1 = pneg %p3036_p9 }
 0x4e6   : > { %p3042_p12 = pnand %p3041_p11, %p3037_p1 }
 0x4e8   : > { %3045 = shalt.err (!%p3042_p12)
}
 0x4e9   : > { %s3176_s28 = smov 256   ;;  %s4591_s17 = smov 16  }
 0x4ea   : > { %2774 = dma.vmem_to_hbm [thread:$0]  (%p4590_p13), %s4452_s13, 1024, %s4450_s15, %s2596_s16, %s3176_s28, %s3176_s28, %s4591_s17  }
 0x4eb PF: > { %s2624_s26 = sand.u32 1, %s3072_s18   ;;  %p4592_p4 = scmp.ne.s32.totalorder %s4535_s6, 0 }
 0x4ec   : > { %p4593_p5 = scmp.ge.s32.totalorder %s3084_s21, 2  ;;  %s2625_s8 = scalar_lea.sflag [#allocation6], %s2624_s26 }
 0x4ee   : > { %p2781_p7 = pnand %p4593_p5, %p4592_p4 }
 0x4f0   : > { %p2782_p8 = pneg %p2781_p7 }
 0x4f2   : > { %3067 = dma.done.wait (%p2782_p8), %s2625_s8, 1024  }
 0x4f3   : > { %3069 = vsyncadd (%p2782_p8), %s2625_s8, 4294966272  ;;  %p18_p10 = scmp.ge.s32.totalorder %s3232_s24, 4   ;;  %s4594_s18 = smov %s3076_s19 }
 0x4f4   : > { %s4595_s19 = smov %s3080_s20  ;;  %s4596_s20 = smov %s3244_s27 }
 0x4f5   : > { %s4597_s21 = smov %s3232_s24  ;;  %20 = sbr.rel (!%p18_p10) target bundleno = 5 (0x5), region = 88 }
 0x4fa   :  { %2630 = vsyncpa [#allocation5], 1 }
 0x4fb   :  { %2632 = vsyncpa [#allocation5 + $0x1], 1 }
 0x4fc   :  { %2633 = vsyncpa [#allocation6], 1 }
 0x4fd   :  { %2635 = vsyncpa [#allocation6 + $0x1], 1 }

</bundles_post_ra>
